<compile_context>
chip_gen: v7x
topology: tpu7x:2x2x1
jax: 0.10.0
libtpu: 0.0.40
codegen_flags: <defaults>
</compile_context>

<pallas_src>
import functools

import jax
import jax.numpy as jnp
from jax import lax
from jax.experimental import pallas as pl
from jax.experimental.pallas import tpu as pltpu


def _gru_chunk_kernel(len_ref, gates_ref, whh_t_ref, bhn_ref,
                      seq_ref, hn_ref, *, t_chunk, hid_size, b_block, mxu_dtype):
    """One grid step = (one batch block) x (one chunk of t_chunk GRU timesteps)."""
    c = pl.program_id(1)          # time-chunk index (inner, sequential axis)
    H = hid_size

    @pl.when(c == 0)
    def _():
        hn_ref[...] = jnp.zeros_like(hn_ref)           # h_0 = 0 for this batch block

    lens = len_ref[...]                                # (b_block, 1) int32
    whh_t = whh_t_ref[...]                             # (H, 3H) mxu_dtype (pre-transposed)
    # Hoisted broadcast of the n-gate hidden bias (JAX does not CSE broadcast_in_dim).
    b_hn_b = jnp.broadcast_to(bhn_ref[...].astype(jnp.float32), (b_block, H))

    h = hn_ref[...]                                    # (b_block, H) f32 carried state
    t_base = c * t_chunk

    # Statically unrolled inner time loop: static ref indices, one MXU matmul/step.
    for tt in range(t_chunk):
        gi = gates_ref[tt].astype(jnp.float32)         # (b_block, 3H) precomputed gates
        # bf16 MXU operands, f32 accumulation; carry/activations stay f32.
        gh = jnp.dot(h.astype(mxu_dtype), whh_t,
                     preferred_element_type=jnp.float32)          # (b_block, 3H)

        # PyTorch GRU gate order: r, z, n.
        r = jax.nn.sigmoid(gi[:, 0:H] + gh[:, 0:H])
        z = jax.nn.sigmoid(gi[:, H:2 * H] + gh[:, H:2 * H])
        n = jnp.tanh(gi[:, 2 * H:3 * H] + r * (gh[:, 2 * H:3 * H] + b_hn_b))
        h_new = (1.0 - z) * n + z * h

        # Packed-sequence mask: only rows with length > t advance.
        valid = (t_base + tt) < lens                   # (b_block, 1) bool
        h = jnp.where(valid, h_new, h)                 # freeze finished rows
        seq_ref[tt] = jnp.where(valid, h, 0.0)         # padded positions -> 0

    hn_ref[...] = h


def encoder_rnn_forward(token_ids, lengths, params, *, t_chunk=None, b_block=None,
                        mxu_dtype=jnp.bfloat16, gates_dtype=jnp.float32):
    """Mirrors EncoderRNN.forward: embedding -> pack -> GRU -> pad.

    token_ids : (B, T) int32
    lengths   : (B,)   int32, descending (enforce_sorted), lengths[0] == T
    mxu_dtype : dtype of the recurrent matmul operands (bf16 recommended).
    gates_dtype: storage dtype of the precomputed gates stream (bf16 on v6e/v7x
                 halves the dominant HBM stream; gate math stays f32 in-kernel).
    returns (rnn_seq (T, B, H), h_n (1, B, H))
    """
    emb_tbl = params["embedding"]                     # (V, E)
    wih, whh = params["w_ih"], params["w_hh"]         # (3H, E), (3H, H)
    bih, bhh = params["b_ih"], params["b_hh"]         # (1, 3H), (1, 3H)

    B, T = token_ids.shape
    H = whh.shape[1]
    V = emb_tbl.shape[0]

    # ---- batch blocking (fills MXU M rows; shards across v7x TensorCores) ----
    if b_block is None or B % b_block != 0 or (b_block != B and b_block % 8 != 0):
        b_block = B
    n_bblk = B // b_block

    # ---- adaptive time chunking (amortize per-grid-step overhead) ----
    if t_chunk is None:
        t_chunk = T if T <= 64 else 32
    t_chunk = min(t_chunk, T)
    n_chunks = pl.cdiv(T, t_chunk)
    T_pad = n_chunks * t_chunk

    # ---- glue (XLA): hoisted input projection, time-major, biases folded ----
    # b_ih + b_hh[r,z] folded in; the n-gate hidden bias stays in-kernel because
    # of  r * (h @ W_hh_n^T + b_hn).
    bias_fold = bih + jnp.concatenate(
        [bhh[:, :2 * H], jnp.zeros((1, H), bhh.dtype)], axis=1)
    if V <= B * T:
        # Small vocab: project the embedding table once, gather gates directly.
        gate_tbl = emb_tbl @ wih.T + bias_fold                       # (V, 3H)
        gates_x = jnp.take(gate_tbl, token_ids.T, axis=0)            # (T, B, 3H)
    else:
        x_emb = jnp.take(emb_tbl, token_ids, axis=0)                 # (B, T, E)
        gates_x = jnp.einsum("bte,ge->tbg", x_emb, wih) + bias_fold  # (T, B, 3H)
    gates_x = gates_x.astype(gates_dtype)
    if T_pad != T:
        # Padded timesteps are masked out in-kernel (t >= lengths for every row).
        gates_x = jnp.pad(gates_x, ((0, T_pad - T), (0, 0), (0, 0)))

    whh_t = whh.T.astype(mxu_dtype)                                  # (H, 3H)
    b_hn = bhh[:, 2 * H:]                                            # (1, H)
    len2d = lengths.astype(jnp.int32).reshape(B, 1)                  # (B, 1)

    kernel = functools.partial(_gru_chunk_kernel, t_chunk=t_chunk, hid_size=H,
                               b_block=b_block, mxu_dtype=mxu_dtype)

    rnn_seq, h_last = pl.pallas_call(
        kernel,
        out_shape=(
            jax.ShapeDtypeStruct((T_pad, B, H), jnp.float32),
            jax.ShapeDtypeStruct((B, H), jnp.float32),
        ),
        grid=(n_bblk, n_chunks),                                     # (parallel, sequential)
        in_specs=[
            pl.BlockSpec((b_block, 1), lambda b, c: (b, 0)),         # lengths
            pl.BlockSpec((t_chunk, b_block, 3 * H),
                         lambda b, c: (c, b, 0)),                    # precomputed gates
            pl.BlockSpec((H, 3 * H), lambda b, c: (0, 0),
                         pipeline_mode=pl.Buffered(1)),              # W_hh^T (resident)
            pl.BlockSpec((1, H), lambda b, c: (0, 0),
                         pipeline_mode=pl.Buffered(1)),              # b_hh (n gate)
        ],
        out_specs=(
            pl.BlockSpec((t_chunk, b_block, H), lambda b, c: (c, b, 0)),  # rnn_seq chunk
            pl.BlockSpec((b_block, H), lambda b, c: (b, 0)),              # h_n (carried)
        ),
        compiler_params=pltpu.CompilerParams(
            dimension_semantics=("parallel", "arbitrary")),
    )(len2d, gates_x, whh_t, b_hn)

    rnn_seq = rnn_seq[:T]                                            # drop time padding
    h_n = h_last.reshape(1, B, H)                                    # (layers*dirs, B, H)
    return rnn_seq, h_n


def _reference_forward(token_ids, lengths, params):
    """Pure-JAX f32 reference (PyTorch GRU math) for correctness checking."""
    emb_tbl = params["embedding"]
    wih, whh = params["w_ih"], params["w_hh"]
    bih, bhh = params["b_ih"], params["b_hh"]
    B, T = token_ids.shape
    H = whh.shape[1]
    x = jnp.transpose(jnp.take(emb_tbl, token_ids, axis=0), (1, 0, 2))  # (T,B,E)

    def step(h, inp):
        x_t, t = inp
        gi = x_t @ wih.T + bih
        gh = h @ whh.T + bhh
        r = jax.nn.sigmoid(gi[:, :H] + gh[:, :H])
        z = jax.nn.sigmoid(gi[:, H:2 * H] + gh[:, H:2 * H])
        n = jnp.tanh(gi[:, 2 * H:] + r * gh[:, 2 * H:])
        h_new = (1.0 - z) * n + z * h
        mask = (t < lengths)[:, None]
        h_upd = jnp.where(mask, h_new, h)
        out = jnp.where(mask, h_upd, 0.0)
        return h_upd, out

    h0 = jnp.zeros((B, H), jnp.float32)
    hT, outs = lax.scan(step, h0, (x, jnp.arange(T)))
    return outs, hT.reshape(1, B, H)


def init_params(key, vocab_size, emb_size, hid_size):
    k1, k2, k3, k4, k5 = jax.random.split(key, 5)
    scale = 1.0 / jnp.sqrt(hid_size)
    return {
        "embedding": jax.random.normal(k1, (vocab_size, emb_size), jnp.float32),
        "w_ih": jax.random.uniform(k2, (3 * hid_size, emb_size), jnp.float32, -scale, scale),
        "w_hh": jax.random.uniform(k3, (3 * hid_size, hid_size), jnp.float32, -scale, scale),
        "b_ih": jax.random.uniform(k4, (1, 3 * hid_size), jnp.float32, -scale, scale),
        "b_hh": jax.random.uniform(k5, (1, 3 * hid_size), jnp.float32, -scale, scale),
    }


if __name__ == "__main__":
    # Small but TPU-friendly shapes: b_block=8 fills the sublanes, H=128 fills a lane;
    # two batch blocks exercise the parallel batch grid axis (2 TCs on v7x).
    VOCAB, EMB, HID = 50, 32, 128
    B, T = 16, 16

    key = jax.random.PRNGKey(0)
    kp, kx = jax.random.split(key)
    params = init_params(kp, VOCAB, EMB, HID)

    token_ids = jax.random.randint(kx, (B, T), 0, VOCAB, dtype=jnp.int32)
    # Descending lengths with lengths[0] == T (pack_padded_sequence, enforce_sorted).
    lengths = jnp.array([16, 16, 15, 14, 13, 12, 11, 10, 9, 8, 7, 6, 5, 4, 3, 2],
                        dtype=jnp.int32)

    ref_seq, ref_hn = _reference_forward(token_ids, lengths, params)

    # (mxu dtype, gates storage dtype, tolerance): f32 structural check, then the
    # bf16-MXU fast path, then the bf16-gates HBM-optimized path (v6e/v7x).
    configs = [
        (jnp.float32, jnp.float32, 1e-3),
        (jnp.bfloat16, jnp.float32, 2e-2),
        (jnp.bfloat16, jnp.bfloat16, 5e-2),
    ]
    for mxu_dt, gates_dt, tol in configs:
        rnn_seq, h_n = encoder_rnn_forward(
            token_ids, lengths, params,
            b_block=8, mxu_dtype=mxu_dt, gates_dtype=gates_dt)
        jax.block_until_ready((rnn_seq, h_n))
        assert rnn_seq.shape == (T, B, HID) and h_n.shape == (1, B, HID)
        assert jnp.allclose(rnn_seq, ref_seq, atol=tol, rtol=tol), (mxu_dt, gates_dt)
        assert jnp.allclose(h_n, ref_hn, atol=tol, rtol=tol), (mxu_dt, gates_dt)

    print("KERNEL_OK")
</pallas_src>

<mosaic_0001>
module attributes {stable_mosaic.version = 11 : i64} {
  func.func @_gru_chunk_kernel(%arg0: i32, %arg1: i32, %arg2: memref<8x1xi32, #tpu.memory_space<vmem>>, %arg3: memref<16x8x384xf32, #tpu.memory_space<vmem>>, %arg4: memref<128x384xf32, #tpu.memory_space<vmem>>, %arg5: memref<1x128xf32, #tpu.memory_space<vmem>>, %arg6: memref<16x8x128xf32, #tpu.memory_space<vmem>>, %arg7: memref<8x128xf32, #tpu.memory_space<vmem>>) attributes {dimension_semantics = [#tpu.dimension_semantics<parallel>, #tpu.dimension_semantics<arbitrary>], iteration_bounds = array<i64: 2, 1>, scalar_prefetch = 0 : i64, scratch_operands = 0 : i64, tpu.core_type = #tpu.core_type<tc>, window_params = [{transform_indices = @transform_0, window_bounds = array<i64: 8, 1>}, {transform_indices = @transform_1, window_bounds = array<i64: 16, 8, 384>}, {pipeline_mode = #tpu.pipeline_mode<synchronous>, transform_indices = @transform_2, window_bounds = array<i64: 128, 384>}, {pipeline_mode = #tpu.pipeline_mode<synchronous>, transform_indices = @transform_3, window_bounds = array<i64: 1, 128>}, {transform_indices = @transform_4, window_bounds = array<i64: 16, 8, 128>}, {transform_indices = @transform_5, window_bounds = array<i64: 8, 128>}]} {
    %c0_i32 = arith.constant 0 : i32
    %0 = arith.cmpi eq, %arg1, %c0_i32 : i32
    %1 = arith.extui %0 : i1 to i32
    %c0_i32_0 = arith.constant 0 : i32
    %2 = arith.cmpi ne, %1, %c0_i32_0 : i32
    scf.if %2 {
      %cst_171 = arith.constant 0.000000e+00 : f32
      %699 = vector.broadcast %cst_171 : f32 to vector<8x128xf32>
      %c0_172 = arith.constant 0 : index
      %c0_173 = arith.constant 0 : index
      %700 = vector.load %arg7[%c0_172, %c0_173] : memref<8x128xf32, #tpu.memory_space<vmem>>, vector<8x128xf32>
      tpu.vector_store %arg7[%c0_172, %c0_173], %699 {strides = array<i32>} : memref<8x128xf32, #tpu.memory_space<vmem>>, vector<8x128xf32>,
    } else {
    }
    %c0 = arith.constant 0 : index
    %c0_1 = arith.constant 0 : index
    %3 = vector.load %arg2[%c0, %c0_1] : memref<8x1xi32, #tpu.memory_space<vmem>>, vector<8x1xi32>
    %c0_2 = arith.constant 0 : index
    %c0_3 = arith.constant 0 : index
    %4 = vector.load %arg4[%c0_2, %c0_3] : memref<128x384xf32, #tpu.memory_space<vmem>>, vector<128x384xf32>
    %c0_4 = arith.constant 0 : index
    %c0_5 = arith.constant 0 : index
    %5 = vector.load %arg5[%c0_4, %c0_5] : memref<1x128xf32, #tpu.memory_space<vmem>>, vector<1x128xf32>
    %6 = vector.shape_cast %5 : vector<1x128xf32> to vector<1x128xf32>
    %7 = vector.broadcast %6 : vector<1x128xf32> to vector<8x128xf32>
    %c0_6 = arith.constant 0 : index
    %c0_7 = arith.constant 0 : index
    %8 = vector.load %arg7[%c0_6, %c0_7] : memref<8x128xf32, #tpu.memory_space<vmem>>, vector<8x128xf32>
    %c16_i32 = arith.constant 16 : i32
    %9 = arith.muli %arg1, %c16_i32 : i32
    %c0_8 = arith.constant 0 : index
    %c0_9 = arith.constant 0 : index
    %c0_10 = arith.constant 0 : index
    %10 = vector.load %arg3[%c0_8, %c0_9, %c0_10] : memref<16x8x384xf32, #tpu.memory_space<vmem>>, vector<1x8x384xf32>
    %11 = vector.shape_cast %10 : vector<1x8x384xf32> to vector<8x384xf32>
    %cst = arith.constant dense<0.000000e+00> : vector<8x384xf32>
    %12 = tpu.matmul %8, %4, %cst {dimension_numbers = #tpu.dot_dimension_numbers<[1], [0], [0], [1], [0, 0, 1, 1], [], []>} : vector<8x128xf32>, vector<128x384xf32>, vector<8x384xf32> -> vector<8x384xf32>
    %13 = vector.extract_strided_slice %11 {offsets = [0, 0], sizes = [8, 128], strides = [1, 1]} : vector<8x384xf32> to vector<8x128xf32>
    %14 = vector.extract_strided_slice %12 {offsets = [0, 0], sizes = [8, 128], strides = [1, 1]} : vector<8x384xf32> to vector<8x128xf32>
    %15 = arith.addf %13, %14 : vector<8x128xf32>
    %16 = arith.negf %15 : vector<8x128xf32>
    %17 = math.exp %16 : vector<8x128xf32>
    %cst_11 = arith.constant 1.000000e+00 : f32
    %18 = vector.broadcast %cst_11 : f32 to vector<8x128xf32>
    %19 = arith.addf %18, %17 : vector<8x128xf32>
    %20 = arith.divf %18, %19 : vector<8x128xf32>
    %21 = vector.extract_strided_slice %11 {offsets = [0, 128], sizes = [8, 128], strides = [1, 1]} : vector<8x384xf32> to vector<8x128xf32>
    %22 = vector.extract_strided_slice %12 {offsets = [0, 128], sizes = [8, 128], strides = [1, 1]} : vector<8x384xf32> to vector<8x128xf32>
    %23 = arith.addf %21, %22 : vector<8x128xf32>
    %24 = arith.negf %23 : vector<8x128xf32>
    %25 = math.exp %24 : vector<8x128xf32>
    %cst_12 = arith.constant 1.000000e+00 : f32
    %26 = vector.broadcast %cst_12 : f32 to vector<8x128xf32>
    %27 = arith.addf %26, %25 : vector<8x128xf32>
    %28 = arith.divf %26, %27 : vector<8x128xf32>
    %29 = vector.extract_strided_slice %11 {offsets = [0, 256], sizes = [8, 128], strides = [1, 1]} : vector<8x384xf32> to vector<8x128xf32>
    %30 = vector.extract_strided_slice %12 {offsets = [0, 256], sizes = [8, 128], strides = [1, 1]} : vector<8x384xf32> to vector<8x128xf32>
    %31 = arith.addf %30, %7 : vector<8x128xf32>
    %32 = arith.mulf %20, %31 : vector<8x128xf32>
    %33 = arith.addf %29, %32 : vector<8x128xf32>
    %34 = math.tanh %33 : vector<8x128xf32>
    %cst_13 = arith.constant 1.000000e+00 : f32
    %35 = vector.broadcast %cst_13 : f32 to vector<8x128xf32>
    %36 = arith.subf %35, %28 : vector<8x128xf32>
    %37 = arith.mulf %36, %34 : vector<8x128xf32>
    %38 = arith.mulf %28, %8 : vector<8x128xf32>
    %39 = arith.addf %37, %38 : vector<8x128xf32>
    %c0_i32_14 = arith.constant 0 : i32
    %40 = arith.addi %9, %c0_i32_14 : i32
    %41 = vector.broadcast %40 : i32 to vector<8x1xi32>
    %42 = arith.cmpi slt, %41, %3 : vector<8x1xi32>
    %43 = vector.shape_cast %42 : vector<8x1xi1> to vector<8x1xi1>
    %44 = vector.broadcast %43 : vector<8x1xi1> to vector<8x128xi1>
    %45 = arith.select %44, %39, %8 : vector<8x128xi1>, vector<8x128xf32>
    %cst_15 = arith.constant 0.000000e+00 : f32
    %46 = vector.shape_cast %42 : vector<8x1xi1> to vector<8x1xi1>
    %47 = vector.broadcast %46 : vector<8x1xi1> to vector<8x128xi1>
    %48 = vector.broadcast %cst_15 : f32 to vector<8x128xf32>
    %49 = arith.select %47, %45, %48 : vector<8x128xi1>, vector<8x128xf32>
    %c0_16 = arith.constant 0 : index
    %c0_17 = arith.constant 0 : index
    %c0_18 = arith.constant 0 : index
    %50 = vector.load %arg6[%c0_16, %c0_17, %c0_18] : memref<16x8x128xf32, #tpu.memory_space<vmem>>, vector<1x8x128xf32>
    %51 = vector.shape_cast %50 : vector<1x8x128xf32> to vector<8x128xf32>
    %52 = vector.shape_cast %49 : vector<8x128xf32> to vector<1x8x128xf32>
    tpu.vector_store %arg6[%c0_16, %c0_17, %c0_18], %52 {strides = array<i32>} : memref<16x8x128xf32, #tpu.memory_space<vmem>>, vector<1x8x128xf32>,
    %c1 = arith.constant 1 : index
    %c0_19 = arith.constant 0 : index
    %c0_20 = arith.constant 0 : index
    %53 = vector.load %arg3[%c1, %c0_19, %c0_20] : memref<16x8x384xf32, #tpu.memory_space<vmem>>, vector<1x8x384xf32>
    %54 = vector.shape_cast %53 : vector<1x8x384xf32> to vector<8x384xf32>
    %cst_21 = arith.constant dense<0.000000e+00> : vector<8x384xf32>
    %55 = tpu.matmul %45, %4, %cst_21 {dimension_numbers = #tpu.dot_dimension_numbers<[1], [0], [0], [1], [0, 0, 1, 1], [], []>} : vector<8x128xf32>, vector<128x384xf32>, vector<8x384xf32> -> vector<8x384xf32>
    %56 = vector.extract_strided_slice %54 {offsets = [0, 0], sizes = [8, 128], strides = [1, 1]} : vector<8x384xf32> to vector<8x128xf32>
    %57 = vector.extract_strided_slice %55 {offsets = [0, 0], sizes = [8, 128], strides = [1, 1]} : vector<8x384xf32> to vector<8x128xf32>
    %58 = arith.addf %56, %57 : vector<8x128xf32>
    %59 = arith.negf %58 : vector<8x128xf32>
    %60 = math.exp %59 : vector<8x128xf32>
    %cst_22 = arith.constant 1.000000e+00 : f32
    %61 = vector.broadcast %cst_22 : f32 to vector<8x128xf32>
    %62 = arith.addf %61, %60 : vector<8x128xf32>
    %63 = arith.divf %61, %62 : vector<8x128xf32>
    %64 = vector.extract_strided_slice %54 {offsets = [0, 128], sizes = [8, 128], strides = [1, 1]} : vector<8x384xf32> to vector<8x128xf32>
    %65 = vector.extract_strided_slice %55 {offsets = [0, 128], sizes = [8, 128], strides = [1, 1]} : vector<8x384xf32> to vector<8x128xf32>
    %66 = arith.addf %64, %65 : vector<8x128xf32>
    %67 = arith.negf %66 : vector<8x128xf32>
    %68 = math.exp %67 : vector<8x128xf32>
    %cst_23 = arith.constant 1.000000e+00 : f32
    %69 = vector.broadcast %cst_23 : f32 to vector<8x128xf32>
    %70 = arith.addf %69, %68 : vector<8x128xf32>
    %71 = arith.divf %69, %70 : vector<8x128xf32>
    %72 = vector.extract_strided_slice %54 {offsets = [0, 256], sizes = [8, 128], strides = [1, 1]} : vector<8x384xf32> to vector<8x128xf32>
    %73 = vector.extract_strided_slice %55 {offsets = [0, 256], sizes = [8, 128], strides = [1, 1]} : vector<8x384xf32> to vector<8x128xf32>
    %74 = arith.addf %73, %7 : vector<8x128xf32>
    %75 = arith.mulf %63, %74 : vector<8x128xf32>
    %76 = arith.addf %72, %75 : vector<8x128xf32>
    %77 = math.tanh %76 : vector<8x128xf32>
    %cst_24 = arith.constant 1.000000e+00 : f32
    %78 = vector.broadcast %cst_24 : f32 to vector<8x128xf32>
    %79 = arith.subf %78, %71 : vector<8x128xf32>
    %80 = arith.mulf %79, %77 : vector<8x128xf32>
    %81 = arith.mulf %71, %45 : vector<8x128xf32>
    %82 = arith.addf %80, %81 : vector<8x128xf32>
    %c1_i32 = arith.constant 1 : i32
    %83 = arith.addi %9, %c1_i32 : i32
    %84 = vector.broadcast %83 : i32 to vector<8x1xi32>
    %85 = arith.cmpi slt, %84, %3 : vector<8x1xi32>
    %86 = vector.shape_cast %85 : vector<8x1xi1> to vector<8x1xi1>
    %87 = vector.broadcast %86 : vector<8x1xi1> to vector<8x128xi1>
    %88 = arith.select %87, %82, %45 : vector<8x128xi1>, vector<8x128xf32>
    %cst_25 = arith.constant 0.000000e+00 : f32
    %89 = vector.shape_cast %85 : vector<8x1xi1> to vector<8x1xi1>
    %90 = vector.broadcast %89 : vector<8x1xi1> to vector<8x128xi1>
    %91 = vector.broadcast %cst_25 : f32 to vector<8x128xf32>
    %92 = arith.select %90, %88, %91 : vector<8x128xi1>, vector<8x128xf32>
    %c1_26 = arith.constant 1 : index
    %c0_27 = arith.constant 0 : index
    %c0_28 = arith.constant 0 : index
    %93 = vector.load %arg6[%c1_26, %c0_27, %c0_28] : memref<16x8x128xf32, #tpu.memory_space<vmem>>, vector<1x8x128xf32>
    %94 = vector.shape_cast %93 : vector<1x8x128xf32> to vector<8x128xf32>
    %95 = vector.shape_cast %92 : vector<8x128xf32> to vector<1x8x128xf32>
    tpu.vector_store %arg6[%c1_26, %c0_27, %c0_28], %95 {strides = array<i32>} : memref<16x8x128xf32, #tpu.memory_space<vmem>>, vector<1x8x128xf32>,
    %c2 = arith.constant 2 : index
    %c0_29 = arith.constant 0 : index
    %c0_30 = arith.constant 0 : index
    %96 = vector.load %arg3[%c2, %c0_29, %c0_30] : memref<16x8x384xf32, #tpu.memory_space<vmem>>, vector<1x8x384xf32>
    %97 = vector.shape_cast %96 : vector<1x8x384xf32> to vector<8x384xf32>
    %cst_31 = arith.constant dense<0.000000e+00> : vector<8x384xf32>
    %98 = tpu.matmul %88, %4, %cst_31 {dimension_numbers = #tpu.dot_dimension_numbers<[1], [0], [0], [1], [0, 0, 1, 1], [], []>} : vector<8x128xf32>, vector<128x384xf32>, vector<8x384xf32> -> vector<8x384xf32>
    %99 = vector.extract_strided_slice %97 {offsets = [0, 0], sizes = [8, 128], strides = [1, 1]} : vector<8x384xf32> to vector<8x128xf32>
    %100 = vector.extract_strided_slice %98 {offsets = [0, 0], sizes = [8, 128], strides = [1, 1]} : vector<8x384xf32> to vector<8x128xf32>
    %101 = arith.addf %99, %100 : vector<8x128xf32>
    %102 = arith.negf %101 : vector<8x128xf32>
    %103 = math.exp %102 : vector<8x128xf32>
    %cst_32 = arith.constant 1.000000e+00 : f32
    %104 = vector.broadcast %cst_32 : f32 to vector<8x128xf32>
    %105 = arith.addf %104, %103 : vector<8x128xf32>
    %106 = arith.divf %104, %105 : vector<8x128xf32>
    %107 = vector.extract_strided_slice %97 {offsets = [0, 128], sizes = [8, 128], strides = [1, 1]} : vector<8x384xf32> to vector<8x128xf32>
    %108 = vector.extract_strided_slice %98 {offsets = [0, 128], sizes = [8, 128], strides = [1, 1]} : vector<8x384xf32> to vector<8x128xf32>
    %109 = arith.addf %107, %108 : vector<8x128xf32>
    %110 = arith.negf %109 : vector<8x128xf32>
    %111 = math.exp %110 : vector<8x128xf32>
    %cst_33 = arith.constant 1.000000e+00 : f32
    %112 = vector.broadcast %cst_33 : f32 to vector<8x128xf32>
    %113 = arith.addf %112, %111 : vector<8x128xf32>
    %114 = arith.divf %112, %113 : vector<8x128xf32>
    %115 = vector.extract_strided_slice %97 {offsets = [0, 256], sizes = [8, 128], strides = [1, 1]} : vector<8x384xf32> to vector<8x128xf32>
    %116 = vector.extract_strided_slice %98 {offsets = [0, 256], sizes = [8, 128], strides = [1, 1]} : vector<8x384xf32> to vector<8x128xf32>
    %117 = arith.addf %116, %7 : vector<8x128xf32>
    %118 = arith.mulf %106, %117 : vector<8x128xf32>
    %119 = arith.addf %115, %118 : vector<8x128xf32>
    %120 = math.tanh %119 : vector<8x128xf32>
    %cst_34 = arith.constant 1.000000e+00 : f32
    %121 = vector.broadcast %cst_34 : f32 to vector<8x128xf32>
    %122 = arith.subf %121, %114 : vector<8x128xf32>
    %123 = arith.mulf %122, %120 : vector<8x128xf32>
    %124 = arith.mulf %114, %88 : vector<8x128xf32>
    %125 = arith.addf %123, %124 : vector<8x128xf32>
    %c2_i32 = arith.constant 2 : i32
    %126 = arith.addi %9, %c2_i32 : i32
    %127 = vector.broadcast %126 : i32 to vector<8x1xi32>
    %128 = arith.cmpi slt, %127, %3 : vector<8x1xi32>
    %129 = vector.shape_cast %128 : vector<8x1xi1> to vector<8x1xi1>
    %130 = vector.broadcast %129 : vector<8x1xi1> to vector<8x128xi1>
    %131 = arith.select %130, %125, %88 : vector<8x128xi1>, vector<8x128xf32>
    %cst_35 = arith.constant 0.000000e+00 : f32
    %132 = vector.shape_cast %128 : vector<8x1xi1> to vector<8x1xi1>
    %133 = vector.broadcast %132 : vector<8x1xi1> to vector<8x128xi1>
    %134 = vector.broadcast %cst_35 : f32 to vector<8x128xf32>
    %135 = arith.select %133, %131, %134 : vector<8x128xi1>, vector<8x128xf32>
    %c2_36 = arith.constant 2 : index
    %c0_37 = arith.constant 0 : index
    %c0_38 = arith.constant 0 : index
    %136 = vector.load %arg6[%c2_36, %c0_37, %c0_38] : memref<16x8x128xf32, #tpu.memory_space<vmem>>, vector<1x8x128xf32>
    %137 = vector.shape_cast %136 : vector<1x8x128xf32> to vector<8x128xf32>
    %138 = vector.shape_cast %135 : vector<8x128xf32> to vector<1x8x128xf32>
    tpu.vector_store %arg6[%c2_36, %c0_37, %c0_38], %138 {strides = array<i32>} : memref<16x8x128xf32, #tpu.memory_space<vmem>>, vector<1x8x128xf32>,
    %c3 = arith.constant 3 : index
    %c0_39 = arith.constant 0 : index
    %c0_40 = arith.constant 0 : index
    %139 = vector.load %arg3[%c3, %c0_39, %c0_40] : memref<16x8x384xf32, #tpu.memory_space<vmem>>, vector<1x8x384xf32>
    %140 = vector.shape_cast %139 : vector<1x8x384xf32> to vector<8x384xf32>
    %cst_41 = arith.constant dense<0.000000e+00> : vector<8x384xf32>
    %141 = tpu.matmul %131, %4, %cst_41 {dimension_numbers = #tpu.dot_dimension_numbers<[1], [0], [0], [1], [0, 0, 1, 1], [], []>} : vector<8x128xf32>, vector<128x384xf32>, vector<8x384xf32> -> vector<8x384xf32>
    %142 = vector.extract_strided_slice %140 {offsets = [0, 0], sizes = [8, 128], strides = [1, 1]} : vector<8x384xf32> to vector<8x128xf32>
    %143 = vector.extract_strided_slice %141 {offsets = [0, 0], sizes = [8, 128], strides = [1, 1]} : vector<8x384xf32> to vector<8x128xf32>
    %144 = arith.addf %142, %143 : vector<8x128xf32>
    %145 = arith.negf %144 : vector<8x128xf32>
    %146 = math.exp %145 : vector<8x128xf32>
    %cst_42 = arith.constant 1.000000e+00 : f32
    %147 = vector.broadcast %cst_42 : f32 to vector<8x128xf32>
    %148 = arith.addf %147, %146 : vector<8x128xf32>
    %149 = arith.divf %147, %148 : vector<8x128xf32>
    %150 = vector.extract_strided_slice %140 {offsets = [0, 128], sizes = [8, 128], strides = [1, 1]} : vector<8x384xf32> to vector<8x128xf32>
    %151 = vector.extract_strided_slice %141 {offsets = [0, 128], sizes = [8, 128], strides = [1, 1]} : vector<8x384xf32> to vector<8x128xf32>
    %152 = arith.addf %150, %151 : vector<8x128xf32>
    %153 = arith.negf %152 : vector<8x128xf32>
    %154 = math.exp %153 : vector<8x128xf32>
    %cst_43 = arith.constant 1.000000e+00 : f32
    %155 = vector.broadcast %cst_43 : f32 to vector<8x128xf32>
    %156 = arith.addf %155, %154 : vector<8x128xf32>
    %157 = arith.divf %155, %156 : vector<8x128xf32>
    %158 = vector.extract_strided_slice %140 {offsets = [0, 256], sizes = [8, 128], strides = [1, 1]} : vector<8x384xf32> to vector<8x128xf32>
    %159 = vector.extract_strided_slice %141 {offsets = [0, 256], sizes = [8, 128], strides = [1, 1]} : vector<8x384xf32> to vector<8x128xf32>
    %160 = arith.addf %159, %7 : vector<8x128xf32>
    %161 = arith.mulf %149, %160 : vector<8x128xf32>
    %162 = arith.addf %158, %161 : vector<8x128xf32>
    %163 = math.tanh %162 : vector<8x128xf32>
    %cst_44 = arith.constant 1.000000e+00 : f32
    %164 = vector.broadcast %cst_44 : f32 to vector<8x128xf32>
    %165 = arith.subf %164, %157 : vector<8x128xf32>
    %166 = arith.mulf %165, %163 : vector<8x128xf32>
    %167 = arith.mulf %157, %131 : vector<8x128xf32>
    %168 = arith.addf %166, %167 : vector<8x128xf32>
    %c3_i32 = arith.constant 3 : i32
    %169 = arith.addi %9, %c3_i32 : i32
    %170 = vector.broadcast %169 : i32 to vector<8x1xi32>
    %171 = arith.cmpi slt, %170, %3 : vector<8x1xi32>
    %172 = vector.shape_cast %171 : vector<8x1xi1> to vector<8x1xi1>
    %173 = vector.broadcast %172 : vector<8x1xi1> to vector<8x128xi1>
    %174 = arith.select %173, %168, %131 : vector<8x128xi1>, vector<8x128xf32>
    %cst_45 = arith.constant 0.000000e+00 : f32
    %175 = vector.shape_cast %171 : vector<8x1xi1> to vector<8x1xi1>
    %176 = vector.broadcast %175 : vector<8x1xi1> to vector<8x128xi1>
    %177 = vector.broadcast %cst_45 : f32 to vector<8x128xf32>
    %178 = arith.select %176, %174, %177 : vector<8x128xi1>, vector<8x128xf32>
    %c3_46 = arith.constant 3 : index
    %c0_47 = arith.constant 0 : index
    %c0_48 = arith.constant 0 : index
    %179 = vector.load %arg6[%c3_46, %c0_47, %c0_48] : memref<16x8x128xf32, #tpu.memory_space<vmem>>, vector<1x8x128xf32>
    %180 = vector.shape_cast %179 : vector<1x8x128xf32> to vector<8x128xf32>
    %181 = vector.shape_cast %178 : vector<8x128xf32> to vector<1x8x128xf32>
    tpu.vector_store %arg6[%c3_46, %c0_47, %c0_48], %181 {strides = array<i32>} : memref<16x8x128xf32, #tpu.memory_space<vmem>>, vector<1x8x128xf32>,
    %c4 = arith.constant 4 : index
    %c0_49 = arith.constant 0 : index
    %c0_50 = arith.constant 0 : index
    %182 = vector.load %arg3[%c4, %c0_49, %c0_50] : memref<16x8x384xf32, #tpu.memory_space<vmem>>, vector<1x8x384xf32>
    %183 = vector.shape_cast %182 : vector<1x8x384xf32> to vector<8x384xf32>
    %cst_51 = arith.constant dense<0.000000e+00> : vector<8x384xf32>
    %184 = tpu.matmul %174, %4, %cst_51 {dimension_numbers = #tpu.dot_dimension_numbers<[1], [0], [0], [1], [0, 0, 1, 1], [], []>} : vector<8x128xf32>, vector<128x384xf32>, vector<8x384xf32> -> vector<8x384xf32>
    %185 = vector.extract_strided_slice %183 {offsets = [0, 0], sizes = [8, 128], strides = [1, 1]} : vector<8x384xf32> to vector<8x128xf32>
    %186 = vector.extract_strided_slice %184 {offsets = [0, 0], sizes = [8, 128], strides = [1, 1]} : vector<8x384xf32> to vector<8x128xf32>
    %187 = arith.addf %185, %186 : vector<8x128xf32>
    %188 = arith.negf %187 : vector<8x128xf32>
    %189 = math.exp %188 : vector<8x128xf32>
    %cst_52 = arith.constant 1.000000e+00 : f32
    %190 = vector.broadcast %cst_52 : f32 to vector<8x128xf32>
    %191 = arith.addf %190, %189 : vector<8x128xf32>
    %192 = arith.divf %190, %191 : vector<8x128xf32>
    %193 = vector.extract_strided_slice %183 {offsets = [0, 128], sizes = [8, 128], strides = [1, 1]} : vector<8x384xf32> to vector<8x128xf32>
    %194 = vector.extract_strided_slice %184 {offsets = [0, 128], sizes = [8, 128], strides = [1, 1]} : vector<8x384xf32> to vector<8x128xf32>
    %195 = arith.addf %193, %194 : vector<8x128xf32>
    %196 = arith.negf %195 : vector<8x128xf32>
    %197 = math.exp %196 : vector<8x128xf32>
    %cst_53 = arith.constant 1.000000e+00 : f32
    %198 = vector.broadcast %cst_53 : f32 to vector<8x128xf32>
    %199 = arith.addf %198, %197 : vector<8x128xf32>
    %200 = arith.divf %198, %199 : vector<8x128xf32>
    %201 = vector.extract_strided_slice %183 {offsets = [0, 256], sizes = [8, 128], strides = [1, 1]} : vector<8x384xf32> to vector<8x128xf32>
    %202 = vector.extract_strided_slice %184 {offsets = [0, 256], sizes = [8, 128], strides = [1, 1]} : vector<8x384xf32> to vector<8x128xf32>
    %203 = arith.addf %202, %7 : vector<8x128xf32>
    %204 = arith.mulf %192, %203 : vector<8x128xf32>
    %205 = arith.addf %201, %204 : vector<8x128xf32>
    %206 = math.tanh %205 : vector<8x128xf32>
    %cst_54 = arith.constant 1.000000e+00 : f32
    %207 = vector.broadcast %cst_54 : f32 to vector<8x128xf32>
    %208 = arith.subf %207, %200 : vector<8x128xf32>
    %209 = arith.mulf %208, %206 : vector<8x128xf32>
    %210 = arith.mulf %200, %174 : vector<8x128xf32>
    %211 = arith.addf %209, %210 : vector<8x128xf32>
    %c4_i32 = arith.constant 4 : i32
    %212 = arith.addi %9, %c4_i32 : i32
    %213 = vector.broadcast %212 : i32 to vector<8x1xi32>
    %214 = arith.cmpi slt, %213, %3 : vector<8x1xi32>
    %215 = vector.shape_cast %214 : vector<8x1xi1> to vector<8x1xi1>
    %216 = vector.broadcast %215 : vector<8x1xi1> to vector<8x128xi1>
    %217 = arith.select %216, %211, %174 : vector<8x128xi1>, vector<8x128xf32>
    %cst_55 = arith.constant 0.000000e+00 : f32
    %218 = vector.shape_cast %214 : vector<8x1xi1> to vector<8x1xi1>
    %219 = vector.broadcast %218 : vector<8x1xi1> to vector<8x128xi1>
    %220 = vector.broadcast %cst_55 : f32 to vector<8x128xf32>
    %221 = arith.select %219, %217, %220 : vector<8x128xi1>, vector<8x128xf32>
    %c4_56 = arith.constant 4 : index
    %c0_57 = arith.constant 0 : index
    %c0_58 = arith.constant 0 : index
    %222 = vector.load %arg6[%c4_56, %c0_57, %c0_58] : memref<16x8x128xf32, #tpu.memory_space<vmem>>, vector<1x8x128xf32>
    %223 = vector.shape_cast %222 : vector<1x8x128xf32> to vector<8x128xf32>
    %224 = vector.shape_cast %221 : vector<8x128xf32> to vector<1x8x128xf32>
    tpu.vector_store %arg6[%c4_56, %c0_57, %c0_58], %224 {strides = array<i32>} : memref<16x8x128xf32, #tpu.memory_space<vmem>>, vector<1x8x128xf32>,
    %c5 = arith.constant 5 : index
    %c0_59 = arith.constant 0 : index
    %c0_60 = arith.constant 0 : index
    %225 = vector.load %arg3[%c5, %c0_59, %c0_60] : memref<16x8x384xf32, #tpu.memory_space<vmem>>, vector<1x8x384xf32>
    %226 = vector.shape_cast %225 : vector<1x8x384xf32> to vector<8x384xf32>
    %cst_61 = arith.constant dense<0.000000e+00> : vector<8x384xf32>
    %227 = tpu.matmul %217, %4, %cst_61 {dimension_numbers = #tpu.dot_dimension_numbers<[1], [0], [0], [1], [0, 0, 1, 1], [], []>} : vector<8x128xf32>, vector<128x384xf32>, vector<8x384xf32> -> vector<8x384xf32>
    %228 = vector.extract_strided_slice %226 {offsets = [0, 0], sizes = [8, 128], strides = [1, 1]} : vector<8x384xf32> to vector<8x128xf32>
    %229 = vector.extract_strided_slice %227 {offsets = [0, 0], sizes = [8, 128], strides = [1, 1]} : vector<8x384xf32> to vector<8x128xf32>
    %230 = arith.addf %228, %229 : vector<8x128xf32>
    %231 = arith.negf %230 : vector<8x128xf32>
    %232 = math.exp %231 : vector<8x128xf32>
    %cst_62 = arith.constant 1.000000e+00 : f32
    %233 = vector.broadcast %cst_62 : f32 to vector<8x128xf32>
    %234 = arith.addf %233, %232 : vector<8x128xf32>
    %235 = arith.divf %233, %234 : vector<8x128xf32>
    %236 = vector.extract_strided_slice %226 {offsets = [0, 128], sizes = [8, 128], strides = [1, 1]} : vector<8x384xf32> to vector<8x128xf32>
    %237 = vector.extract_strided_slice %227 {offsets = [0, 128], sizes = [8, 128], strides = [1, 1]} : vector<8x384xf32> to vector<8x128xf32>
    %238 = arith.addf %236, %237 : vector<8x128xf32>
    %239 = arith.negf %238 : vector<8x128xf32>
    %240 = math.exp %239 : vector<8x128xf32>
    %cst_63 = arith.constant 1.000000e+00 : f32
    %241 = vector.broadcast %cst_63 : f32 to vector<8x128xf32>
    %242 = arith.addf %241, %240 : vector<8x128xf32>
    %243 = arith.divf %241, %242 : vector<8x128xf32>
    %244 = vector.extract_strided_slice %226 {offsets = [0, 256], sizes = [8, 128], strides = [1, 1]} : vector<8x384xf32> to vector<8x128xf32>
    %245 = vector.extract_strided_slice %227 {offsets = [0, 256], sizes = [8, 128], strides = [1, 1]} : vector<8x384xf32> to vector<8x128xf32>
    %246 = arith.addf %245, %7 : vector<8x128xf32>
    %247 = arith.mulf %235, %246 : vector<8x128xf32>
    %248 = arith.addf %244, %247 : vector<8x128xf32>
    %249 = math.tanh %248 : vector<8x128xf32>
    %cst_64 = arith.constant 1.000000e+00 : f32
    %250 = vector.broadcast %cst_64 : f32 to vector<8x128xf32>
    %251 = arith.subf %250, %243 : vector<8x128xf32>
    %252 = arith.mulf %251, %249 : vector<8x128xf32>
    %253 = arith.mulf %243, %217 : vector<8x128xf32>
    %254 = arith.addf %252, %253 : vector<8x128xf32>
    %c5_i32 = arith.constant 5 : i32
    %255 = arith.addi %9, %c5_i32 : i32
    %256 = vector.broadcast %255 : i32 to vector<8x1xi32>
    %257 = arith.cmpi slt, %256, %3 : vector<8x1xi32>
    %258 = vector.shape_cast %257 : vector<8x1xi1> to vector<8x1xi1>
    %259 = vector.broadcast %258 : vector<8x1xi1> to vector<8x128xi1>
    %260 = arith.select %259, %254, %217 : vector<8x128xi1>, vector<8x128xf32>
    %cst_65 = arith.constant 0.000000e+00 : f32
    %261 = vector.shape_cast %257 : vector<8x1xi1> to vector<8x1xi1>
    %262 = vector.broadcast %261 : vector<8x1xi1> to vector<8x128xi1>
    %263 = vector.broadcast %cst_65 : f32 to vector<8x128xf32>
    %264 = arith.select %262, %260, %263 : vector<8x128xi1>, vector<8x128xf32>
    %c5_66 = arith.constant 5 : index
    %c0_67 = arith.constant 0 : index
    %c0_68 = arith.constant 0 : index
    %265 = vector.load %arg6[%c5_66, %c0_67, %c0_68] : memref<16x8x128xf32, #tpu.memory_space<vmem>>, vector<1x8x128xf32>
    %266 = vector.shape_cast %265 : vector<1x8x128xf32> to vector<8x128xf32>
    %267 = vector.shape_cast %264 : vector<8x128xf32> to vector<1x8x128xf32>
    tpu.vector_store %arg6[%c5_66, %c0_67, %c0_68], %267 {strides = array<i32>} : memref<16x8x128xf32, #tpu.memory_space<vmem>>, vector<1x8x128xf32>,
    %c6 = arith.constant 6 : index
    %c0_69 = arith.constant 0 : index
    %c0_70 = arith.constant 0 : index
    %268 = vector.load %arg3[%c6, %c0_69, %c0_70] : memref<16x8x384xf32, #tpu.memory_space<vmem>>, vector<1x8x384xf32>
    %269 = vector.shape_cast %268 : vector<1x8x384xf32> to vector<8x384xf32>
    %cst_71 = arith.constant dense<0.000000e+00> : vector<8x384xf32>
    %270 = tpu.matmul %260, %4, %cst_71 {dimension_numbers = #tpu.dot_dimension_numbers<[1], [0], [0], [1], [0, 0, 1, 1], [], []>} : vector<8x128xf32>, vector<128x384xf32>, vector<8x384xf32> -> vector<8x384xf32>
    %271 = vector.extract_strided_slice %269 {offsets = [0, 0], sizes = [8, 128], strides = [1, 1]} : vector<8x384xf32> to vector<8x128xf32>
    %272 = vector.extract_strided_slice %270 {offsets = [0, 0], sizes = [8, 128], strides = [1, 1]} : vector<8x384xf32> to vector<8x128xf32>
    %273 = arith.addf %271, %272 : vector<8x128xf32>
    %274 = arith.negf %273 : vector<8x128xf32>
    %275 = math.exp %274 : vector<8x128xf32>
    %cst_72 = arith.constant 1.000000e+00 : f32
    %276 = vector.broadcast %cst_72 : f32 to vector<8x128xf32>
    %277 = arith.addf %276, %275 : vector<8x128xf32>
    %278 = arith.divf %276, %277 : vector<8x128xf32>
    %279 = vector.extract_strided_slice %269 {offsets = [0, 128], sizes = [8, 128], strides = [1, 1]} : vector<8x384xf32> to vector<8x128xf32>
    %280 = vector.extract_strided_slice %270 {offsets = [0, 128], sizes = [8, 128], strides = [1, 1]} : vector<8x384xf32> to vector<8x128xf32>
    %281 = arith.addf %279, %280 : vector<8x128xf32>
    %282 = arith.negf %281 : vector<8x128xf32>
    %283 = math.exp %282 : vector<8x128xf32>
    %cst_73 = arith.constant 1.000000e+00 : f32
    %284 = vector.broadcast %cst_73 : f32 to vector<8x128xf32>
    %285 = arith.addf %284, %283 : vector<8x128xf32>
    %286 = arith.divf %284, %285 : vector<8x128xf32>
    %287 = vector.extract_strided_slice %269 {offsets = [0, 256], sizes = [8, 128], strides = [1, 1]} : vector<8x384xf32> to vector<8x128xf32>
    %288 = vector.extract_strided_slice %270 {offsets = [0, 256], sizes = [8, 128], strides = [1, 1]} : vector<8x384xf32> to vector<8x128xf32>
    %289 = arith.addf %288, %7 : vector<8x128xf32>
    %290 = arith.mulf %278, %289 : vector<8x128xf32>
    %291 = arith.addf %287, %290 : vector<8x128xf32>
    %292 = math.tanh %291 : vector<8x128xf32>
    %cst_74 = arith.constant 1.000000e+00 : f32
    %293 = vector.broadcast %cst_74 : f32 to vector<8x128xf32>
    %294 = arith.subf %293, %286 : vector<8x128xf32>
    %295 = arith.mulf %294, %292 : vector<8x128xf32>
    %296 = arith.mulf %286, %260 : vector<8x128xf32>
    %297 = arith.addf %295, %296 : vector<8x128xf32>
    %c6_i32 = arith.constant 6 : i32
    %298 = arith.addi %9, %c6_i32 : i32
    %299 = vector.broadcast %298 : i32 to vector<8x1xi32>
    %300 = arith.cmpi slt, %299, %3 : vector<8x1xi32>
    %301 = vector.shape_cast %300 : vector<8x1xi1> to vector<8x1xi1>
    %302 = vector.broadcast %301 : vector<8x1xi1> to vector<8x128xi1>
    %303 = arith.select %302, %297, %260 : vector<8x128xi1>, vector<8x128xf32>
    %cst_75 = arith.constant 0.000000e+00 : f32
    %304 = vector.shape_cast %300 : vector<8x1xi1> to vector<8x1xi1>
    %305 = vector.broadcast %304 : vector<8x1xi1> to vector<8x128xi1>
    %306 = vector.broadcast %cst_75 : f32 to vector<8x128xf32>
    %307 = arith.select %305, %303, %306 : vector<8x128xi1>, vector<8x128xf32>
    %c6_76 = arith.constant 6 : index
    %c0_77 = arith.constant 0 : index
    %c0_78 = arith.constant 0 : index
    %308 = vector.load %arg6[%c6_76, %c0_77, %c0_78] : memref<16x8x128xf32, #tpu.memory_space<vmem>>, vector<1x8x128xf32>
    %309 = vector.shape_cast %308 : vector<1x8x128xf32> to vector<8x128xf32>
    %310 = vector.shape_cast %307 : vector<8x128xf32> to vector<1x8x128xf32>
    tpu.vector_store %arg6[%c6_76, %c0_77, %c0_78], %310 {strides = array<i32>} : memref<16x8x128xf32, #tpu.memory_space<vmem>>, vector<1x8x128xf32>,
    %c7 = arith.constant 7 : index
    %c0_79 = arith.constant 0 : index
    %c0_80 = arith.constant 0 : index
    %311 = vector.load %arg3[%c7, %c0_79, %c0_80] : memref<16x8x384xf32, #tpu.memory_space<vmem>>, vector<1x8x384xf32>
    %312 = vector.shape_cast %311 : vector<1x8x384xf32> to vector<8x384xf32>
    %cst_81 = arith.constant dense<0.000000e+00> : vector<8x384xf32>
    %313 = tpu.matmul %303, %4, %cst_81 {dimension_numbers = #tpu.dot_dimension_numbers<[1], [0], [0], [1], [0, 0, 1, 1], [], []>} : vector<8x128xf32>, vector<128x384xf32>, vector<8x384xf32> -> vector<8x384xf32>
    %314 = vector.extract_strided_slice %312 {offsets = [0, 0], sizes = [8, 128], strides = [1, 1]} : vector<8x384xf32> to vector<8x128xf32>
    %315 = vector.extract_strided_slice %313 {offsets = [0, 0], sizes = [8, 128], strides = [1, 1]} : vector<8x384xf32> to vector<8x128xf32>
    %316 = arith.addf %314, %315 : vector<8x128xf32>
    %317 = arith.negf %316 : vector<8x128xf32>
    %318 = math.exp %317 : vector<8x128xf32>
    %cst_82 = arith.constant 1.000000e+00 : f32
    %319 = vector.broadcast %cst_82 : f32 to vector<8x128xf32>
    %320 = arith.addf %319, %318 : vector<8x128xf32>
    %321 = arith.divf %319, %320 : vector<8x128xf32>
    %322 = vector.extract_strided_slice %312 {offsets = [0, 128], sizes = [8, 128], strides = [1, 1]} : vector<8x384xf32> to vector<8x128xf32>
    %323 = vector.extract_strided_slice %313 {offsets = [0, 128], sizes = [8, 128], strides = [1, 1]} : vector<8x384xf32> to vector<8x128xf32>
    %324 = arith.addf %322, %323 : vector<8x128xf32>
    %325 = arith.negf %324 : vector<8x128xf32>
    %326 = math.exp %325 : vector<8x128xf32>
    %cst_83 = arith.constant 1.000000e+00 : f32
    %327 = vector.broadcast %cst_83 : f32 to vector<8x128xf32>
    %328 = arith.addf %327, %326 : vector<8x128xf32>
    %329 = arith.divf %327, %328 : vector<8x128xf32>
    %330 = vector.extract_strided_slice %312 {offsets = [0, 256], sizes = [8, 128], strides = [1, 1]} : vector<8x384xf32> to vector<8x128xf32>
    %331 = vector.extract_strided_slice %313 {offsets = [0, 256], sizes = [8, 128], strides = [1, 1]} : vector<8x384xf32> to vector<8x128xf32>
    %332 = arith.addf %331, %7 : vector<8x128xf32>
    %333 = arith.mulf %321, %332 : vector<8x128xf32>
    %334 = arith.addf %330, %333 : vector<8x128xf32>
    %335 = math.tanh %334 : vector<8x128xf32>
    %cst_84 = arith.constant 1.000000e+00 : f32
    %336 = vector.broadcast %cst_84 : f32 to vector<8x128xf32>
    %337 = arith.subf %336, %329 : vector<8x128xf32>
    %338 = arith.mulf %337, %335 : vector<8x128xf32>
    %339 = arith.mulf %329, %303 : vector<8x128xf32>
    %340 = arith.addf %338, %339 : vector<8x128xf32>
    %c7_i32 = arith.constant 7 : i32
    %341 = arith.addi %9, %c7_i32 : i32
    %342 = vector.broadcast %341 : i32 to vector<8x1xi32>
    %343 = arith.cmpi slt, %342, %3 : vector<8x1xi32>
    %344 = vector.shape_cast %343 : vector<8x1xi1> to vector<8x1xi1>
    %345 = vector.broadcast %344 : vector<8x1xi1> to vector<8x128xi1>
    %346 = arith.select %345, %340, %303 : vector<8x128xi1>, vector<8x128xf32>
    %cst_85 = arith.constant 0.000000e+00 : f32
    %347 = vector.shape_cast %343 : vector<8x1xi1> to vector<8x1xi1>
    %348 = vector.broadcast %347 : vector<8x1xi1> to vector<8x128xi1>
    %349 = vector.broadcast %cst_85 : f32 to vector<8x128xf32>
    %350 = arith.select %348, %346, %349 : vector<8x128xi1>, vector<8x128xf32>
    %c7_86 = arith.constant 7 : index
    %c0_87 = arith.constant 0 : index
    %c0_88 = arith.constant 0 : index
    %351 = vector.load %arg6[%c7_86, %c0_87, %c0_88] : memref<16x8x128xf32, #tpu.memory_space<vmem>>, vector<1x8x128xf32>
    %352 = vector.shape_cast %351 : vector<1x8x128xf32> to vector<8x128xf32>
    %353 = vector.shape_cast %350 : vector<8x128xf32> to vector<1x8x128xf32>
    tpu.vector_store %arg6[%c7_86, %c0_87, %c0_88], %353 {strides = array<i32>} : memref<16x8x128xf32, #tpu.memory_space<vmem>>, vector<1x8x128xf32>,
    %c8 = arith.constant 8 : index
    %c0_89 = arith.constant 0 : index
    %c0_90 = arith.constant 0 : index
    %354 = vector.load %arg3[%c8, %c0_89, %c0_90] : memref<16x8x384xf32, #tpu.memory_space<vmem>>, vector<1x8x384xf32>
    %355 = vector.shape_cast %354 : vector<1x8x384xf32> to vector<8x384xf32>
    %cst_91 = arith.constant dense<0.000000e+00> : vector<8x384xf32>
    %356 = tpu.matmul %346, %4, %cst_91 {dimension_numbers = #tpu.dot_dimension_numbers<[1], [0], [0], [1], [0, 0, 1, 1], [], []>} : vector<8x128xf32>, vector<128x384xf32>, vector<8x384xf32> -> vector<8x384xf32>
    %357 = vector.extract_strided_slice %355 {offsets = [0, 0], sizes = [8, 128], strides = [1, 1]} : vector<8x384xf32> to vector<8x128xf32>
    %358 = vector.extract_strided_slice %356 {offsets = [0, 0], sizes = [8, 128], strides = [1, 1]} : vector<8x384xf32> to vector<8x128xf32>
    %359 = arith.addf %357, %358 : vector<8x128xf32>
    %360 = arith.negf %359 : vector<8x128xf32>
    %361 = math.exp %360 : vector<8x128xf32>
    %cst_92 = arith.constant 1.000000e+00 : f32
    %362 = vector.broadcast %cst_92 : f32 to vector<8x128xf32>
    %363 = arith.addf %362, %361 : vector<8x128xf32>
    %364 = arith.divf %362, %363 : vector<8x128xf32>
    %365 = vector.extract_strided_slice %355 {offsets = [0, 128], sizes = [8, 128], strides = [1, 1]} : vector<8x384xf32> to vector<8x128xf32>
    %366 = vector.extract_strided_slice %356 {offsets = [0, 128], sizes = [8, 128], strides = [1, 1]} : vector<8x384xf32> to vector<8x128xf32>
    %367 = arith.addf %365, %366 : vector<8x128xf32>
    %368 = arith.negf %367 : vector<8x128xf32>
    %369 = math.exp %368 : vector<8x128xf32>
    %cst_93 = arith.constant 1.000000e+00 : f32
    %370 = vector.broadcast %cst_93 : f32 to vector<8x128xf32>
    %371 = arith.addf %370, %369 : vector<8x128xf32>
    %372 = arith.divf %370, %371 : vector<8x128xf32>
    %373 = vector.extract_strided_slice %355 {offsets = [0, 256], sizes = [8, 128], strides = [1, 1]} : vector<8x384xf32> to vector<8x128xf32>
    %374 = vector.extract_strided_slice %356 {offsets = [0, 256], sizes = [8, 128], strides = [1, 1]} : vector<8x384xf32> to vector<8x128xf32>
    %375 = arith.addf %374, %7 : vector<8x128xf32>
    %376 = arith.mulf %364, %375 : vector<8x128xf32>
    %377 = arith.addf %373, %376 : vector<8x128xf32>
    %378 = math.tanh %377 : vector<8x128xf32>
    %cst_94 = arith.constant 1.000000e+00 : f32
    %379 = vector.broadcast %cst_94 : f32 to vector<8x128xf32>
    %380 = arith.subf %379, %372 : vector<8x128xf32>
    %381 = arith.mulf %380, %378 : vector<8x128xf32>
    %382 = arith.mulf %372, %346 : vector<8x128xf32>
    %383 = arith.addf %381, %382 : vector<8x128xf32>
    %c8_i32 = arith.constant 8 : i32
    %384 = arith.addi %9, %c8_i32 : i32
    %385 = vector.broadcast %384 : i32 to vector<8x1xi32>
    %386 = arith.cmpi slt, %385, %3 : vector<8x1xi32>
    %387 = vector.shape_cast %386 : vector<8x1xi1> to vector<8x1xi1>
    %388 = vector.broadcast %387 : vector<8x1xi1> to vector<8x128xi1>
    %389 = arith.select %388, %383, %346 : vector<8x128xi1>, vector<8x128xf32>
    %cst_95 = arith.constant 0.000000e+00 : f32
    %390 = vector.shape_cast %386 : vector<8x1xi1> to vector<8x1xi1>
    %391 = vector.broadcast %390 : vector<8x1xi1> to vector<8x128xi1>
    %392 = vector.broadcast %cst_95 : f32 to vector<8x128xf32>
    %393 = arith.select %391, %389, %392 : vector<8x128xi1>, vector<8x128xf32>
    %c8_96 = arith.constant 8 : index
    %c0_97 = arith.constant 0 : index
    %c0_98 = arith.constant 0 : index
    %394 = vector.load %arg6[%c8_96, %c0_97, %c0_98] : memref<16x8x128xf32, #tpu.memory_space<vmem>>, vector<1x8x128xf32>
    %395 = vector.shape_cast %394 : vector<1x8x128xf32> to vector<8x128xf32>
    %396 = vector.shape_cast %393 : vector<8x128xf32> to vector<1x8x128xf32>
    tpu.vector_store %arg6[%c8_96, %c0_97, %c0_98], %396 {strides = array<i32>} : memref<16x8x128xf32, #tpu.memory_space<vmem>>, vector<1x8x128xf32>,
    %c9 = arith.constant 9 : index
    %c0_99 = arith.constant 0 : index
    %c0_100 = arith.constant 0 : index
    %397 = vector.load %arg3[%c9, %c0_99, %c0_100] : memref<16x8x384xf32, #tpu.memory_space<vmem>>, vector<1x8x384xf32>
    %398 = vector.shape_cast %397 : vector<1x8x384xf32> to vector<8x384xf32>
    %cst_101 = arith.constant dense<0.000000e+00> : vector<8x384xf32>
    %399 = tpu.matmul %389, %4, %cst_101 {dimension_numbers = #tpu.dot_dimension_numbers<[1], [0], [0], [1], [0, 0, 1, 1], [], []>} : vector<8x128xf32>, vector<128x384xf32>, vector<8x384xf32> -> vector<8x384xf32>
    %400 = vector.extract_strided_slice %398 {offsets = [0, 0], sizes = [8, 128], strides = [1, 1]} : vector<8x384xf32> to vector<8x128xf32>
    %401 = vector.extract_strided_slice %399 {offsets = [0, 0], sizes = [8, 128], strides = [1, 1]} : vector<8x384xf32> to vector<8x128xf32>
    %402 = arith.addf %400, %401 : vector<8x128xf32>
    %403 = arith.negf %402 : vector<8x128xf32>
    %404 = math.exp %403 : vector<8x128xf32>
    %cst_102 = arith.constant 1.000000e+00 : f32
    %405 = vector.broadcast %cst_102 : f32 to vector<8x128xf32>
    %406 = arith.addf %405, %404 : vector<8x128xf32>
    %407 = arith.divf %405, %406 : vector<8x128xf32>
    %408 = vector.extract_strided_slice %398 {offsets = [0, 128], sizes = [8, 128], strides = [1, 1]} : vector<8x384xf32> to vector<8x128xf32>
    %409 = vector.extract_strided_slice %399 {offsets = [0, 128], sizes = [8, 128], strides = [1, 1]} : vector<8x384xf32> to vector<8x128xf32>
    %410 = arith.addf %408, %409 : vector<8x128xf32>
    %411 = arith.negf %410 : vector<8x128xf32>
    %412 = math.exp %411 : vector<8x128xf32>
    %cst_103 = arith.constant 1.000000e+00 : f32
    %413 = vector.broadcast %cst_103 : f32 to vector<8x128xf32>
    %414 = arith.addf %413, %412 : vector<8x128xf32>
    %415 = arith.divf %413, %414 : vector<8x128xf32>
    %416 = vector.extract_strided_slice %398 {offsets = [0, 256], sizes = [8, 128], strides = [1, 1]} : vector<8x384xf32> to vector<8x128xf32>
    %417 = vector.extract_strided_slice %399 {offsets = [0, 256], sizes = [8, 128], strides = [1, 1]} : vector<8x384xf32> to vector<8x128xf32>
    %418 = arith.addf %417, %7 : vector<8x128xf32>
    %419 = arith.mulf %407, %418 : vector<8x128xf32>
    %420 = arith.addf %416, %419 : vector<8x128xf32>
    %421 = math.tanh %420 : vector<8x128xf32>
    %cst_104 = arith.constant 1.000000e+00 : f32
    %422 = vector.broadcast %cst_104 : f32 to vector<8x128xf32>
    %423 = arith.subf %422, %415 : vector<8x128xf32>
    %424 = arith.mulf %423, %421 : vector<8x128xf32>
    %425 = arith.mulf %415, %389 : vector<8x128xf32>
    %426 = arith.addf %424, %425 : vector<8x128xf32>
    %c9_i32 = arith.constant 9 : i32
    %427 = arith.addi %9, %c9_i32 : i32
    %428 = vector.broadcast %427 : i32 to vector<8x1xi32>
    %429 = arith.cmpi slt, %428, %3 : vector<8x1xi32>
    %430 = vector.shape_cast %429 : vector<8x1xi1> to vector<8x1xi1>
    %431 = vector.broadcast %430 : vector<8x1xi1> to vector<8x128xi1>
    %432 = arith.select %431, %426, %389 : vector<8x128xi1>, vector<8x128xf32>
    %cst_105 = arith.constant 0.000000e+00 : f32
    %433 = vector.shape_cast %429 : vector<8x1xi1> to vector<8x1xi1>
    %434 = vector.broadcast %433 : vector<8x1xi1> to vector<8x128xi1>
    %435 = vector.broadcast %cst_105 : f32 to vector<8x128xf32>
    %436 = arith.select %434, %432, %435 : vector<8x128xi1>, vector<8x128xf32>
    %c9_106 = arith.constant 9 : index
    %c0_107 = arith.constant 0 : index
    %c0_108 = arith.constant 0 : index
    %437 = vector.load %arg6[%c9_106, %c0_107, %c0_108] : memref<16x8x128xf32, #tpu.memory_space<vmem>>, vector<1x8x128xf32>
    %438 = vector.shape_cast %437 : vector<1x8x128xf32> to vector<8x128xf32>
    %439 = vector.shape_cast %436 : vector<8x128xf32> to vector<1x8x128xf32>
    tpu.vector_store %arg6[%c9_106, %c0_107, %c0_108], %439 {strides = array<i32>} : memref<16x8x128xf32, #tpu.memory_space<vmem>>, vector<1x8x128xf32>,
    %c10 = arith.constant 10 : index
    %c0_109 = arith.constant 0 : index
    %c0_110 = arith.constant 0 : index
    %440 = vector.load %arg3[%c10, %c0_109, %c0_110] : memref<16x8x384xf32, #tpu.memory_space<vmem>>, vector<1x8x384xf32>
    %441 = vector.shape_cast %440 : vector<1x8x384xf32> to vector<8x384xf32>
    %cst_111 = arith.constant dense<0.000000e+00> : vector<8x384xf32>
    %442 = tpu.matmul %432, %4, %cst_111 {dimension_numbers = #tpu.dot_dimension_numbers<[1], [0], [0], [1], [0, 0, 1, 1], [], []>} : vector<8x128xf32>, vector<128x384xf32>, vector<8x384xf32> -> vector<8x384xf32>
    %443 = vector.extract_strided_slice %441 {offsets = [0, 0], sizes = [8, 128], strides = [1, 1]} : vector<8x384xf32> to vector<8x128xf32>
    %444 = vector.extract_strided_slice %442 {offsets = [0, 0], sizes = [8, 128], strides = [1, 1]} : vector<8x384xf32> to vector<8x128xf32>
    %445 = arith.addf %443, %444 : vector<8x128xf32>
    %446 = arith.negf %445 : vector<8x128xf32>
    %447 = math.exp %446 : vector<8x128xf32>
    %cst_112 = arith.constant 1.000000e+00 : f32
    %448 = vector.broadcast %cst_112 : f32 to vector<8x128xf32>
    %449 = arith.addf %448, %447 : vector<8x128xf32>
    %450 = arith.divf %448, %449 : vector<8x128xf32>
    %451 = vector.extract_strided_slice %441 {offsets = [0, 128], sizes = [8, 128], strides = [1, 1]} : vector<8x384xf32> to vector<8x128xf32>
    %452 = vector.extract_strided_slice %442 {offsets = [0, 128], sizes = [8, 128], strides = [1, 1]} : vector<8x384xf32> to vector<8x128xf32>
    %453 = arith.addf %451, %452 : vector<8x128xf32>
    %454 = arith.negf %453 : vector<8x128xf32>
    %455 = math.exp %454 : vector<8x128xf32>
    %cst_113 = arith.constant 1.000000e+00 : f32
    %456 = vector.broadcast %cst_113 : f32 to vector<8x128xf32>
    %457 = arith.addf %456, %455 : vector<8x128xf32>
    %458 = arith.divf %456, %457 : vector<8x128xf32>
    %459 = vector.extract_strided_slice %441 {offsets = [0, 256], sizes = [8, 128], strides = [1, 1]} : vector<8x384xf32> to vector<8x128xf32>
    %460 = vector.extract_strided_slice %442 {offsets = [0, 256], sizes = [8, 128], strides = [1, 1]} : vector<8x384xf32> to vector<8x128xf32>
    %461 = arith.addf %460, %7 : vector<8x128xf32>
    %462 = arith.mulf %450, %461 : vector<8x128xf32>
    %463 = arith.addf %459, %462 : vector<8x128xf32>
    %464 = math.tanh %463 : vector<8x128xf32>
    %cst_114 = arith.constant 1.000000e+00 : f32
    %465 = vector.broadcast %cst_114 : f32 to vector<8x128xf32>
    %466 = arith.subf %465, %458 : vector<8x128xf32>
    %467 = arith.mulf %466, %464 : vector<8x128xf32>
    %468 = arith.mulf %458, %432 : vector<8x128xf32>
    %469 = arith.addf %467, %468 : vector<8x128xf32>
    %c10_i32 = arith.constant 10 : i32
    %470 = arith.addi %9, %c10_i32 : i32
    %471 = vector.broadcast %470 : i32 to vector<8x1xi32>
    %472 = arith.cmpi slt, %471, %3 : vector<8x1xi32>
    %473 = vector.shape_cast %472 : vector<8x1xi1> to vector<8x1xi1>
    %474 = vector.broadcast %473 : vector<8x1xi1> to vector<8x128xi1>
    %475 = arith.select %474, %469, %432 : vector<8x128xi1>, vector<8x128xf32>
    %cst_115 = arith.constant 0.000000e+00 : f32
    %476 = vector.shape_cast %472 : vector<8x1xi1> to vector<8x1xi1>
    %477 = vector.broadcast %476 : vector<8x1xi1> to vector<8x128xi1>
    %478 = vector.broadcast %cst_115 : f32 to vector<8x128xf32>
    %479 = arith.select %477, %475, %478 : vector<8x128xi1>, vector<8x128xf32>
    %c10_116 = arith.constant 10 : index
    %c0_117 = arith.constant 0 : index
    %c0_118 = arith.constant 0 : index
    %480 = vector.load %arg6[%c10_116, %c0_117, %c0_118] : memref<16x8x128xf32, #tpu.memory_space<vmem>>, vector<1x8x128xf32>
    %481 = vector.shape_cast %480 : vector<1x8x128xf32> to vector<8x128xf32>
    %482 = vector.shape_cast %479 : vector<8x128xf32> to vector<1x8x128xf32>
    tpu.vector_store %arg6[%c10_116, %c0_117, %c0_118], %482 {strides = array<i32>} : memref<16x8x128xf32, #tpu.memory_space<vmem>>, vector<1x8x128xf32>,
    %c11 = arith.constant 11 : index
    %c0_119 = arith.constant 0 : index
    %c0_120 = arith.constant 0 : index
    %483 = vector.load %arg3[%c11, %c0_119, %c0_120] : memref<16x8x384xf32, #tpu.memory_space<vmem>>, vector<1x8x384xf32>
    %484 = vector.shape_cast %483 : vector<1x8x384xf32> to vector<8x384xf32>
    %cst_121 = arith.constant dense<0.000000e+00> : vector<8x384xf32>
    %485 = tpu.matmul %475, %4, %cst_121 {dimension_numbers = #tpu.dot_dimension_numbers<[1], [0], [0], [1], [0, 0, 1, 1], [], []>} : vector<8x128xf32>, vector<128x384xf32>, vector<8x384xf32> -> vector<8x384xf32>
    %486 = vector.extract_strided_slice %484 {offsets = [0, 0], sizes = [8, 128], strides = [1, 1]} : vector<8x384xf32> to vector<8x128xf32>
    %487 = vector.extract_strided_slice %485 {offsets = [0, 0], sizes = [8, 128], strides = [1, 1]} : vector<8x384xf32> to vector<8x128xf32>
    %488 = arith.addf %486, %487 : vector<8x128xf32>
    %489 = arith.negf %488 : vector<8x128xf32>
    %490 = math.exp %489 : vector<8x128xf32>
    %cst_122 = arith.constant 1.000000e+00 : f32
    %491 = vector.broadcast %cst_122 : f32 to vector<8x128xf32>
    %492 = arith.addf %491, %490 : vector<8x128xf32>
    %493 = arith.divf %491, %492 : vector<8x128xf32>
    %494 = vector.extract_strided_slice %484 {offsets = [0, 128], sizes = [8, 128], strides = [1, 1]} : vector<8x384xf32> to vector<8x128xf32>
    %495 = vector.extract_strided_slice %485 {offsets = [0, 128], sizes = [8, 128], strides = [1, 1]} : vector<8x384xf32> to vector<8x128xf32>
    %496 = arith.addf %494, %495 : vector<8x128xf32>
    %497 = arith.negf %496 : vector<8x128xf32>
    %498 = math.exp %497 : vector<8x128xf32>
    %cst_123 = arith.constant 1.000000e+00 : f32
    %499 = vector.broadcast %cst_123 : f32 to vector<8x128xf32>
    %500 = arith.addf %499, %498 : vector<8x128xf32>
    %501 = arith.divf %499, %500 : vector<8x128xf32>
    %502 = vector.extract_strided_slice %484 {offsets = [0, 256], sizes = [8, 128], strides = [1, 1]} : vector<8x384xf32> to vector<8x128xf32>
    %503 = vector.extract_strided_slice %485 {offsets = [0, 256], sizes = [8, 128], strides = [1, 1]} : vector<8x384xf32> to vector<8x128xf32>
    %504 = arith.addf %503, %7 : vector<8x128xf32>
    %505 = arith.mulf %493, %504 : vector<8x128xf32>
    %506 = arith.addf %502, %505 : vector<8x128xf32>
    %507 = math.tanh %506 : vector<8x128xf32>
    %cst_124 = arith.constant 1.000000e+00 : f32
    %508 = vector.broadcast %cst_124 : f32 to vector<8x128xf32>
    %509 = arith.subf %508, %501 : vector<8x128xf32>
    %510 = arith.mulf %509, %507 : vector<8x128xf32>
    %511 = arith.mulf %501, %475 : vector<8x128xf32>
    %512 = arith.addf %510, %511 : vector<8x128xf32>
    %c11_i32 = arith.constant 11 : i32
    %513 = arith.addi %9, %c11_i32 : i32
    %514 = vector.broadcast %513 : i32 to vector<8x1xi32>
    %515 = arith.cmpi slt, %514, %3 : vector<8x1xi32>
    %516 = vector.shape_cast %515 : vector<8x1xi1> to vector<8x1xi1>
    %517 = vector.broadcast %516 : vector<8x1xi1> to vector<8x128xi1>
    %518 = arith.select %517, %512, %475 : vector<8x128xi1>, vector<8x128xf32>
    %cst_125 = arith.constant 0.000000e+00 : f32
    %519 = vector.shape_cast %515 : vector<8x1xi1> to vector<8x1xi1>
    %520 = vector.broadcast %519 : vector<8x1xi1> to vector<8x128xi1>
    %521 = vector.broadcast %cst_125 : f32 to vector<8x128xf32>
    %522 = arith.select %520, %518, %521 : vector<8x128xi1>, vector<8x128xf32>
    %c11_126 = arith.constant 11 : index
    %c0_127 = arith.constant 0 : index
    %c0_128 = arith.constant 0 : index
    %523 = vector.load %arg6[%c11_126, %c0_127, %c0_128] : memref<16x8x128xf32, #tpu.memory_space<vmem>>, vector<1x8x128xf32>
    %524 = vector.shape_cast %523 : vector<1x8x128xf32> to vector<8x128xf32>
    %525 = vector.shape_cast %522 : vector<8x128xf32> to vector<1x8x128xf32>
    tpu.vector_store %arg6[%c11_126, %c0_127, %c0_128], %525 {strides = array<i32>} : memref<16x8x128xf32, #tpu.memory_space<vmem>>, vector<1x8x128xf32>,
    %c12 = arith.constant 12 : index
    %c0_129 = arith.constant 0 : index
    %c0_130 = arith.constant 0 : index
    %526 = vector.load %arg3[%c12, %c0_129, %c0_130] : memref<16x8x384xf32, #tpu.memory_space<vmem>>, vector<1x8x384xf32>
    %527 = vector.shape_cast %526 : vector<1x8x384xf32> to vector<8x384xf32>
    %cst_131 = arith.constant dense<0.000000e+00> : vector<8x384xf32>
    %528 = tpu.matmul %518, %4, %cst_131 {dimension_numbers = #tpu.dot_dimension_numbers<[1], [0], [0], [1], [0, 0, 1, 1], [], []>} : vector<8x128xf32>, vector<128x384xf32>, vector<8x384xf32> -> vector<8x384xf32>
    %529 = vector.extract_strided_slice %527 {offsets = [0, 0], sizes = [8, 128], strides = [1, 1]} : vector<8x384xf32> to vector<8x128xf32>
    %530 = vector.extract_strided_slice %528 {offsets = [0, 0], sizes = [8, 128], strides = [1, 1]} : vector<8x384xf32> to vector<8x128xf32>
    %531 = arith.addf %529, %530 : vector<8x128xf32>
    %532 = arith.negf %531 : vector<8x128xf32>
    %533 = math.exp %532 : vector<8x128xf32>
    %cst_132 = arith.constant 1.000000e+00 : f32
    %534 = vector.broadcast %cst_132 : f32 to vector<8x128xf32>
    %535 = arith.addf %534, %533 : vector<8x128xf32>
    %536 = arith.divf %534, %535 : vector<8x128xf32>
    %537 = vector.extract_strided_slice %527 {offsets = [0, 128], sizes = [8, 128], strides = [1, 1]} : vector<8x384xf32> to vector<8x128xf32>
    %538 = vector.extract_strided_slice %528 {offsets = [0, 128], sizes = [8, 128], strides = [1, 1]} : vector<8x384xf32> to vector<8x128xf32>
    %539 = arith.addf %537, %538 : vector<8x128xf32>
    %540 = arith.negf %539 : vector<8x128xf32>
    %541 = math.exp %540 : vector<8x128xf32>
    %cst_133 = arith.constant 1.000000e+00 : f32
    %542 = vector.broadcast %cst_133 : f32 to vector<8x128xf32>
    %543 = arith.addf %542, %541 : vector<8x128xf32>
    %544 = arith.divf %542, %543 : vector<8x128xf32>
    %545 = vector.extract_strided_slice %527 {offsets = [0, 256], sizes = [8, 128], strides = [1, 1]} : vector<8x384xf32> to vector<8x128xf32>
    %546 = vector.extract_strided_slice %528 {offsets = [0, 256], sizes = [8, 128], strides = [1, 1]} : vector<8x384xf32> to vector<8x128xf32>
    %547 = arith.addf %546, %7 : vector<8x128xf32>
    %548 = arith.mulf %536, %547 : vector<8x128xf32>
    %549 = arith.addf %545, %548 : vector<8x128xf32>
    %550 = math.tanh %549 : vector<8x128xf32>
    %cst_134 = arith.constant 1.000000e+00 : f32
    %551 = vector.broadcast %cst_134 : f32 to vector<8x128xf32>
    %552 = arith.subf %551, %544 : vector<8x128xf32>
    %553 = arith.mulf %552, %550 : vector<8x128xf32>
    %554 = arith.mulf %544, %518 : vector<8x128xf32>
    %555 = arith.addf %553, %554 : vector<8x128xf32>
    %c12_i32 = arith.constant 12 : i32
    %556 = arith.addi %9, %c12_i32 : i32
    %557 = vector.broadcast %556 : i32 to vector<8x1xi32>
    %558 = arith.cmpi slt, %557, %3 : vector<8x1xi32>
    %559 = vector.shape_cast %558 : vector<8x1xi1> to vector<8x1xi1>
    %560 = vector.broadcast %559 : vector<8x1xi1> to vector<8x128xi1>
    %561 = arith.select %560, %555, %518 : vector<8x128xi1>, vector<8x128xf32>
    %cst_135 = arith.constant 0.000000e+00 : f32
    %562 = vector.shape_cast %558 : vector<8x1xi1> to vector<8x1xi1>
    %563 = vector.broadcast %562 : vector<8x1xi1> to vector<8x128xi1>
    %564 = vector.broadcast %cst_135 : f32 to vector<8x128xf32>
    %565 = arith.select %563, %561, %564 : vector<8x128xi1>, vector<8x128xf32>
    %c12_136 = arith.constant 12 : index
    %c0_137 = arith.constant 0 : index
    %c0_138 = arith.constant 0 : index
    %566 = vector.load %arg6[%c12_136, %c0_137, %c0_138] : memref<16x8x128xf32, #tpu.memory_space<vmem>>, vector<1x8x128xf32>
    %567 = vector.shape_cast %566 : vector<1x8x128xf32> to vector<8x128xf32>
    %568 = vector.shape_cast %565 : vector<8x128xf32> to vector<1x8x128xf32>
    tpu.vector_store %arg6[%c12_136, %c0_137, %c0_138], %568 {strides = array<i32>} : memref<16x8x128xf32, #tpu.memory_space<vmem>>, vector<1x8x128xf32>,
    %c13 = arith.constant 13 : index
    %c0_139 = arith.constant 0 : index
    %c0_140 = arith.constant 0 : index
    %569 = vector.load %arg3[%c13, %c0_139, %c0_140] : memref<16x8x384xf32, #tpu.memory_space<vmem>>, vector<1x8x384xf32>
    %570 = vector.shape_cast %569 : vector<1x8x384xf32> to vector<8x384xf32>
    %cst_141 = arith.constant dense<0.000000e+00> : vector<8x384xf32>
    %571 = tpu.matmul %561, %4, %cst_141 {dimension_numbers = #tpu.dot_dimension_numbers<[1], [0], [0], [1], [0, 0, 1, 1], [], []>} : vector<8x128xf32>, vector<128x384xf32>, vector<8x384xf32> -> vector<8x384xf32>
    %572 = vector.extract_strided_slice %570 {offsets = [0, 0], sizes = [8, 128], strides = [1, 1]} : vector<8x384xf32> to vector<8x128xf32>
    %573 = vector.extract_strided_slice %571 {offsets = [0, 0], sizes = [8, 128], strides = [1, 1]} : vector<8x384xf32> to vector<8x128xf32>
    %574 = arith.addf %572, %573 : vector<8x128xf32>
    %575 = arith.negf %574 : vector<8x128xf32>
    %576 = math.exp %575 : vector<8x128xf32>
    %cst_142 = arith.constant 1.000000e+00 : f32
    %577 = vector.broadcast %cst_142 : f32 to vector<8x128xf32>
    %578 = arith.addf %577, %576 : vector<8x128xf32>
    %579 = arith.divf %577, %578 : vector<8x128xf32>
    %580 = vector.extract_strided_slice %570 {offsets = [0, 128], sizes = [8, 128], strides = [1, 1]} : vector<8x384xf32> to vector<8x128xf32>
    %581 = vector.extract_strided_slice %571 {offsets = [0, 128], sizes = [8, 128], strides = [1, 1]} : vector<8x384xf32> to vector<8x128xf32>
    %582 = arith.addf %580, %581 : vector<8x128xf32>
    %583 = arith.negf %582 : vector<8x128xf32>
    %584 = math.exp %583 : vector<8x128xf32>
    %cst_143 = arith.constant 1.000000e+00 : f32
    %585 = vector.broadcast %cst_143 : f32 to vector<8x128xf32>
    %586 = arith.addf %585, %584 : vector<8x128xf32>
    %587 = arith.divf %585, %586 : vector<8x128xf32>
    %588 = vector.extract_strided_slice %570 {offsets = [0, 256], sizes = [8, 128], strides = [1, 1]} : vector<8x384xf32> to vector<8x128xf32>
    %589 = vector.extract_strided_slice %571 {offsets = [0, 256], sizes = [8, 128], strides = [1, 1]} : vector<8x384xf32> to vector<8x128xf32>
    %590 = arith.addf %589, %7 : vector<8x128xf32>
    %591 = arith.mulf %579, %590 : vector<8x128xf32>
    %592 = arith.addf %588, %591 : vector<8x128xf32>
    %593 = math.tanh %592 : vector<8x128xf32>
    %cst_144 = arith.constant 1.000000e+00 : f32
    %594 = vector.broadcast %cst_144 : f32 to vector<8x128xf32>
    %595 = arith.subf %594, %587 : vector<8x128xf32>
    %596 = arith.mulf %595, %593 : vector<8x128xf32>
    %597 = arith.mulf %587, %561 : vector<8x128xf32>
    %598 = arith.addf %596, %597 : vector<8x128xf32>
    %c13_i32 = arith.constant 13 : i32
    %599 = arith.addi %9, %c13_i32 : i32
    %600 = vector.broadcast %599 : i32 to vector<8x1xi32>
    %601 = arith.cmpi slt, %600, %3 : vector<8x1xi32>
    %602 = vector.shape_cast %601 : vector<8x1xi1> to vector<8x1xi1>
    %603 = vector.broadcast %602 : vector<8x1xi1> to vector<8x128xi1>
    %604 = arith.select %603, %598, %561 : vector<8x128xi1>, vector<8x128xf32>
    %cst_145 = arith.constant 0.000000e+00 : f32
    %605 = vector.shape_cast %601 : vector<8x1xi1> to vector<8x1xi1>
    %606 = vector.broadcast %605 : vector<8x1xi1> to vector<8x128xi1>
    %607 = vector.broadcast %cst_145 : f32 to vector<8x128xf32>
    %608 = arith.select %606, %604, %607 : vector<8x128xi1>, vector<8x128xf32>
    %c13_146 = arith.constant 13 : index
    %c0_147 = arith.constant 0 : index
    %c0_148 = arith.constant 0 : index
    %609 = vector.load %arg6[%c13_146, %c0_147, %c0_148] : memref<16x8x128xf32, #tpu.memory_space<vmem>>, vector<1x8x128xf32>
    %610 = vector.shape_cast %609 : vector<1x8x128xf32> to vector<8x128xf32>
    %611 = vector.shape_cast %608 : vector<8x128xf32> to vector<1x8x128xf32>
    tpu.vector_store %arg6[%c13_146, %c0_147, %c0_148], %611 {strides = array<i32>} : memref<16x8x128xf32, #tpu.memory_space<vmem>>, vector<1x8x128xf32>,
    %c14 = arith.constant 14 : index
    %c0_149 = arith.constant 0 : index
    %c0_150 = arith.constant 0 : index
    %612 = vector.load %arg3[%c14, %c0_149, %c0_150] : memref<16x8x384xf32, #tpu.memory_space<vmem>>, vector<1x8x384xf32>
    %613 = vector.shape_cast %612 : vector<1x8x384xf32> to vector<8x384xf32>
    %cst_151 = arith.constant dense<0.000000e+00> : vector<8x384xf32>
    %614 = tpu.matmul %604, %4, %cst_151 {dimension_numbers = #tpu.dot_dimension_numbers<[1], [0], [0], [1], [0, 0, 1, 1], [], []>} : vector<8x128xf32>, vector<128x384xf32>, vector<8x384xf32> -> vector<8x384xf32>
    %615 = vector.extract_strided_slice %613 {offsets = [0, 0], sizes = [8, 128], strides = [1, 1]} : vector<8x384xf32> to vector<8x128xf32>
    %616 = vector.extract_strided_slice %614 {offsets = [0, 0], sizes = [8, 128], strides = [1, 1]} : vector<8x384xf32> to vector<8x128xf32>
    %617 = arith.addf %615, %616 : vector<8x128xf32>
    %618 = arith.negf %617 : vector<8x128xf32>
    %619 = math.exp %618 : vector<8x128xf32>
    %cst_152 = arith.constant 1.000000e+00 : f32
    %620 = vector.broadcast %cst_152 : f32 to vector<8x128xf32>
    %621 = arith.addf %620, %619 : vector<8x128xf32>
    %622 = arith.divf %620, %621 : vector<8x128xf32>
    %623 = vector.extract_strided_slice %613 {offsets = [0, 128], sizes = [8, 128], strides = [1, 1]} : vector<8x384xf32> to vector<8x128xf32>
    %624 = vector.extract_strided_slice %614 {offsets = [0, 128], sizes = [8, 128], strides = [1, 1]} : vector<8x384xf32> to vector<8x128xf32>
    %625 = arith.addf %623, %624 : vector<8x128xf32>
    %626 = arith.negf %625 : vector<8x128xf32>
    %627 = math.exp %626 : vector<8x128xf32>
    %cst_153 = arith.constant 1.000000e+00 : f32
    %628 = vector.broadcast %cst_153 : f32 to vector<8x128xf32>
    %629 = arith.addf %628, %627 : vector<8x128xf32>
    %630 = arith.divf %628, %629 : vector<8x128xf32>
    %631 = vector.extract_strided_slice %613 {offsets = [0, 256], sizes = [8, 128], strides = [1, 1]} : vector<8x384xf32> to vector<8x128xf32>
    %632 = vector.extract_strided_slice %614 {offsets = [0, 256], sizes = [8, 128], strides = [1, 1]} : vector<8x384xf32> to vector<8x128xf32>
    %633 = arith.addf %632, %7 : vector<8x128xf32>
    %634 = arith.mulf %622, %633 : vector<8x128xf32>
    %635 = arith.addf %631, %634 : vector<8x128xf32>
    %636 = math.tanh %635 : vector<8x128xf32>
    %cst_154 = arith.constant 1.000000e+00 : f32
    %637 = vector.broadcast %cst_154 : f32 to vector<8x128xf32>
    %638 = arith.subf %637, %630 : vector<8x128xf32>
    %639 = arith.mulf %638, %636 : vector<8x128xf32>
    %640 = arith.mulf %630, %604 : vector<8x128xf32>
    %641 = arith.addf %639, %640 : vector<8x128xf32>
    %c14_i32 = arith.constant 14 : i32
    %642 = arith.addi %9, %c14_i32 : i32
    %643 = vector.broadcast %642 : i32 to vector<8x1xi32>
    %644 = arith.cmpi slt, %643, %3 : vector<8x1xi32>
    %645 = vector.shape_cast %644 : vector<8x1xi1> to vector<8x1xi1>
    %646 = vector.broadcast %645 : vector<8x1xi1> to vector<8x128xi1>
    %647 = arith.select %646, %641, %604 : vector<8x128xi1>, vector<8x128xf32>
    %cst_155 = arith.constant 0.000000e+00 : f32
    %648 = vector.shape_cast %644 : vector<8x1xi1> to vector<8x1xi1>
    %649 = vector.broadcast %648 : vector<8x1xi1> to vector<8x128xi1>
    %650 = vector.broadcast %cst_155 : f32 to vector<8x128xf32>
    %651 = arith.select %649, %647, %650 : vector<8x128xi1>, vector<8x128xf32>
    %c14_156 = arith.constant 14 : index
    %c0_157 = arith.constant 0 : index
    %c0_158 = arith.constant 0 : index
    %652 = vector.load %arg6[%c14_156, %c0_157, %c0_158] : memref<16x8x128xf32, #tpu.memory_space<vmem>>, vector<1x8x128xf32>
    %653 = vector.shape_cast %652 : vector<1x8x128xf32> to vector<8x128xf32>
    %654 = vector.shape_cast %651 : vector<8x128xf32> to vector<1x8x128xf32>
    tpu.vector_store %arg6[%c14_156, %c0_157, %c0_158], %654 {strides = array<i32>} : memref<16x8x128xf32, #tpu.memory_space<vmem>>, vector<1x8x128xf32>,
    %c15 = arith.constant 15 : index
    %c0_159 = arith.constant 0 : index
    %c0_160 = arith.constant 0 : index
    %655 = vector.load %arg3[%c15, %c0_159, %c0_160] : memref<16x8x384xf32, #tpu.memory_space<vmem>>, vector<1x8x384xf32>
    %656 = vector.shape_cast %655 : vector<1x8x384xf32> to vector<8x384xf32>
    %cst_161 = arith.constant dense<0.000000e+00> : vector<8x384xf32>
    %657 = tpu.matmul %647, %4, %cst_161 {dimension_numbers = #tpu.dot_dimension_numbers<[1], [0], [0], [1], [0, 0, 1, 1], [], []>} : vector<8x128xf32>, vector<128x384xf32>, vector<8x384xf32> -> vector<8x384xf32>
    %658 = vector.extract_strided_slice %656 {offsets = [0, 0], sizes = [8, 128], strides = [1, 1]} : vector<8x384xf32> to vector<8x128xf32>
    %659 = vector.extract_strided_slice %657 {offsets = [0, 0], sizes = [8, 128], strides = [1, 1]} : vector<8x384xf32> to vector<8x128xf32>
    %660 = arith.addf %658, %659 : vector<8x128xf32>
    %661 = arith.negf %660 : vector<8x128xf32>
    %662 = math.exp %661 : vector<8x128xf32>
    %cst_162 = arith.constant 1.000000e+00 : f32
    %663 = vector.broadcast %cst_162 : f32 to vector<8x128xf32>
    %664 = arith.addf %663, %662 : vector<8x128xf32>
    %665 = arith.divf %663, %664 : vector<8x128xf32>
    %666 = vector.extract_strided_slice %656 {offsets = [0, 128], sizes = [8, 128], strides = [1, 1]} : vector<8x384xf32> to vector<8x128xf32>
    %667 = vector.extract_strided_slice %657 {offsets = [0, 128], sizes = [8, 128], strides = [1, 1]} : vector<8x384xf32> to vector<8x128xf32>
    %668 = arith.addf %666, %667 : vector<8x128xf32>
    %669 = arith.negf %668 : vector<8x128xf32>
    %670 = math.exp %669 : vector<8x128xf32>
    %cst_163 = arith.constant 1.000000e+00 : f32
    %671 = vector.broadcast %cst_163 : f32 to vector<8x128xf32>
    %672 = arith.addf %671, %670 : vector<8x128xf32>
    %673 = arith.divf %671, %672 : vector<8x128xf32>
    %674 = vector.extract_strided_slice %656 {offsets = [0, 256], sizes = [8, 128], strides = [1, 1]} : vector<8x384xf32> to vector<8x128xf32>
    %675 = vector.extract_strided_slice %657 {offsets = [0, 256], sizes = [8, 128], strides = [1, 1]} : vector<8x384xf32> to vector<8x128xf32>
    %676 = arith.addf %675, %7 : vector<8x128xf32>
    %677 = arith.mulf %665, %676 : vector<8x128xf32>
    %678 = arith.addf %674, %677 : vector<8x128xf32>
    %679 = math.tanh %678 : vector<8x128xf32>
    %cst_164 = arith.constant 1.000000e+00 : f32
    %680 = vector.broadcast %cst_164 : f32 to vector<8x128xf32>
    %681 = arith.subf %680, %673 : vector<8x128xf32>
    %682 = arith.mulf %681, %679 : vector<8x128xf32>
    %683 = arith.mulf %673, %647 : vector<8x128xf32>
    %684 = arith.addf %682, %683 : vector<8x128xf32>
    %c15_i32 = arith.constant 15 : i32
    %685 = arith.addi %9, %c15_i32 : i32
    %686 = vector.broadcast %685 : i32 to vector<8x1xi32>
    %687 = arith.cmpi slt, %686, %3 : vector<8x1xi32>
    %688 = vector.shape_cast %687 : vector<8x1xi1> to vector<8x1xi1>
    %689 = vector.broadcast %688 : vector<8x1xi1> to vector<8x128xi1>
    %690 = arith.select %689, %684, %647 : vector<8x128xi1>, vector<8x128xf32>
    %cst_165 = arith.constant 0.000000e+00 : f32
    %691 = vector.shape_cast %687 : vector<8x1xi1> to vector<8x1xi1>
    %692 = vector.broadcast %691 : vector<8x1xi1> to vector<8x128xi1>
    %693 = vector.broadcast %cst_165 : f32 to vector<8x128xf32>
    %694 = arith.select %692, %690, %693 : vector<8x128xi1>, vector<8x128xf32>
    %c15_166 = arith.constant 15 : index
    %c0_167 = arith.constant 0 : index
    %c0_168 = arith.constant 0 : index
    %695 = vector.load %arg6[%c15_166, %c0_167, %c0_168] : memref<16x8x128xf32, #tpu.memory_space<vmem>>, vector<1x8x128xf32>
    %696 = vector.shape_cast %695 : vector<1x8x128xf32> to vector<8x128xf32>
    %697 = vector.shape_cast %694 : vector<8x128xf32> to vector<1x8x128xf32>
    tpu.vector_store %arg6[%c15_166, %c0_167, %c0_168], %697 {strides = array<i32>} : memref<16x8x128xf32, #tpu.memory_space<vmem>>, vector<1x8x128xf32>,
    %c0_169 = arith.constant 0 : index
    %c0_170 = arith.constant 0 : index
    %698 = vector.load %arg7[%c0_169, %c0_170] : memref<8x128xf32, #tpu.memory_space<vmem>>, vector<8x128xf32>
    tpu.vector_store %arg7[%c0_169, %c0_170], %690 {strides = array<i32>} : memref<8x128xf32, #tpu.memory_space<vmem>>, vector<8x128xf32>,
    return
  }
  func.func @transform_0(%arg0: i32, %arg1: i32) -> (i32, i32) {
    %c0_i32 = arith.constant 0 : i32
    %c0_i32_0 = arith.constant 0 : i32
    return %arg0, %c0_i32 : i32, i32
  }
  func.func @transform_1(%arg0: i32, %arg1: i32) -> (i32, i32, i32) {
    %c0_i32 = arith.constant 0 : i32
    %c0_i32_0 = arith.constant 0 : i32
    return %arg1, %arg0, %c0_i32 : i32, i32, i32
  }
  func.func @transform_2(%arg0: i32, %arg1: i32) -> (i32, i32) {
    %c0_i32 = arith.constant 0 : i32
    %c0_i32_0 = arith.constant 0 : i32
    %c0_i32_1 = arith.constant 0 : i32
    return %c0_i32, %c0_i32_0 : i32, i32
  }
  func.func @transform_3(%arg0: i32, %arg1: i32) -> (i32, i32) {
    %c0_i32 = arith.constant 0 : i32
    %c0_i32_0 = arith.constant 0 : i32
    %c0_i32_1 = arith.constant 0 : i32
    return %c0_i32, %c0_i32_0 : i32, i32
  }
  func.func @transform_4(%arg0: i32, %arg1: i32) -> (i32, i32, i32) {
    %c0_i32 = arith.constant 0 : i32
    %c0_i32_0 = arith.constant 0 : i32
    return %arg1, %arg0, %c0_i32 : i32, i32, i32
  }
  func.func @transform_5(%arg0: i32, %arg1: i32) -> (i32, i32) {
    %c0_i32 = arith.constant 0 : i32
    %c0_i32_0 = arith.constant 0 : i32
    return %arg0, %c0_i32 : i32, i32
  }
}

</mosaic_0001>

<bundles_post_ra>
// kernel: tpu_custom_call.1
= control target key start
LH: loop header
LB: loop body
LE: loop exit
PB: predicated region body
PF: predicated region fallthrough
CT: control target
= control target key end

     0   :  { %11 = vsyncpa [#allocation3], 0  ;;  %s6834_s0 = inlined_call_operand.vmem [shape: s32[16,1], index: 0, kind: input, shape index: {}]   ;;  %s6835_s1 = inlined_call_operand.hbm [shape: f32[16,16,384], index: 1, kind: input, shape index: {}]   ;;  %s6836_s2 = inlined_call_operand.hbm [shape: f32[128,384], index: 2, kind: input, shape index: {}]   ;;  %s6837_s3 = inlined_call_operand.vmem [shape: f32[1,128], index: 3, kind: input, shape index: {}]   ;;  %s6838_s4 = inlined_call_operand.hbm [shape: f32[16,16,128], index: 4, kind: output, shape index: {0}]   ;;  %s6839_s5 = inlined_call_operand.hbm [shape: f32[16,128], index: 5, kind: output, shape index: {1}]  }
   0x1   :  { %13 = vsyncpa [#allocation3 + $0x1], 0 }
   0x2   :  { %14 = vsyncpa [#allocation6], 0 }
   0x3   :  { %15 = vsyncpa [#allocation4], 0 }
   0x4   :  { %17 = vsyncpa [#allocation4 + $0x1], 0 }
   0x5   :  { %18 = vsyncpa [#allocation9], 0 }
   0x6   :  { %20 = vsyncpa [#allocation9 + $0x1], 0  ;;  %s5739_s18 = smov 0   ;;  %s5741_s19 = smov 0  }
   0x7   :  { %s5743_s20 = smov 0   ;;  %s5745_s21 = smov 0  }
   0x8   :  { %s5747_s22 = smov 0   ;;  %s5749_s23 = smov 0  }
   0x9 LB: > { %6850 = sst [smem:[#allocation14_spill]] %s5693_s23  ;;  %s3406_s24 = sadd.s32 4294967295, %s5693_s23   ;;  %s5693_s23 = sphi %s5749_s23, %s26_s23   ;;  %s5689_s22 = sphi %s5747_s22, %s6876_s22   ;;  %s5685_s21 = sphi %s5745_s21, %s6875_s21   ;;  %s5681_s20 = sphi %s5743_s20, %s6874_s20   ;;  %s5677_s19 = sphi %s5741_s19, %s6873_s19   ;;  %s5673_s18 = sphi %s5739_s18, %s6872_s18  }
   0xa   : > { %s3407_s25 = sadd.s32 4294967294, %s5693_s23   ;;  %p80_p0 = scmp.ne.s32.totalorder %s5681_s20, %s5677_s19 }
   0xb   : > { %p81_p1 = scmp.eq.s32.totalorder %s5693_s23, 0  ;;  %p86_p2 = scmp.ne.s32.totalorder %s5677_s19, %s5673_s18 }
   0xc   : > { %p5777_p3 = scmp.eq.s32.totalorder %s3406_s24, 0  ;;  %p154_p4 = scmp.eq.s32.totalorder %s3406_s24, 1 }
   0xd   : > { %p5781_p5 = por %p81_p1, %p80_p0  ;;  %p160_p6 = scmp.eq.s32.totalorder %s3407_s25, 1 }
   0xe   : > { %s6851_s27 = scalar_select %p5777_p3, 1, 0 }
   0xf   : > { %p5787_p7 = por %p5777_p3, %p86_p2  ;;  %p5791_p8 = por %p154_p4, %p80_p0 }
  0x10   : > { %p5795_p9 = por %p160_p6, %p86_p2  ;;  %p3408_p10 = scmp.ge.s32.totalorder %s5693_s23, 1 }
  0x11   : > { %s6853_s29 = scalar_select %p5787_p7, 1, 0 }
  0x12   : > { %s6854_s30 = scalar_select %p5791_p8, 1, 0 }
  0x13   : > { %s6855_s6 = scalar_select %p5795_p9, 1, 0 }
  0x14   : > { %p193_p11 = scmp.lt.s32.totalorder %s5693_s23, 3  ;;  %s5695_s8 = smov [#allocation5]  }
  0x15   : > { %s205_s9 = sshll.u32 %s5695_s8, 4  ;;  %p5289_p1 = scmp.lt.s32.totalorder %s5693_s23, 2  ;;  %s5805_s9 = int_to_ptr.vmem [resolvable:$true] %s205_s9 }
  0x16   : > { %p5801_p12 = pnand %p3408_p10, %p193_p11  ;;  %s38_s12 = sadd.s32 1, %s5689_s22 }
  0x17   : > { %p5819_p4 = pnand %p5289_p1, %p5781_p5  ;;  %p5824_p6 = scmp.ge.s32.totalorder %s38_s12, 2 }
  0x18   : > { %s6856_s7 = scalar_select %p5801_p12, 1, 0 }
  0x19   : > { %p5273_p13 = pneg %p5801_p12  ;;  %s5517_s16 = scalar_lea.hbm %s6836_s2, 6144 }
  0x1a   : > { %s6858_s11 = scalar_select %p5819_p4, 1, 0 }
  0x1b   : > { %p5813_p2 = pnand %p5273_p13, %p5777_p3  ;;  %p5518_p10 = scmp.ne.s32.totalorder %s6836_s2, %s5517_s16 }
  0x1c   : > { %s6859_s13 = scalar_select %p5824_p6, 1, 0 }
  0x1d   : > { %p5519_p11 = pneg %p5813_p2  ;;  %p5524_p1 = scmp.lt.u32.totalorder %s5517_s16, %s6836_s2 }
  0x1f   : > { %p5520_p13 = pnand %p5519_p11, %p5518_p10 }
  0x21   : > { %p5521_p5 = pneg %p5520_p13 }
  0x23   : > { %p5526_p0 = pnand %p5524_p1, %p5521_p5 }
  0x25   : > { %5529 = shalt.err (!%p5526_p0)
}
  0x26   : > { %s5530_s8 = scalar_lea.vmem %s5805_s9, 6144  ;;  %p5538_p7 = scmp.lt.s32.totalorder %s5805_s9, %s5805_s9 }
  0x27   : > { %p5531_p9 = scmp.ne.s32.totalorder %s5805_s9, %s5530_s8  ;;  %p5539_p12 = scmp.lt.s32.totalorder %s5530_s8, %s5530_s8 }
  0x29   : > { %p5533_p8 = pnand %p5531_p9, %p5519_p11  ;;  %p5540_p4 = por %p5539_p12, %p5538_p7 }
  0x2b   : > { %p5534_p3 = pneg %p5533_p8 }
  0x2d   : > { %p5541_p6 = pnand %p5540_p4, %p5534_p3 }
  0x2f   : > { %5544 = shalt.err (!%p5541_p6)
}
  0x30   : > { %s6848_s14 = smov 384   ;;  %s6849_s15 = smov 24  }
  0x31   : > { %5276 = dma.hbm_to_vmem [thread:$0]  (!%p5813_p2), %s6836_s2, 6144, %s5805_s9, [#allocation6], %s6848_s14, %s6848_s14, %s6849_s15  }
  0x32   : > { %s229_s24 = sand.u32 1, %s5681_s20   ;;  %p6860_p3 = scmp.ne.s32.totalorder %s6859_s13, 0 }
  0x33   : > { %s5260_s25 = smul.u32 384, %s229_s24  ;;  %s6861_s17 = sadd.s32 1, %s5681_s20 }
  0x34   : > { %s6878_s12 = smov (%p6860_p3, %s38_s12), 0  ;;  %s5261_s8 = smul.u32 384, %s5689_s22 }
  0x35   : > { %s69_s28 = ssub.s32 %s5689_s22, %s6878_s12  ;;  %s233_s9 = scalar_lea.vmem [#allocation2], %s5260_s25 }
  0x36   : > { %p71_p7 = scmp.eq.s32.totalorder %s69_s28, 0  ;;  %s5863_s23 = scalar_lea.hbm %s6835_s1, %s5261_s8 }
  0x37   : > { %s243_s16 = sshll.u32 %s233_s9, 4  ;;  %s5872_s14 = scalar_lea.sflag [#allocation3], %s229_s24  ;;  %s5870_s16 = int_to_ptr.vmem [resolvable:$true] %s243_s16 }
  0x38   : > { %s5868_s13 = scalar_select %p71_p7, %s5681_s20, %s6861_s17  }
  0x39   : > { %s5545_s15 = scalar_lea.hbm %s5863_s23, 6144  ;;  %p6862_p9 = scmp.ne.s32.totalorder %s6858_s11, 0 }
  0x3a   : > { %p5546_p8 = scmp.ne.s32.totalorder %s5863_s23, %s5545_s15  ;;  %s5550_s25 = scalar_lea.hbm %s6835_s1, 12288 }
  0x3b   : > { %p5547_p12 = pneg %p6862_p9  ;;  %p5551_p4 = scmp.lt.u32.totalorder %s5863_s23, %s6835_s1 }
  0x3c   : > { %p5552_p6 = scmp.lt.u32.totalorder %s5550_s25, %s5545_s15  ;;  %p5554_p11 = scmp.lt.u32.totalorder %s5545_s15, %s5863_s23 }
  0x3d   : > { %p5548_p0 = pnand %p5547_p12, %p5546_p8 }
  0x3e   : > { %p5553_p10 = por %p5552_p6, %p5551_p4 }
  0x3f   : > { %p5549_p2 = pneg %p5548_p0 }
  0x40   : > { %p5555_p13 = por %p5554_p11, %p5553_p10 }
  0x42   : > { %p5556_p5 = pnand %p5555_p13, %p5549_p2 }
  0x44   : > { %5559 = shalt.err (!%p5556_p5)
}
  0x45   : > { %s5560_s24 = scalar_lea.vmem %s5870_s16, 6144  ;;  %s5698_s9 = smov [#allocation2]  }
  0x46   : > { %p5561_p1 = scmp.ne.s32.totalorder %s5870_s16, %s5560_s24  ;;  %s5565_s17 = sshll.u32 %s5698_s9, 4  ;;  %s5566_s17 = int_to_ptr.vmem [resolvable:$false] %s5565_s17 }
  0x47   : > { %s5567_s26 = scalar_lea.vmem %s5566_s17, 12288  ;;  %p5568_p8 = scmp.lt.s32.totalorder %s5870_s16, %s5566_s17 }
  0x48   : > { %p5563_p3 = pnand %p5561_p1, %p5547_p12  ;;  %p5569_p0 = scmp.lt.s32.totalorder %s5567_s26, %s5560_s24 }
  0x4a   : > { %p5564_p7 = pneg %p5563_p3  ;;  %p5570_p4 = por %p5569_p0, %p5568_p8 }
  0x4c   : > { %p5571_p6 = pnand %p5570_p4, %p5564_p7 }
  0x4e   : > { %5574 = shalt.err (!%p5571_p6)
}
  0x4f   : > { %s5699_s15 = smov 768   ;;  %s6863_s28 = smov 24  }
  0x50   : > { %s6864_s25 = smov 384   ;;  %p6865_p12 = scmp.ne.s32.totalorder %s6856_s7, 0 }
  0x51   : > { %5280 = dma.hbm_to_vmem [thread:$0]  (!%p6862_p9), %s5863_s23, 6144, %s5870_s16, %s5872_s14, %s5699_s15, %s6864_s25, %s6863_s28  }
  0x52   : > { %255 = sbr.rel (%p6865_p12) target bundleno = 4326 (0x10e6), region = 36  ;;  %s5905_s8 = sand.u32 (!%p6865_p12), 1, %s5677_s19  }
  0x53   : > { %s5262_s10 = smul.u32 (!%p6865_p12), 384, %s5905_s8  ;;  %s258_s24 = scalar_lea.sflag (!%p6865_p12), [#allocation3], %s5905_s8 }
  0x54   : > { %p6866_p2 = scmp.ne.s32.totalorder (!%p6865_p12), %s6853_s29, 0 }
  0x55   : > { %s5909_s9 = scalar_lea.vmem (!%p6865_p12), [#allocation2], %s5262_s10 }
  0x59   : > { %5656 = dma.done.wait (%p6866_p2), %s258_s24, 6144  }
  0x5a   : > { %5658 = vsyncadd (%p6866_p2), %s258_s24, 4294961152  ;;  %p6867_p9 = scmp.ne.s32.totalorder %s6851_s27, 0 }
  0x5c   : > { %5660 = dma.done.wait (%p6867_p9), [#allocation6], 6144  }
  0x5d   : > { %5662 = vsyncadd (%p6867_p9), [#allocation6], 4294961152  ;;  %v5700_v0 = vmov 0.0|0.0   ;;  %v5701_v1 = vmov 0.0   ;;  %vm5702_vm0 = vmmov 0   ;;  %v5703_v2 = vmov 0  }
  0x5e   : > { %4396 = vmatprep.subr.bf16.mxu1 %v5700_v0  ;;  %437 = vmatprep.mubr.f32.mxu0 %v5701_v1  ;;  %v314_v3 = vld [vmem:[#allocation5 + $0x8] sm:$0xff]  ;;  %v317_v4 = vld [vmem:[#allocation5 + $0x20] sm:$0xff]  ;;  %v316_v7 = vld [vmem:[#allocation5 + $0x18] sm:$0xff]  ;;  %p301_p10 = scmp.lt.s32.totalorder %s5685_s21, 1  ;;  %s3414_s17 = sshll.u32 %s5905_s8, 7 }
  0x5f   : > { %3836 = vmatprep.mubr.msk.f32.mxu1 %vm5702_vm0, %v5701_v1  ;;  %5351 = vset.pattern.permute.xlu0 %v5703_v2  ;;  %v313_v5 = vld [vmem:[#allocation5] sm:$0xff]  ;;  %v5925_v6 = vpack.c.bf16 %v317_v4, %v314_v3  ;;  %v320_v8 = vld [vmem:[#allocation5 + $0x38] sm:$0xff]  ;;  %v323_v9 = vld [vmem:[#allocation5 + $0x50] sm:$0xff]  ;;  %s6078_s26 = scalar_lea.vmem [#allocation7], %s3414_s17  ;;  %s3415_s24 = sshll.u32 %s5905_s8, 3 }
  0x60   : > { %5352 = vset.pattern.permute.xlu1 %v5703_v2  ;;  %v5927_v10 = vpack.c.bf16 %v316_v7, %v313_v5  ;;  %v5929_v11 = vpack.c.bf16 %v323_v9, %v320_v8  ;;  %v319_v12 = vld [vmem:[#allocation5 + $0x30] sm:$0xff]  ;;  %v322_v13 = vld [vmem:[#allocation5 + $0x48] sm:$0xff]  ;;  %v329_v15 = vld [vmem:[#allocation5 + $0x80] sm:$0xff]  ;;  %s302_s23 = scalar_select %p301_p10, %s5685_s21, 1 }
  0x61   : > { %v326_v14 = vld [vmem:[#allocation5 + $0x68] sm:$0xff]  ;;  %4365 = vmatprep.subr.bf16.mxu0 %v5925_v6  ;;  %v5934_v16 = vpack.c.bf16 %v322_v13, %v319_v12  ;;  %v325_v18 = vld [vmem:[#allocation5 + $0x60] sm:$0xff]  ;;  %v328_v19 = vld [vmem:[#allocation5 + $0x78] sm:$0xff]  ;;  %s3233_s15 = scalar_lea.sflag [#allocation4], %s5905_s8  ;;  %p6868_p13 = scmp.ne.s32.totalorder %s6854_s30, 0 }
  0x62   : > { %4367 = vmatpush1.bf16.msra.mxu0 %v5927_v10  ;;  %v5937_v17 = vpack.c.bf16 %v329_v15, %v326_v14  ;;  %v332_v20 = vld [vmem:[#allocation5 + $0x98] sm:$0xff]  ;;  %v335_v21 = vld [vmem:[#allocation5 + $0xb0] sm:$0xff]  ;;  %v5941_v22 = vpack.c.bf16 %v328_v19, %v325_v18  ;;  %v334_v25 = vld [vmem:[#allocation5 + $0xa8] sm:$0xff]  ;;  %s3416_s27 = sshll.u32 %s302_s23, 3  ;;  %s3528_s23 = sshll.u32 %s5685_s21, 7 }
  0x63   : > { %4369 = vmatprep.subr.bf16.mxu0 %v5929_v11  ;;  %v331_v23 = vld [vmem:[#allocation5 + $0x90] sm:$0xff]  ;;  %v5944_v24 = vpack.c.bf16 %v335_v21, %v332_v20  ;;  %v318_v27 = vld [vmem:[#allocation5 + $0x28] sm:$0xff]  ;;  %v341_v29 = vld [vmem:[#allocation5 + $0xe0] sm:$0xff]  ;;  %s304_s11 = scalar_lea.vmem %s6834_s0, %s3416_s27  ;;  %s3253_s27 = sshll.u32 %s6078_s26, 4  ;;  %s6755_s27 = int_to_ptr.vmem [resolvable:$true] %s3253_s27 }
  0x64   : > { %v315_v26 = vld [vmem:[#allocation5 + $0x10] sm:$0xff]  ;;  %v338_v28 = vld [vmem:[#allocation5 + $0xc8] sm:$0xff]  ;;  %v321_v31 = vld [vmem:[#allocation5 + $0x40] sm:$0xff]  ;;  %v5949_v33 = vpack.c.bf16 %v334_v25, %v331_v23  ;;  %s6760_s17 = scalar_lea.hbm %s6839_s5, %s3528_s23  ;;  %s5575_s28 = scalar_lea.vmem %s6755_s27, 2048 }
  0x65   : > { %v5946_v30 = vpack.c.bf16 %v318_v27, %v315_v26  ;;  %v324_v32 = vld [vmem:[#allocation5 + $0x58] sm:$0xff]  ;;  %v337_v34 = vld [vmem:[#allocation5 + $0xc0] sm:$0xff]  ;;  %v5955_v36 = vpack.c.bf16 %v341_v29, %v338_v28  ;;  %v327_v38 = vld [vmem:[#allocation5 + $0x70] sm:$0xff]  ;;  %p5576_p11 = scmp.ne.s32.totalorder %s6755_s27, %s5575_s28  ;;  %s5704_s25 = smov [#allocation7]  }
  0x66   : > { %4371 = vmatpush1.bf16.msra.mxu0 %v5934_v16  ;;  %v5952_v35 = vpack.c.bf16 %v324_v32, %v321_v31  ;;  %v340_v37 = vld [vmem:[#allocation5 + $0xd8] sm:$0xff]  ;;  %v330_v39 = vld [vmem:[#allocation5 + $0x88] sm:$0xff]  ;;  %v347_v41 = vld [vmem:[#allocation5 + $0x110] sm:$0xff]  ;;  %s5579_s10 = sshll.u32 %s5704_s25, 4  ;;  %s5580_s10 = int_to_ptr.vmem [resolvable:$false] %s5579_s10 }
  0x67   : > { %4373 = vmatprep.subr.bf16.mxu0 %v5937_v17  ;;  %4398 = vmatpush3.bf16.msra.mxu1 %v5946_v30  ;;  %v344_v40 = vld [vmem:[#allocation5 + $0xf8] sm:$0xff]  ;;  %v5962_v42 = vpack.c.bf16 %v340_v37, %v337_v34  ;;  %v343_v43 = vld [vmem:[#allocation5 + $0xf0] sm:$0xff]  ;;  %v5965_v44 = vpack.c.bf16 %v330_v39, %v327_v38  ;;  %v346_v47 = vld [vmem:[#allocation5 + $0x108] sm:$0xff]  ;;  %p5577_p5 = pnand %p5576_p11, %p6868_p13  ;;  %p5582_p3 = scmp.lt.s32.totalorder %s6755_s27, %s5580_s10 }
  0x68   : > { %4399 = vmatprep.subr.bf16.mxu1 %v5700_v0  ;;  %v5967_v45 = vld [vmem:[%s304_s11] sm:$0xff]  ;;  %v5970_v46 = vpack.c.bf16 %v347_v41, %v344_v40  ;;  %v333_v48 = vld [vmem:[#allocation5 + $0xa0] sm:$0xff]  ;;  %v336_v49 = vld [vmem:[#allocation5 + $0xb8] sm:$0xff]  ;;  %v5977_v53 = vpack.c.bf16 %v346_v47, %v343_v43  ;;  %s300_s11 = scalar_lea.vmem [#allocation8], %s3415_s24  ;;  %s5581_s24 = scalar_lea.vmem %s5580_s10, 4096 }
  0x69   : > { %vm3420_vm1 = vcmp.gt.s32.totalorder %v5967_v45, 0  ;;  %vm3426_vm2 = vcmp.gt.s32.totalorder %v5967_v45, 1  ;;  %v350_v50 = vld [vmem:[#allocation5 + $0x128] sm:$0xff]  ;;  %v353_v51 = vld [vmem:[#allocation5 + $0x140] sm:$0xff]  ;;  %v5980_v55 = vpack.c.bf16 %v336_v49, %v333_v48  ;;  %v352_v58 = vld [vmem:[#allocation5 + $0x138] sm:$0xff]  ;;  %vm3447_vm3 = vcmp.gt.s32.totalorder %v5967_v45, 4  ;;  %p5578_p1 = pneg %p5577_p5  ;;  %p5583_p7 = scmp.lt.s32.totalorder %s5581_s24, %s5575_s28 }
  0x6a   : > { %4375 = vmatpush1.bf16.msra.mxu0 %v5941_v22  ;;  %v538_v52 = vsel %vm3420_vm1, 1, %v5703_v2  ;;  %v349_v54 = vld [vmem:[#allocation5 + $0x120] sm:$0xff]  ;;  %v716_v56 = vsel %vm3426_vm2, 1, %v5703_v2  ;;  %v5984_v57 = vpack.c.bf16 %v353_v51, %v350_v50  ;;  %v339_v59 = vld [vmem:[#allocation5 + $0xd0] sm:$0xff]  ;;  %v342_v60 = vld [vmem:[#allocation5 + $0xe8] sm:$0xff]  ;;  %v1253_v5 = vsel %vm3447_vm3, 1, %v5703_v2 }
  0x6b   : > { %4377 = vmatprep.subr.bf16.mxu0 %v5944_v24  ;;  %4401 = vmatpush3.bf16.msra.mxu1 %v5952_v35  ;;  %v356_v61 = vld [vmem:[#allocation5 + $0x158] sm:$0xff]  ;;  %v359_v62 = vld [vmem:[#allocation5 + $0x170] sm:$0xff]  ;;  %v5989_v63 = vpack.c.bf16 %v352_v58, %v349_v54  ;;  %v5992_v4 = vpack.c.bf16 %v342_v60, %v339_v59  ;;  %v358_v8 = vld [vmem:[#allocation5 + $0x168] sm:$0xff]  ;;  %vm3461_vm4 = vcmp.gt.s32.totalorder %v5967_v45, 6  ;;  %vm3475_vm5 = vcmp.gt.s32.totalorder %v5967_v45, 8  ;;  %s3269_s21 = sshll.u32 %s300_s11, 4  ;;  %p5584_p8 = por %p5583_p7, %p5582_p3  ;;  %s6762_s21 = int_to_ptr.vmem [resolvable:$true] %s3269_s21 }
  0x6c   : > { %4402 = vmatprep.subr.bf16.mxu1 %v5700_v0  ;;  %540 = vperm.xlu0 %5351, %v538_v52   ;;  %v355_v3 = vld [vmem:[#allocation5 + $0x150] sm:$0xff]  ;;  %v5996_v7 = vpack.c.bf16 %v359_v62, %v356_v61  ;;  %v345_v9 = vld [vmem:[#allocation5 + $0x100] sm:$0xff]  ;;  %v348_v12 = vld [vmem:[#allocation5 + $0x118] sm:$0xff]  ;;  %v1611_v15 = vsel %vm3461_vm4, 1, %v5703_v2  ;;  %v1969_v21 = vsel %vm3475_vm5, 1, %v5703_v2  ;;  %vm3489_vm6 = vcmp.gt.s32.totalorder %v5967_v45, 10 }
  0x6d   : > { %v6001_v13 = vpack.c.bf16 %v358_v8, %v355_v3  ;;  %v6004_v14 = vpack.c.bf16 %v348_v12, %v345_v9  ;;  %v351_v18 = vld [vmem:[#allocation5 + $0x130] sm:$0xff]  ;;  %v354_v19 = vld [vmem:[#allocation5 + $0x148] sm:$0xff]  ;;  %v357_v23 = vld [vmem:[#allocation5 + $0x160] sm:$0xff]  ;;  %v2327_v27 = vsel %vm3489_vm6, 1, %v5703_v2  ;;  %vm3503_vm7 = vcmp.gt.s32.totalorder %v5967_v45, 12  ;;  %p5585_p0 = pnand %p5584_p8, %p5578_p1 }
  0x6e   : > { %4379 = vmatpush1.bf16.msra.mxu0 %v5949_v33  ;;  %v6012_v20 = vpack.c.bf16 %v354_v19, %v351_v18  ;;  %v360_v25 = vld [vmem:[#allocation5 + $0x178] sm:$0xff]  ;;  %v2685_v28 = vsel %vm3503_vm7, 1, %v5703_v2  ;;  %vm3517_vm8 = vcmp.gt.s32.totalorder %v5967_v45, 14  ;;  %v370_v31 = vld [vmem:[%s5909_s9] sm:$0xff]  ;;  %v371_v37 = vld [vmem:[%s5909_s9 + $0x8] sm:$0xff]  ;;  %vm3433_vm10 = vcmp.gt.s32.totalorder %v5967_v45, 2 }
  0x6f   : > { %4381 = vmatprep.subr.bf16.mxu0 %v5955_v36  ;;  %4404 = vmatpush3.bf16.msra.mxu1 %v5965_v44  ;;  %v6020_v26 = vpack.c.bf16 %v360_v25, %v357_v23  ;;  %v3043_v29 = vsel %vm3517_vm8, 1, %v5703_v2  ;;  %v6071_v51 = vld [vmem:[%s6837_s3] ss:$0 sm:$0xff]  ;;  %vm3440_vm11 = vcmp.gt.s32.totalorder %v5967_v45, 3  ;;  %v895_v18 = vsel %vm3433_vm10, 1, %v5703_v2 }
  0x70   : > { %4405 = vmatprep.subr.bf16.mxu1 %v5700_v0  ;;  %718 = vperm.xlu0 %5351, %v716_v56   ;;  %v372_v58 = vld [vmem:[%s5909_s9 + $0x10] sm:$0xff]  ;;  %v1074_v19 = vsel %vm3440_vm11, 1, %v5703_v2  ;;  %vm3454_vm12 = vcmp.gt.s32.totalorder %v5967_v45, 5  ;;  %vm3468_vm13 = vcmp.gt.s32.totalorder %v5967_v45, 7  ;;  %vm3482_vm14 = vcmp.gt.s32.totalorder %v5967_v45, 9 }
  0x71   : > { %897 = vperm.xlu1 %5352, %v895_v18   ;;  %v1790_v23 = vsel %vm3468_vm13, 1, %v5703_v2  ;;  %v2148_v25 = vsel %vm3482_vm14, 1, %v5703_v2  ;;  %vm3496_vm15 = vcmp.gt.s32.totalorder %v5967_v45, 11  ;;  %vm3510_vm1 = vcmp.gt.s32.totalorder %v5967_v45, 13 }
  0x72   : > { %4383 = vmatpush1.bf16.msra.mxu0 %v5962_v42  ;;  %vm3524_vm2 = vcmp.gt.s32.totalorder %v5967_v45, 15 }
  0x73   : > { %4385 = vmatprep.subr.bf16.mxu0 %v5970_v46  ;;  %4407 = vmatpush3.bf16.msra.mxu1 %v5980_v55 }
  0x74   : > { %4408 = vmatprep.subr.bf16.mxu1 %v5700_v0  ;;  %1255 = vperm.xlu0 %5351, %v1253_v5  }
  0x75   : > { %1076 = vperm.xlu1 %5352, %v1074_v19  }
  0x76   : > { %4387 = vmatpush1.bf16.msra.mxu0 %v5977_v53 }
  0x77   : > { %4389 = vmatprep.subr.bf16.mxu0 %v5984_v57  ;;  %4410 = vmatpush3.bf16.msra.mxu1 %v5992_v4 }
  0x78   : > { %4411 = vmatprep.subr.bf16.mxu1 %v5700_v0  ;;  %1613 = vperm.xlu0 %5351, %v1611_v15  }
  0x7a   : > { %4391 = vmatpush1.bf16.msra.mxu0 %v5989_v63 }
  0x7b   : > { %4393 = vmatprep.subr.bf16.mxu0 %v5996_v7  ;;  %4413 = vmatpush3.bf16.msra.mxu1 %v6004_v14 }
  0x7c   : > { %4414 = vmatprep.subr.bf16.mxu1 %v5700_v0  ;;  %1971 = vperm.xlu0 %5351, %v1969_v21   ;;  %v1432_v21 = vsel %vm3454_vm12, 1, %v5703_v2 }
  0x7d   : > { %1434 = vperm.xlu1 %5352, %v1432_v21  }
  0x7e   : > { %4395 = vmatpush1.bf16.msra.mxu0 %v6001_v13 }
  0x7f   : > { %4421 = vmatprep.subr.bf16.mxu0 %v5925_v6  ;;  %4416 = vmatpush3.bf16.msra.mxu1 %v6012_v20 }
  0x80   : > { %4417 = vmatprep.subr.bf16.mxu1 %v5700_v0  ;;  %2329 = vperm.xlu0 %5351, %v2327_v27   ;;  %v2506_v27 = vsel %vm3496_vm15, 1, %v5703_v2 }
  0x81   : > { %438 = vmatmul.mubr.f32.vlgmr.msra.gmra.mrb[0].mxu0 %v5701_v1  ;;  %1792 = vperm.xlu1 %5352, %v1790_v23   ;;  %v3429_v23 = vld [vmem:[%s5909_s9 + $0x38] sm:$0xff] }
  0x82   : > { %4423 = vmatpush1.bf16.msra.mxu0 %v5927_v10  ;;  %614 = vmatprep.mubr.f32.mxu0 %v5701_v1 }
  0x83   : > { %4425 = vmatprep.subr.bf16.mxu0 %v5929_v11  ;;  %4419 = vmatpush3.bf16.msra.mxu1 %v6020_v26 }
  0x84   : > { %4452 = vmatprep.subr.bf16.mxu1 %v5700_v0  ;;  %2687 = vperm.xlu0 %5351, %v2685_v28   ;;  %v2864_v28 = vsel %vm3510_vm1, 1, %v5703_v2 }
  0x85   : > { %2150 = vperm.xlu1 %5352, %v2148_v25  }
  0x86   : > { %4427 = vmatpush1.bf16.msra.mxu0 %v5934_v16  ;;  %3837 = vmatmul.mubr.f32.vlgmr.msra.gmra.mrb[0].mxu1 %v5701_v1 }
  0x87   : > { %4429 = vmatprep.subr.bf16.mxu0 %v5937_v17  ;;  %4454 = vmatpush3.bf16.msra.mxu1 %v5946_v30 }
  0x88   : > { %4455 = vmatprep.subr.bf16.mxu1 %v5700_v0  ;;  %3871 = vmatprep.mubr.msk.f32.mxu1 %vm5702_vm0, %v5701_v1 }
  0x89   : > { %3045 = vperm.xlu0 %5351, %v3043_v29   ;;  %2508 = vperm.xlu1 %5352, %v2506_v27   ;;  %v3222_v29 = vsel %vm3524_vm2, 1, %v5703_v2 }
  0x8a   : > { %4431 = vmatpush1.bf16.msra.mxu0 %v5941_v22 }
  0x8b   : > { %4433 = vmatprep.subr.bf16.mxu0 %v5944_v24  ;;  %4457 = vmatpush3.bf16.msra.mxu1 %v5952_v35 }
  0x8c   : > { %4458 = vmatprep.subr.bf16.mxu1 %v5700_v0 }
  0x8d   : > { %2866 = vperm.xlu1 %5352, %v2864_v28  }
  0x8e   : > { %4435 = vmatpush1.bf16.msra.mxu0 %v5949_v33 }
  0x8f   : > { %4437 = vmatprep.subr.bf16.mxu0 %v5955_v36  ;;  %4460 = vmatpush3.bf16.msra.mxu1 %v5965_v44 }
  0x90   : > { %4461 = vmatprep.subr.bf16.mxu1 %v5700_v0 }
  0x91   : > { %3224 = vperm.xlu1 %5352, %v3222_v29  }
  0x92   : > { %4439 = vmatpush1.bf16.msra.mxu0 %v5962_v42 }
  0x93   : > { %4441 = vmatprep.subr.bf16.mxu0 %v5970_v46  ;;  %4463 = vmatpush3.bf16.msra.mxu1 %v5980_v55 }
  0x94   : > { %4464 = vmatprep.subr.bf16.mxu1 %v5700_v0 }
  0x96   : > { %4443 = vmatpush1.bf16.msra.mxu0 %v5977_v53 }
  0x97   : > { %4445 = vmatprep.subr.bf16.mxu0 %v5984_v57  ;;  %4466 = vmatpush3.bf16.msra.mxu1 %v5992_v4 }
  0x98   : > { %4467 = vmatprep.subr.bf16.mxu1 %v5700_v0 }
  0x9a   : > { %4447 = vmatpush1.bf16.msra.mxu0 %v5989_v63 }
  0x9b   : > { %4449 = vmatprep.subr.bf16.mxu0 %v5996_v7  ;;  %4469 = vmatpush3.bf16.msra.mxu1 %v6004_v14 }
  0x9c   : > { %4470 = vmatprep.subr.bf16.mxu1 %v5700_v0 }
  0x9e   : > { %4451 = vmatpush1.bf16.msra.mxu0 %v6001_v13 }
  0x9f   : > { %4477 = vmatprep.subr.bf16.mxu0 %v5925_v6  ;;  %4472 = vmatpush3.bf16.msra.mxu1 %v6012_v20 }
  0xa0   : > { %4473 = vmatprep.subr.bf16.mxu1 %v5700_v0 }
  0xa3   : > { %4475 = vmatpush3.bf16.msra.mxu1 %v6020_v26 }
  0xa4   : > { %4508 = vmatprep.subr.bf16.mxu1 %v5700_v0 }
  0xeb   : > { %v541_v5 = vpop.permute.xlu0 %540 }
  0xec   : > { %vm542_vm9 = vcmp.eq.s32.totalorder %v541_v5, 1 }
  0xef   : > { %v719_v5 = vpop.permute.xlu0 %718 }
  0xf0   : > { %vm720_vm3 = vcmp.eq.s32.totalorder %v719_v5, 1 }
 0x154   : > { %v439_v32 = vpop.f32.mrb[0].mxu0 }
 0x155   : > { %v514_v34 = vadd.f32 %v439_v32, %v370_v31  ;;  %v441_v38 = vpop.f32.mrb[1].mxu0  ;;  %v3421_v31 = vld [vmem:[%s5909_s9 + $0x18] sm:$0xff] }
 0x156   : > { %v521_v40 = vadd.f32 %v441_v38, %v371_v37  ;;  %v3422_v38 = vld [vmem:[%s5909_s9 + $0x20] sm:$0xff] }
 0x157   : > { %v3418_v39 = vmul.f32 -1.442695, %v514_v34 }
 0x158   : > { %v3419_v41 = vmul.f32 -1.442695, %v521_v40 }
 0x159   : > { %5353 = vpow2.f32 %v3418_v39  ;;  %v510_v43 = vpop.f32.mrb[0].mxu1 }
 0x15a   : > { %v3838_v47 = vpop.f32.mrb[1].mxu1  ;;  %5355 = vpow2.f32 %v3419_v41  ;;  %v528_v54 = vadd.f32 %v6071_v51, %v510_v43 }
 0x163   : > { %v5354_v48 = vpop.eup %5353 }
 0x164   : > { %v518_v49 = vadd.f32 1.0, %v5354_v48  ;;  %v5356_v50 = vpop.eup %5355 }
 0x165   : > { %v525_v52 = vadd.f32 1.0, %v5356_v50 }
 0x166   : > { %5357 = vrcp.f32 %v518_v49 }
 0x167   : > { %5359 = vrcp.f32 %v525_v52 }
 0x170   : > { %v5358_v56 = vpop.eup %5357 }
 0x171   : > { %v529_v59 = vmul.f32 %v5358_v56, %v528_v54  ;;  %v5360_v61 = vpop.eup %5359  ;;  %v3423_v54 = vld [vmem:[%s5909_s9 + $0x28] sm:$0xff] }
 0x172   : > { %v532_v62 = vsub.f32 1.0, %v5360_v61  ;;  %v534_v9 = vmul.f32 0.0, %v5360_v61 }
 0x173   : > { %v530_v60 = vadd.f32 %v529_v59, %v372_v58 }
 0x175   : > { %5361 = vtanh.f32 %v530_v60 }
 0x17f   : > { %v5362_v3 = vpop.eup %5361 }
 0x180   : > { %v533_v8 = vmul.f32 %v5362_v3, %v532_v62 }
 0x182   : > { %v535_v12 = vadd.f32 %v534_v9, %v533_v8 }
 0x184   : > { %v6076_v15 = vsel %vm542_vm9, %v535_v12, 0.0  ;;  %5515 = vmatmul.mubr.msk.f32.vlgmr.msra.gmra.mrb[2].mxu0 %vm542_vm9, %v535_v12  ;;  %5516 = vmatmul.mubr.msk.f32.vlgmr.msra.gmra.mrb[2].mxu1 %vm542_vm9, %v535_v12 }
 0x185   : > { %545 = vst [vmem:[%s6078_s26] sm:$0xff] %v6076_v15  ;;  %4479 = vmatpush1.bf16.msra.mxu0 %v5927_v10  ;;  %4510 = vmatpush3.bf16.msra.mxu1 %v5946_v30 }
 0x186   : > { %4481 = vmatprep.subr.bf16.mxu0 %v5929_v11  ;;  %4511 = vmatprep.subr.bf16.mxu1 %v5700_v0 }
 0x187   : > { %793 = vmatprep.mubr.f32.mxu0 %v5701_v1  ;;  %3906 = vmatprep.mubr.msk.f32.mxu1 %vm5702_vm0, %v5701_v1 }
 0x189   : > { %4483 = vmatpush1.bf16.msra.mxu0 %v5934_v16  ;;  %4513 = vmatpush3.bf16.msra.mxu1 %v5952_v35 }
 0x18a   : > { %4485 = vmatprep.subr.bf16.mxu0 %v5937_v17  ;;  %4514 = vmatprep.subr.bf16.mxu1 %v5700_v0 }
 0x18d   : > { %4487 = vmatpush1.bf16.msra.mxu0 %v5941_v22  ;;  %4516 = vmatpush3.bf16.msra.mxu1 %v5965_v44 }
 0x18e   : > { %4489 = vmatprep.subr.bf16.mxu0 %v5944_v24  ;;  %4517 = vmatprep.subr.bf16.mxu1 %v5700_v0 }
 0x191   : > { %4491 = vmatpush1.bf16.msra.mxu0 %v5949_v33  ;;  %4519 = vmatpush3.bf16.msra.mxu1 %v5980_v55 }
 0x192   : > { %4493 = vmatprep.subr.bf16.mxu0 %v5955_v36  ;;  %4520 = vmatprep.subr.bf16.mxu1 %v5700_v0 }
 0x195   : > { %4495 = vmatpush1.bf16.msra.mxu0 %v5962_v42  ;;  %4522 = vmatpush3.bf16.msra.mxu1 %v5992_v4 }
 0x196   : > { %4497 = vmatprep.subr.bf16.mxu0 %v5970_v46  ;;  %4523 = vmatprep.subr.bf16.mxu1 %v5700_v0 }
 0x199   : > { %4499 = vmatpush1.bf16.msra.mxu0 %v5977_v53  ;;  %4525 = vmatpush3.bf16.msra.mxu1 %v6004_v14 }
 0x19a   : > { %4501 = vmatprep.subr.bf16.mxu0 %v5984_v57  ;;  %4526 = vmatprep.subr.bf16.mxu1 %v5700_v0 }
 0x19d   : > { %4503 = vmatpush1.bf16.msra.mxu0 %v5989_v63  ;;  %4528 = vmatpush3.bf16.msra.mxu1 %v6012_v20 }
 0x19e   : > { %4505 = vmatprep.subr.bf16.mxu0 %v5996_v7  ;;  %4529 = vmatprep.subr.bf16.mxu1 %v5700_v0 }
 0x1a1   : > { %4507 = vmatpush1.bf16.msra.mxu0 %v6001_v13  ;;  %4531 = vmatpush3.bf16.msra.mxu1 %v6020_v26 }
 0x1a2   : > { %4533 = vmatprep.subr.bf16.mxu0 %v5925_v6  ;;  %4564 = vmatprep.subr.bf16.mxu1 %v5700_v0 }
 0x257   : > { %v616_v32 = vpop.f32.mrb[2].mxu0  ;;  %v687_v34 = vpop.f32.mrb[2].mxu1 }
 0x258   : > { %v691_v37 = vadd.f32 %v3421_v31, %v616_v32  ;;  %v618_v39 = vpop.f32.mrb[3].mxu0  ;;  %v3873_v40 = vpop.f32.mrb[3].mxu1  ;;  %v705_v2 = vadd.f32 %v6071_v51, %v687_v34 }
 0x259   : > { %v698_v43 = vadd.f32 %v3422_v38, %v618_v39 }
 0x25a   : > { %v3424_v41 = vmul.f32 -1.442695, %v691_v37 }
 0x25b   : > { %v3425_v47 = vmul.f32 -1.442695, %v698_v43 }
 0x25c   : > { %5363 = vpow2.f32 %v3424_v41  ;;  %v3430_v41 = vld [vmem:[%s5909_s9 + $0x40] sm:$0xff] }
 0x25d   : > { %5365 = vpow2.f32 %v3425_v47 }
 0x266   : > { %v5364_v48 = vpop.eup %5363 }
 0x267   : > { %v695_v49 = vadd.f32 1.0, %v5364_v48  ;;  %v5366_v45 = vpop.eup %5365 }
 0x268   : > { %v702_v50 = vadd.f32 1.0, %v5366_v45 }
 0x269   : > { %5367 = vrcp.f32 %v695_v49 }
 0x26a   : > { %5369 = vrcp.f32 %v702_v50  ;;  %v898_v50 = vpop.permute.xlu1 %897 }
 0x26b   : > { %vm899_vm4 = vcmp.eq.s32.totalorder %v898_v50, 1 }
 0x273   : > { %v5368_v52 = vpop.eup %5367 }
 0x274   : > { %v706_v56 = vmul.f32 %v5368_v52, %v705_v2  ;;  %v5370_v59 = vpop.eup %5369 }
 0x275   : > { %v709_v60 = vsub.f32 1.0, %v5370_v59  ;;  %v711_v3 = vmul.f32 %v5370_v59, %v6076_v15  ;;  %v3435_v59 = vld [vmem:[%s5909_s9 + $0x48] sm:$0xff] }
 0x276   : > { %v707_v58 = vadd.f32 %v3423_v54, %v706_v56 }
 0x278   : > { %5371 = vtanh.f32 %v707_v58 }
 0x282   : > { %v5372_v61 = vpop.eup %5371 }
 0x283   : > { %v710_v62 = vmul.f32 %v5372_v61, %v709_v60 }
 0x285   : > { %v712_v8 = vadd.f32 %v711_v3, %v710_v62  ;;  %v3436_v3 = vld [vmem:[%s5909_s9 + $0x50] sm:$0xff] }
 0x287   : > { %v6139_v9 = vsel %vm720_vm3, %v712_v8, %v6076_v15  ;;  %v722_v12 = vsel %vm720_vm3, %v712_v8, 0.0  ;;  %v3428_v15 = vld [vmem:[%s5909_s9 + $0x30] sm:$0xff] }
 0x288   : > { %3427 = vst [vmem:[%s6078_s26 + $0x8] sm:$0xff] %v722_v12  ;;  %794 = vmatmul.mubr.f32.vlgmr.msra.gmra.mrb[4].mxu0 %v6139_v9  ;;  %3907 = vmatmul.mubr.f32.vlgmr.msra.gmra.mrb[4].mxu1 %v6139_v9 }
 0x289   : > { %4535 = vmatpush1.bf16.msra.mxu0 %v5927_v10  ;;  %4566 = vmatpush3.bf16.msra.mxu1 %v5946_v30 }
 0x28a   : > { %4537 = vmatprep.subr.bf16.mxu0 %v5929_v11  ;;  %4567 = vmatprep.subr.bf16.mxu1 %v5700_v0 }
 0x28b   : > { %972 = vmatprep.mubr.f32.mxu0 %v5701_v1  ;;  %3941 = vmatprep.mubr.msk.f32.mxu1 %vm5702_vm0, %v5701_v1 }
 0x28d   : > { %4539 = vmatpush1.bf16.msra.mxu0 %v5934_v16  ;;  %4569 = vmatpush3.bf16.msra.mxu1 %v5952_v35 }
 0x28e   : > { %4541 = vmatprep.subr.bf16.mxu0 %v5937_v17  ;;  %4570 = vmatprep.subr.bf16.mxu1 %v5700_v0 }
 0x291   : > { %4543 = vmatpush1.bf16.msra.mxu0 %v5941_v22  ;;  %4572 = vmatpush3.bf16.msra.mxu1 %v5965_v44 }
 0x292   : > { %4545 = vmatprep.subr.bf16.mxu0 %v5944_v24  ;;  %4573 = vmatprep.subr.bf16.mxu1 %v5700_v0 }
 0x295   : > { %4547 = vmatpush1.bf16.msra.mxu0 %v5949_v33  ;;  %4575 = vmatpush3.bf16.msra.mxu1 %v5980_v55 }
 0x296   : > { %4549 = vmatprep.subr.bf16.mxu0 %v5955_v36  ;;  %4576 = vmatprep.subr.bf16.mxu1 %v5700_v0 }
 0x299   : > { %4551 = vmatpush1.bf16.msra.mxu0 %v5962_v42  ;;  %4578 = vmatpush3.bf16.msra.mxu1 %v5992_v4 }
 0x29a   : > { %4553 = vmatprep.subr.bf16.mxu0 %v5970_v46  ;;  %4579 = vmatprep.subr.bf16.mxu1 %v5700_v0 }
 0x29d   : > { %4555 = vmatpush1.bf16.msra.mxu0 %v5977_v53  ;;  %4581 = vmatpush3.bf16.msra.mxu1 %v6004_v14 }
 0x29e   : > { %4557 = vmatprep.subr.bf16.mxu0 %v5984_v57  ;;  %4582 = vmatprep.subr.bf16.mxu1 %v5700_v0 }
 0x2a1   : > { %4559 = vmatpush1.bf16.msra.mxu0 %v5989_v63  ;;  %4584 = vmatpush3.bf16.msra.mxu1 %v6012_v20 }
 0x2a2   : > { %4561 = vmatprep.subr.bf16.mxu0 %v5996_v7  ;;  %4585 = vmatprep.subr.bf16.mxu1 %v5700_v0 }
 0x2a5   : > { %4563 = vmatpush1.bf16.msra.mxu0 %v6001_v13  ;;  %4587 = vmatpush3.bf16.msra.mxu1 %v6020_v26 }
 0x2a6   : > { %4589 = vmatprep.subr.bf16.mxu0 %v5925_v6  ;;  %4620 = vmatprep.subr.bf16.mxu1 %v5700_v0 }
 0x35b   : > { %v795_v18 = vpop.f32.mrb[4].mxu0  ;;  %v866_v19 = vpop.f32.mrb[4].mxu1 }
 0x35c   : > { %v870_v21 = vadd.f32 %v3428_v15, %v795_v18  ;;  %v797_v25 = vpop.f32.mrb[5].mxu0  ;;  %v3908_v27 = vpop.f32.mrb[5].mxu1  ;;  %v884_v39 = vadd.f32 %v6071_v51, %v866_v19 }
 0x35d   : > { %v877_v29 = vadd.f32 %v3429_v23, %v797_v25 }
 0x35e   : > { %v3431_v28 = vmul.f32 -1.442695, %v870_v21 }
 0x35f   : > { %v3432_v31 = vmul.f32 -1.442695, %v877_v29 }
 0x360   : > { %5373 = vpow2.f32 %v3431_v28  ;;  %v3437_v28 = vld [vmem:[%s5909_s9 + $0x58] sm:$0xff] }
 0x361   : > { %5375 = vpow2.f32 %v3432_v31 }
 0x36a   : > { %v5374_v32 = vpop.eup %5373 }
 0x36b   : > { %v874_v34 = vadd.f32 1.0, %v5374_v32  ;;  %v5376_v37 = vpop.eup %5375 }
 0x36c   : > { %v881_v38 = vadd.f32 1.0, %v5376_v37 }
 0x36d   : > { %5377 = vrcp.f32 %v874_v34 }
 0x36e   : > { %5379 = vrcp.f32 %v881_v38 }
 0x377   : > { %v5378_v40 = vpop.eup %5377 }
 0x378   : > { %v885_v43 = vmul.f32 %v5378_v40, %v884_v39  ;;  %v5380_v48 = vpop.eup %5379  ;;  %v1077_v40 = vpop.permute.xlu1 %1076 }
 0x379   : > { %v888_v49 = vsub.f32 1.0, %v5380_v48  ;;  %v890_v52 = vmul.f32 %v5380_v48, %v6139_v9  ;;  %vm1078_vm5 = vcmp.eq.s32.totalorder %v1077_v40, 1  ;;  %v3442_v48 = vld [vmem:[%s5909_s9 + $0x60] sm:$0xff] }
 0x37a   : > { %v886_v47 = vadd.f32 %v3430_v41, %v885_v43 }
 0x37c   : > { %5381 = vtanh.f32 %v886_v47 }
 0x386   : > { %v5382_v45 = vpop.eup %5381 }
 0x387   : > { %v889_v2 = vmul.f32 %v5382_v45, %v888_v49 }
 0x389   : > { %v891_v54 = vadd.f32 %v890_v52, %v889_v2  ;;  %v3443_v2 = vld [vmem:[%s5909_s9 + $0x68] sm:$0xff] }
 0x38b   : > { %v6185_v56 = vsel %vm899_vm4, %v891_v54, %v6139_v9  ;;  %v901_v58 = vsel %vm899_vm4, %v891_v54, 0.0 }
 0x38c   : > { %3434 = vst [vmem:[%s6078_s26 + $0x10] sm:$0xff] %v901_v58  ;;  %973 = vmatmul.mubr.f32.vlgmr.msra.gmra.mrb[6].mxu0 %v6185_v56  ;;  %3942 = vmatmul.mubr.f32.vlgmr.msra.gmra.mrb[6].mxu1 %v6185_v56 }
 0x38d   : > { %4591 = vmatpush1.bf16.msra.mxu0 %v5927_v10  ;;  %4622 = vmatpush3.bf16.msra.mxu1 %v5946_v30 }
 0x38e   : > { %4593 = vmatprep.subr.bf16.mxu0 %v5929_v11  ;;  %4623 = vmatprep.subr.bf16.mxu1 %v5700_v0 }
 0x38f   : > { %1151 = vmatprep.mubr.f32.mxu0 %v5701_v1  ;;  %3976 = vmatprep.mubr.msk.f32.mxu1 %vm5702_vm0, %v5701_v1 }
 0x391   : > { %4595 = vmatpush1.bf16.msra.mxu0 %v5934_v16  ;;  %4625 = vmatpush3.bf16.msra.mxu1 %v5952_v35 }
 0x392   : > { %4597 = vmatprep.subr.bf16.mxu0 %v5937_v17  ;;  %4626 = vmatprep.subr.bf16.mxu1 %v5700_v0 }
 0x395   : > { %4599 = vmatpush1.bf16.msra.mxu0 %v5941_v22  ;;  %4628 = vmatpush3.bf16.msra.mxu1 %v5965_v44 }
 0x396   : > { %4601 = vmatprep.subr.bf16.mxu0 %v5944_v24  ;;  %4629 = vmatprep.subr.bf16.mxu1 %v5700_v0 }
 0x399   : > { %4603 = vmatpush1.bf16.msra.mxu0 %v5949_v33  ;;  %4631 = vmatpush3.bf16.msra.mxu1 %v5980_v55 }
 0x39a   : > { %4605 = vmatprep.subr.bf16.mxu0 %v5955_v36  ;;  %4632 = vmatprep.subr.bf16.mxu1 %v5700_v0 }
 0x39d   : > { %4607 = vmatpush1.bf16.msra.mxu0 %v5962_v42  ;;  %4634 = vmatpush3.bf16.msra.mxu1 %v5992_v4 }
 0x39e   : > { %4609 = vmatprep.subr.bf16.mxu0 %v5970_v46  ;;  %4635 = vmatprep.subr.bf16.mxu1 %v5700_v0 }
 0x3a1   : > { %4611 = vmatpush1.bf16.msra.mxu0 %v5977_v53  ;;  %4637 = vmatpush3.bf16.msra.mxu1 %v6004_v14 }
 0x3a2   : > { %4613 = vmatprep.subr.bf16.mxu0 %v5984_v57  ;;  %4638 = vmatprep.subr.bf16.mxu1 %v5700_v0 }
 0x3a5   : > { %4615 = vmatpush1.bf16.msra.mxu0 %v5989_v63  ;;  %4640 = vmatpush3.bf16.msra.mxu1 %v6012_v20 }
 0x3a6   : > { %4617 = vmatprep.subr.bf16.mxu0 %v5996_v7  ;;  %4641 = vmatprep.subr.bf16.mxu1 %v5700_v0 }
 0x3a9   : > { %4619 = vmatpush1.bf16.msra.mxu0 %v6001_v13  ;;  %4643 = vmatpush3.bf16.msra.mxu1 %v6020_v26 }
 0x3aa   : > { %4645 = vmatprep.subr.bf16.mxu0 %v5925_v6  ;;  %4676 = vmatprep.subr.bf16.mxu1 %v5700_v0 }
 0x45f   : > { %v974_v60 = vpop.f32.mrb[6].mxu0  ;;  %v1045_v61 = vpop.f32.mrb[6].mxu1 }
 0x460   : > { %v1049_v62 = vadd.f32 %v3435_v59, %v974_v60  ;;  %v976_v5 = vpop.f32.mrb[7].mxu0  ;;  %v3943_v8 = vpop.f32.mrb[7].mxu1  ;;  %v1063_v25 = vadd.f32 %v6071_v51, %v1045_v61 }
 0x461   : > { %v1056_v12 = vadd.f32 %v3436_v3, %v976_v5 }
 0x462   : > { %v3438_v9 = vmul.f32 -1.442695, %v1049_v62 }
 0x463   : > { %v3439_v15 = vmul.f32 -1.442695, %v1056_v12 }
 0x464   : > { %5383 = vpow2.f32 %v3438_v9  ;;  %v3444_v9 = vld [vmem:[%s5909_s9 + $0x70] sm:$0xff] }
 0x465   : > { %5385 = vpow2.f32 %v3439_v15 }
 0x46e   : > { %v5384_v18 = vpop.eup %5383 }
 0x46f   : > { %v1053_v19 = vadd.f32 1.0, %v5384_v18  ;;  %v5386_v21 = vpop.eup %5385 }
 0x470   : > { %v1060_v23 = vadd.f32 1.0, %v5386_v21 }
 0x471   : > { %5387 = vrcp.f32 %v1053_v19 }
 0x472   : > { %5389 = vrcp.f32 %v1060_v23 }
 0x47b   : > { %v5388_v27 = vpop.eup %5387 }
 0x47c   : > { %v1064_v29 = vmul.f32 %v5388_v27, %v1063_v25  ;;  %v5390_v32 = vpop.eup %5389  ;;  %v1256_v27 = vpop.permute.xlu0 %1255 }
 0x47d   : > { %v1067_v34 = vsub.f32 1.0, %v5390_v32  ;;  %v1069_v39 = vmul.f32 %v5390_v32, %v6185_v56  ;;  %vm1257_vm6 = vcmp.eq.s32.totalorder %v1256_v27, 1  ;;  %v3449_v32 = vld [vmem:[%s5909_s9 + $0x78] sm:$0xff] }
 0x47e   : > { %v1065_v31 = vadd.f32 %v3437_v28, %v1064_v29 }
 0x480   : > { %5391 = vtanh.f32 %v1065_v31 }
 0x48a   : > { %v5392_v37 = vpop.eup %5391 }
 0x48b   : > { %v1068_v38 = vmul.f32 %v5392_v37, %v1067_v34 }
 0x48d   : > { %v1070_v41 = vadd.f32 %v1069_v39, %v1068_v38  ;;  %v3450_v39 = vld [vmem:[%s5909_s9 + $0x80] sm:$0xff] }
 0x48f   : > { %v6231_v43 = vsel %vm1078_vm5, %v1070_v41, %v6185_v56  ;;  %v1080_v47 = vsel %vm1078_vm5, %v1070_v41, 0.0 }
 0x490   : > { %3441 = vst [vmem:[%s6078_s26 + $0x18] sm:$0xff] %v1080_v47  ;;  %1152 = vmatmul.mubr.f32.vlgmr.msra.gmra.mrb[8].mxu0 %v6231_v43  ;;  %3977 = vmatmul.mubr.f32.vlgmr.msra.gmra.mrb[8].mxu1 %v6231_v43 }
 0x491   : > { %4647 = vmatpush1.bf16.msra.mxu0 %v5927_v10  ;;  %4678 = vmatpush3.bf16.msra.mxu1 %v5946_v30 }
 0x492   : > { %4649 = vmatprep.subr.bf16.mxu0 %v5929_v11  ;;  %4679 = vmatprep.subr.bf16.mxu1 %v5700_v0 }
 0x493   : > { %1330 = vmatprep.mubr.f32.mxu0 %v5701_v1  ;;  %4011 = vmatprep.mubr.msk.f32.mxu1 %vm5702_vm0, %v5701_v1 }
 0x495   : > { %4651 = vmatpush1.bf16.msra.mxu0 %v5934_v16  ;;  %4681 = vmatpush3.bf16.msra.mxu1 %v5952_v35 }
 0x496   : > { %4653 = vmatprep.subr.bf16.mxu0 %v5937_v17  ;;  %4682 = vmatprep.subr.bf16.mxu1 %v5700_v0 }
 0x499   : > { %4655 = vmatpush1.bf16.msra.mxu0 %v5941_v22  ;;  %4684 = vmatpush3.bf16.msra.mxu1 %v5965_v44 }
 0x49a   : > { %4657 = vmatprep.subr.bf16.mxu0 %v5944_v24  ;;  %4685 = vmatprep.subr.bf16.mxu1 %v5700_v0 }
 0x49d   : > { %4659 = vmatpush1.bf16.msra.mxu0 %v5949_v33  ;;  %4687 = vmatpush3.bf16.msra.mxu1 %v5980_v55 }
 0x49e   : > { %4661 = vmatprep.subr.bf16.mxu0 %v5955_v36  ;;  %4688 = vmatprep.subr.bf16.mxu1 %v5700_v0 }
 0x4a1   : > { %4663 = vmatpush1.bf16.msra.mxu0 %v5962_v42  ;;  %4690 = vmatpush3.bf16.msra.mxu1 %v5992_v4 }
 0x4a2   : > { %4665 = vmatprep.subr.bf16.mxu0 %v5970_v46  ;;  %4691 = vmatprep.subr.bf16.mxu1 %v5700_v0 }
 0x4a5   : > { %4667 = vmatpush1.bf16.msra.mxu0 %v5977_v53  ;;  %4693 = vmatpush3.bf16.msra.mxu1 %v6004_v14 }
 0x4a6   : > { %4669 = vmatprep.subr.bf16.mxu0 %v5984_v57  ;;  %4694 = vmatprep.subr.bf16.mxu1 %v5700_v0 }
 0x4a9   : > { %4671 = vmatpush1.bf16.msra.mxu0 %v5989_v63  ;;  %4696 = vmatpush3.bf16.msra.mxu1 %v6012_v20 }
 0x4aa   : > { %4673 = vmatprep.subr.bf16.mxu0 %v5996_v7  ;;  %4697 = vmatprep.subr.bf16.mxu1 %v5700_v0 }
 0x4ad   : > { %4675 = vmatpush1.bf16.msra.mxu0 %v6001_v13  ;;  %4699 = vmatpush3.bf16.msra.mxu1 %v6020_v26 }
 0x4ae   : > { %4701 = vmatprep.subr.bf16.mxu0 %v5925_v6  ;;  %4732 = vmatprep.subr.bf16.mxu1 %v5700_v0 }
 0x563   : > { %v1153_v49 = vpop.f32.mrb[8].mxu0  ;;  %v1224_v45 = vpop.f32.mrb[8].mxu1 }
 0x564   : > { %v1228_v50 = vadd.f32 %v3442_v48, %v1153_v49  ;;  %v1155_v52 = vpop.f32.mrb[9].mxu0  ;;  %v3978_v54 = vpop.f32.mrb[9].mxu1  ;;  %v1242_v5 = vadd.f32 %v6071_v51, %v1224_v45 }
 0x565   : > { %v1235_v58 = vadd.f32 %v3443_v2, %v1155_v52 }
 0x566   : > { %v3445_v56 = vmul.f32 -1.442695, %v1228_v50 }
 0x567   : > { %v3446_v59 = vmul.f32 -1.442695, %v1235_v58 }
 0x568   : > { %5393 = vpow2.f32 %v3445_v56  ;;  %v3451_v56 = vld [vmem:[%s5909_s9 + $0x88] sm:$0xff] }
 0x569   : > { %5395 = vpow2.f32 %v3446_v59 }
 0x572   : > { %v5394_v60 = vpop.eup %5393 }
 0x573   : > { %v1232_v61 = vadd.f32 1.0, %v5394_v60  ;;  %v5396_v62 = vpop.eup %5395 }
 0x574   : > { %v1239_v3 = vadd.f32 1.0, %v5396_v62 }
 0x575   : > { %5397 = vrcp.f32 %v1232_v61 }
 0x576   : > { %5399 = vrcp.f32 %v1239_v3 }
 0x57f   : > { %v5398_v8 = vpop.eup %5397 }
 0x580   : > { %v1243_v12 = vmul.f32 %v5398_v8, %v1242_v5  ;;  %v5400_v18 = vpop.eup %5399  ;;  %v1435_v8 = vpop.permute.xlu1 %1434 }
 0x581   : > { %v1246_v19 = vsub.f32 1.0, %v5400_v18  ;;  %v1248_v25 = vmul.f32 %v5400_v18, %v6231_v43  ;;  %vm1436_vm7 = vcmp.eq.s32.totalorder %v1435_v8, 1  ;;  %v3456_v18 = vld [vmem:[%s5909_s9 + $0x90] sm:$0xff] }
 0x582   : > { %v1244_v15 = vadd.f32 %v3444_v9, %v1243_v12 }
 0x584   : > { %5401 = vtanh.f32 %v1244_v15 }
 0x58e   : > { %v5402_v21 = vpop.eup %5401 }
 0x58f   : > { %v1247_v23 = vmul.f32 %v5402_v21, %v1246_v19 }
 0x591   : > { %v1249_v28 = vadd.f32 %v1248_v25, %v1247_v23  ;;  %v3457_v25 = vld [vmem:[%s5909_s9 + $0x98] sm:$0xff] }
 0x593   : > { %v6277_v29 = vsel %vm1257_vm6, %v1249_v28, %v6231_v43  ;;  %v1259_v31 = vsel %vm1257_vm6, %v1249_v28, 0.0 }
 0x594   : > { %3448 = vst [vmem:[%s6078_s26 + $0x20] sm:$0xff] %v1259_v31  ;;  %1331 = vmatmul.mubr.f32.vlgmr.msra.gmra.mrb[10].mxu0 %v6277_v29  ;;  %4012 = vmatmul.mubr.f32.vlgmr.msra.gmra.mrb[10].mxu1 %v6277_v29 }
 0x595   : > { %4703 = vmatpush1.bf16.msra.mxu0 %v5927_v10  ;;  %4734 = vmatpush3.bf16.msra.mxu1 %v5946_v30 }
 0x596   : > { %4705 = vmatprep.subr.bf16.mxu0 %v5929_v11  ;;  %4735 = vmatprep.subr.bf16.mxu1 %v5700_v0 }
 0x597   : > { %1509 = vmatprep.mubr.f32.mxu0 %v5701_v1  ;;  %4046 = vmatprep.mubr.msk.f32.mxu1 %vm5702_vm0, %v5701_v1 }
 0x599   : > { %4707 = vmatpush1.bf16.msra.mxu0 %v5934_v16  ;;  %4737 = vmatpush3.bf16.msra.mxu1 %v5952_v35 }
 0x59a   : > { %4709 = vmatprep.subr.bf16.mxu0 %v5937_v17  ;;  %4738 = vmatprep.subr.bf16.mxu1 %v5700_v0 }
 0x59d   : > { %4711 = vmatpush1.bf16.msra.mxu0 %v5941_v22  ;;  %4740 = vmatpush3.bf16.msra.mxu1 %v5965_v44 }
 0x59e   : > { %4713 = vmatprep.subr.bf16.mxu0 %v5944_v24  ;;  %4741 = vmatprep.subr.bf16.mxu1 %v5700_v0 }
 0x5a1   : > { %4715 = vmatpush1.bf16.msra.mxu0 %v5949_v33  ;;  %4743 = vmatpush3.bf16.msra.mxu1 %v5980_v55 }
 0x5a2   : > { %4717 = vmatprep.subr.bf16.mxu0 %v5955_v36  ;;  %4744 = vmatprep.subr.bf16.mxu1 %v5700_v0 }
 0x5a5   : > { %4719 = vmatpush1.bf16.msra.mxu0 %v5962_v42  ;;  %4746 = vmatpush3.bf16.msra.mxu1 %v5992_v4 }
 0x5a6   : > { %4721 = vmatprep.subr.bf16.mxu0 %v5970_v46  ;;  %4747 = vmatprep.subr.bf16.mxu1 %v5700_v0 }
 0x5a9   : > { %4723 = vmatpush1.bf16.msra.mxu0 %v5977_v53  ;;  %4749 = vmatpush3.bf16.msra.mxu1 %v6004_v14 }
 0x5aa   : > { %4725 = vmatprep.subr.bf16.mxu0 %v5984_v57  ;;  %4750 = vmatprep.subr.bf16.mxu1 %v5700_v0 }
 0x5ad   : > { %4727 = vmatpush1.bf16.msra.mxu0 %v5989_v63  ;;  %4752 = vmatpush3.bf16.msra.mxu1 %v6012_v20 }
 0x5ae   : > { %4729 = vmatprep.subr.bf16.mxu0 %v5996_v7  ;;  %4753 = vmatprep.subr.bf16.mxu1 %v5700_v0 }
 0x5b1   : > { %4731 = vmatpush1.bf16.msra.mxu0 %v6001_v13  ;;  %4755 = vmatpush3.bf16.msra.mxu1 %v6020_v26 }
 0x5b2   : > { %4757 = vmatprep.subr.bf16.mxu0 %v5925_v6  ;;  %4788 = vmatprep.subr.bf16.mxu1 %v5700_v0 }
 0x667   : > { %v1332_v34 = vpop.f32.mrb[10].mxu0  ;;  %v1403_v37 = vpop.f32.mrb[10].mxu1 }
 0x668   : > { %v1407_v38 = vadd.f32 %v3449_v32, %v1332_v34  ;;  %v1334_v40 = vpop.f32.mrb[11].mxu0  ;;  %v4013_v41 = vpop.f32.mrb[11].mxu1  ;;  %v1421_v52 = vadd.f32 %v6071_v51, %v1403_v37 }
 0x669   : > { %v1414_v47 = vadd.f32 %v3450_v39, %v1334_v40 }
 0x66a   : > { %v3452_v43 = vmul.f32 -1.442695, %v1407_v38 }
 0x66b   : > { %v3453_v48 = vmul.f32 -1.442695, %v1414_v47 }
 0x66c   : > { %5403 = vpow2.f32 %v3452_v43  ;;  %v3458_v43 = vld [vmem:[%s5909_s9 + $0xa0] sm:$0xff] }
 0x66d   : > { %5405 = vpow2.f32 %v3453_v48 }
 0x676   : > { %v5404_v49 = vpop.eup %5403 }
 0x677   : > { %v1411_v45 = vadd.f32 1.0, %v5404_v49  ;;  %v5406_v50 = vpop.eup %5405 }
 0x678   : > { %v1418_v2 = vadd.f32 1.0, %v5406_v50 }
 0x679   : > { %5407 = vrcp.f32 %v1411_v45 }
 0x67a   : > { %5409 = vrcp.f32 %v1418_v2 }
 0x683   : > { %v5408_v54 = vpop.eup %5407 }
 0x684   : > { %v1422_v58 = vmul.f32 %v5408_v54, %v1421_v52  ;;  %v5410_v60 = vpop.eup %5409  ;;  %v1614_v54 = vpop.permute.xlu0 %1613 }
 0x685   : > { %v1425_v61 = vsub.f32 1.0, %v5410_v60  ;;  %v1427_v5 = vmul.f32 %v5410_v60, %v6277_v29  ;;  %vm1615_vm8 = vcmp.eq.s32.totalorder %v1614_v54, 1 }
 0x686   : > { %v1423_v59 = vadd.f32 %v3451_v56, %v1422_v58 }
 0x688   : > { %5411 = vtanh.f32 %v1423_v59  ;;  %v3463_v59 = vld [vmem:[%s5909_s9 + $0xa8] sm:$0xff] }
 0x692   : > { %v5412_v62 = vpop.eup %5411 }
 0x693   : > { %v1426_v3 = vmul.f32 %v5412_v62, %v1425_v61 }
 0x695   : > { %v1428_v9 = vadd.f32 %v1427_v5, %v1426_v3  ;;  %v3464_v3 = vld [vmem:[%s5909_s9 + $0xb0] sm:$0xff] }
 0x697   : > { %v6323_v12 = vsel %vm1436_vm7, %v1428_v9, %v6277_v29  ;;  %v1438_v15 = vsel %vm1436_vm7, %v1428_v9, 0.0 }
 0x698   : > { %3455 = vst [vmem:[%s6078_s26 + $0x28] sm:$0xff] %v1438_v15  ;;  %1510 = vmatmul.mubr.f32.vlgmr.msra.gmra.mrb[12].mxu0 %v6323_v12  ;;  %4047 = vmatmul.mubr.f32.vlgmr.msra.gmra.mrb[12].mxu1 %v6323_v12 }
 0x699   : > { %4759 = vmatpush1.bf16.msra.mxu0 %v5927_v10  ;;  %4790 = vmatpush3.bf16.msra.mxu1 %v5946_v30 }
 0x69a   : > { %4761 = vmatprep.subr.bf16.mxu0 %v5929_v11  ;;  %4791 = vmatprep.subr.bf16.mxu1 %v5700_v0 }
 0x69b   : > { %1688 = vmatprep.mubr.f32.mxu0 %v5701_v1  ;;  %4081 = vmatprep.mubr.msk.f32.mxu1 %vm5702_vm0, %v5701_v1 }
 0x69d   : > { %4763 = vmatpush1.bf16.msra.mxu0 %v5934_v16  ;;  %4793 = vmatpush3.bf16.msra.mxu1 %v5952_v35 }
 0x69e   : > { %4765 = vmatprep.subr.bf16.mxu0 %v5937_v17  ;;  %4794 = vmatprep.subr.bf16.mxu1 %v5700_v0 }
 0x6a1   : > { %4767 = vmatpush1.bf16.msra.mxu0 %v5941_v22  ;;  %4796 = vmatpush3.bf16.msra.mxu1 %v5965_v44 }
 0x6a2   : > { %4769 = vmatprep.subr.bf16.mxu0 %v5944_v24  ;;  %4797 = vmatprep.subr.bf16.mxu1 %v5700_v0 }
 0x6a5   : > { %4771 = vmatpush1.bf16.msra.mxu0 %v5949_v33  ;;  %4799 = vmatpush3.bf16.msra.mxu1 %v5980_v55 }
 0x6a6   : > { %4773 = vmatprep.subr.bf16.mxu0 %v5955_v36  ;;  %4800 = vmatprep.subr.bf16.mxu1 %v5700_v0 }
 0x6a9   : > { %4775 = vmatpush1.bf16.msra.mxu0 %v5962_v42  ;;  %4802 = vmatpush3.bf16.msra.mxu1 %v5992_v4 }
 0x6aa   : > { %4777 = vmatprep.subr.bf16.mxu0 %v5970_v46  ;;  %4803 = vmatprep.subr.bf16.mxu1 %v5700_v0 }
 0x6ad   : > { %4779 = vmatpush1.bf16.msra.mxu0 %v5977_v53  ;;  %4805 = vmatpush3.bf16.msra.mxu1 %v6004_v14 }
 0x6ae   : > { %4781 = vmatprep.subr.bf16.mxu0 %v5984_v57  ;;  %4806 = vmatprep.subr.bf16.mxu1 %v5700_v0 }
 0x6b1   : > { %4783 = vmatpush1.bf16.msra.mxu0 %v5989_v63  ;;  %4808 = vmatpush3.bf16.msra.mxu1 %v6012_v20 }
 0x6b2   : > { %4785 = vmatprep.subr.bf16.mxu0 %v5996_v7  ;;  %4809 = vmatprep.subr.bf16.mxu1 %v5700_v0 }
 0x6b5   : > { %4787 = vmatpush1.bf16.msra.mxu0 %v6001_v13  ;;  %4811 = vmatpush3.bf16.msra.mxu1 %v6020_v26 }
 0x6b6   : > { %4813 = vmatprep.subr.bf16.mxu0 %v5925_v6  ;;  %4844 = vmatprep.subr.bf16.mxu1 %v5700_v0 }
 0x76b   : > { %v1511_v19 = vpop.f32.mrb[12].mxu0  ;;  %v1582_v21 = vpop.f32.mrb[12].mxu1 }
 0x76c   : > { %v1586_v23 = vadd.f32 %v3456_v18, %v1511_v19  ;;  %v1513_v27 = vpop.f32.mrb[13].mxu0  ;;  %v4048_v28 = vpop.f32.mrb[13].mxu1  ;;  %v1600_v40 = vadd.f32 %v6071_v51, %v1582_v21 }
 0x76d   : > { %v1593_v31 = vadd.f32 %v3457_v25, %v1513_v27  ;;  %v6414_v25 = vld [vmem:[%s6837_s3] ss:$0 sm:$0xff] }
 0x76e   : > { %v3459_v29 = vmul.f32 -1.442695, %v1586_v23 }
 0x76f   : > { %v3460_v32 = vmul.f32 -1.442695, %v1593_v31 }
 0x770   : > { %5413 = vpow2.f32 %v3459_v29  ;;  %v3465_v29 = vld [vmem:[%s5909_s9 + $0xb8] sm:$0xff] }
 0x771   : > { %5415 = vpow2.f32 %v3460_v32 }
 0x77a   : > { %v5414_v34 = vpop.eup %5413 }
 0x77b   : > { %v1590_v37 = vadd.f32 1.0, %v5414_v34  ;;  %v5416_v38 = vpop.eup %5415 }
 0x77c   : > { %v1597_v39 = vadd.f32 1.0, %v5416_v38 }
 0x77d   : > { %5417 = vrcp.f32 %v1590_v37 }
 0x77e   : > { %5419 = vrcp.f32 %v1597_v39 }
 0x787   : > { %v5418_v41 = vpop.eup %5417 }
 0x788   : > { %v1601_v47 = vmul.f32 %v5418_v41, %v1600_v40  ;;  %v5420_v49 = vpop.eup %5419  ;;  %v1793_v41 = vpop.permute.xlu1 %1792 }
 0x789   : > { %v1604_v45 = vsub.f32 1.0, %v5420_v49  ;;  %v1606_v52 = vmul.f32 %v5420_v49, %v6323_v12  ;;  %vm1794_vm9 = vcmp.eq.s32.totalorder %v1793_v41, 1  ;;  %v3470_v49 = vld [vmem:[%s5909_s9 + $0xc0] sm:$0xff] }
 0x78a   : > { %v1602_v48 = vadd.f32 %v3458_v43, %v1601_v47 }
 0x78c   : > { %5421 = vtanh.f32 %v1602_v48 }
 0x796   : > { %v5422_v50 = vpop.eup %5421 }
 0x797   : > { %v1605_v2 = vmul.f32 %v5422_v50, %v1604_v45 }
 0x799   : > { %v1607_v56 = vadd.f32 %v1606_v52, %v1605_v2  ;;  %v3471_v52 = vld [vmem:[%s5909_s9 + $0xc8] sm:$0xff] }
 0x79b   : > { %v6369_v58 = vsel %vm1615_vm8, %v1607_v56, %v6323_v12  ;;  %v1617_v51 = vsel %vm1615_vm8, %v1607_v56, 0.0 }
 0x79c   : > { %3462 = vst [vmem:[%s6078_s26 + $0x30] sm:$0xff] %v1617_v51  ;;  %1689 = vmatmul.mubr.f32.vlgmr.msra.gmra.mrb[14].mxu0 %v6369_v58  ;;  %4082 = vmatmul.mubr.f32.vlgmr.msra.gmra.mrb[14].mxu1 %v6369_v58 }
 0x79d   : > { %4815 = vmatpush1.bf16.msra.mxu0 %v5927_v10  ;;  %4846 = vmatpush3.bf16.msra.mxu1 %v5946_v30 }
 0x79e   : > { %4817 = vmatprep.subr.bf16.mxu0 %v5929_v11  ;;  %4847 = vmatprep.subr.bf16.mxu1 %v5700_v0 }
 0x79f   : > { %1867 = vmatprep.mubr.f32.mxu0 %v5701_v1  ;;  %4116 = vmatprep.mubr.msk.f32.mxu1 %vm5702_vm0, %v5701_v1 }
 0x7a1   : > { %4819 = vmatpush1.bf16.msra.mxu0 %v5934_v16  ;;  %4849 = vmatpush3.bf16.msra.mxu1 %v5952_v35 }
 0x7a2   : > { %4821 = vmatprep.subr.bf16.mxu0 %v5937_v17  ;;  %4850 = vmatprep.subr.bf16.mxu1 %v5700_v0 }
 0x7a5   : > { %4823 = vmatpush1.bf16.msra.mxu0 %v5941_v22  ;;  %4852 = vmatpush3.bf16.msra.mxu1 %v5965_v44 }
 0x7a6   : > { %4825 = vmatprep.subr.bf16.mxu0 %v5944_v24  ;;  %4853 = vmatprep.subr.bf16.mxu1 %v5700_v0 }
 0x7a9   : > { %4827 = vmatpush1.bf16.msra.mxu0 %v5949_v33  ;;  %4855 = vmatpush3.bf16.msra.mxu1 %v5980_v55 }
 0x7aa   : > { %4829 = vmatprep.subr.bf16.mxu0 %v5955_v36  ;;  %4856 = vmatprep.subr.bf16.mxu1 %v5700_v0 }
 0x7ad   : > { %4831 = vmatpush1.bf16.msra.mxu0 %v5962_v42  ;;  %4858 = vmatpush3.bf16.msra.mxu1 %v5992_v4 }
 0x7ae   : > { %4833 = vmatprep.subr.bf16.mxu0 %v5970_v46  ;;  %4859 = vmatprep.subr.bf16.mxu1 %v5700_v0 }
 0x7b1   : > { %4835 = vmatpush1.bf16.msra.mxu0 %v5977_v53  ;;  %4861 = vmatpush3.bf16.msra.mxu1 %v6004_v14 }
 0x7b2   : > { %4837 = vmatprep.subr.bf16.mxu0 %v5984_v57  ;;  %4862 = vmatprep.subr.bf16.mxu1 %v5700_v0 }
 0x7b5   : > { %4839 = vmatpush1.bf16.msra.mxu0 %v5989_v63  ;;  %4864 = vmatpush3.bf16.msra.mxu1 %v6012_v20 }
 0x7b6   : > { %4841 = vmatprep.subr.bf16.mxu0 %v5996_v7  ;;  %4865 = vmatprep.subr.bf16.mxu1 %v5700_v0 }
 0x7b9   : > { %4843 = vmatpush1.bf16.msra.mxu0 %v6001_v13  ;;  %4867 = vmatpush3.bf16.msra.mxu1 %v6020_v26 }
 0x7ba   : > { %4869 = vmatprep.subr.bf16.mxu0 %v5925_v6  ;;  %4900 = vmatprep.subr.bf16.mxu1 %v5700_v0 }
 0x86f   : > { %v1690_v60 = vpop.f32.mrb[14].mxu0  ;;  %v1761_v61 = vpop.f32.mrb[14].mxu1 }
 0x870   : > { %v1765_v62 = vadd.f32 %v3463_v59, %v1690_v60  ;;  %v1692_v5 = vpop.f32.mrb[15].mxu0  ;;  %v4083_v8 = vpop.f32.mrb[15].mxu1  ;;  %v1779_v27 = vadd.f32 %v6414_v25, %v1761_v61 }
 0x871   : > { %v1772_v12 = vadd.f32 %v3464_v3, %v1692_v5 }
 0x872   : > { %v3466_v9 = vmul.f32 -1.442695, %v1765_v62 }
 0x873   : > { %v3467_v15 = vmul.f32 -1.442695, %v1772_v12 }
 0x874   : > { %5423 = vpow2.f32 %v3466_v9  ;;  %v3472_v9 = vld [vmem:[%s5909_s9 + $0xd0] sm:$0xff] }
 0x875   : > { %5425 = vpow2.f32 %v3467_v15 }
 0x87e   : > { %v5424_v18 = vpop.eup %5423 }
 0x87f   : > { %v1769_v19 = vadd.f32 1.0, %v5424_v18  ;;  %v5426_v21 = vpop.eup %5425 }
 0x880   : > { %v1776_v23 = vadd.f32 1.0, %v5426_v21 }
 0x881   : > { %5427 = vrcp.f32 %v1769_v19 }
 0x882   : > { %5429 = vrcp.f32 %v1776_v23 }
 0x88b   : > { %v5428_v28 = vpop.eup %5427 }
 0x88c   : > { %v1780_v31 = vmul.f32 %v5428_v28, %v1779_v27  ;;  %v5430_v34 = vpop.eup %5429  ;;  %v1972_v28 = vpop.permute.xlu0 %1971 }
 0x88d   : > { %v1783_v37 = vsub.f32 1.0, %v5430_v34  ;;  %v1785_v40 = vmul.f32 %v5430_v34, %v6369_v58  ;;  %vm1973_vm10 = vcmp.eq.s32.totalorder %v1972_v28, 1  ;;  %v3477_v34 = vld [vmem:[%s5909_s9 + $0xd8] sm:$0xff] }
 0x88e   : > { %v1781_v32 = vadd.f32 %v3465_v29, %v1780_v31 }
 0x890   : > { %5431 = vtanh.f32 %v1781_v32 }
 0x89a   : > { %v5432_v38 = vpop.eup %5431 }
 0x89b   : > { %v1784_v39 = vmul.f32 %v5432_v38, %v1783_v37 }
 0x89d   : > { %v1786_v43 = vadd.f32 %v1785_v40, %v1784_v39  ;;  %v3478_v40 = vld [vmem:[%s5909_s9 + $0xe0] sm:$0xff] }
 0x89f   : > { %v6420_v47 = vsel %vm1794_vm9, %v1786_v43, %v6369_v58  ;;  %v1796_v48 = vsel %vm1794_vm9, %v1786_v43, 0.0 }
 0x8a0   : > { %3469 = vst [vmem:[%s6078_s26 + $0x38] sm:$0xff] %v1796_v48  ;;  %1868 = vmatmul.mubr.f32.vlgmr.msra.gmra.mrb[16].mxu0 %v6420_v47  ;;  %4117 = vmatmul.mubr.f32.vlgmr.msra.gmra.mrb[16].mxu1 %v6420_v47 }
 0x8a1   : > { %4871 = vmatpush1.bf16.msra.mxu0 %v5927_v10  ;;  %4902 = vmatpush3.bf16.msra.mxu1 %v5946_v30 }
 0x8a2   : > { %4873 = vmatprep.subr.bf16.mxu0 %v5929_v11  ;;  %4903 = vmatprep.subr.bf16.mxu1 %v5700_v0 }
 0x8a3   : > { %2046 = vmatprep.mubr.f32.mxu0 %v5701_v1  ;;  %4151 = vmatprep.mubr.msk.f32.mxu1 %vm5702_vm0, %v5701_v1 }
 0x8a5   : > { %4875 = vmatpush1.bf16.msra.mxu0 %v5934_v16  ;;  %4905 = vmatpush3.bf16.msra.mxu1 %v5952_v35 }
 0x8a6   : > { %4877 = vmatprep.subr.bf16.mxu0 %v5937_v17  ;;  %4906 = vmatprep.subr.bf16.mxu1 %v5700_v0 }
 0x8a9   : > { %4879 = vmatpush1.bf16.msra.mxu0 %v5941_v22  ;;  %4908 = vmatpush3.bf16.msra.mxu1 %v5965_v44 }
 0x8aa   : > { %4881 = vmatprep.subr.bf16.mxu0 %v5944_v24  ;;  %4909 = vmatprep.subr.bf16.mxu1 %v5700_v0 }
 0x8ad   : > { %4883 = vmatpush1.bf16.msra.mxu0 %v5949_v33  ;;  %4911 = vmatpush3.bf16.msra.mxu1 %v5980_v55 }
 0x8ae   : > { %4885 = vmatprep.subr.bf16.mxu0 %v5955_v36  ;;  %4912 = vmatprep.subr.bf16.mxu1 %v5700_v0 }
 0x8b1   : > { %4887 = vmatpush1.bf16.msra.mxu0 %v5962_v42  ;;  %4914 = vmatpush3.bf16.msra.mxu1 %v5992_v4 }
 0x8b2   : > { %4889 = vmatprep.subr.bf16.mxu0 %v5970_v46  ;;  %4915 = vmatprep.subr.bf16.mxu1 %v5700_v0 }
 0x8b5   : > { %4891 = vmatpush1.bf16.msra.mxu0 %v5977_v53  ;;  %4917 = vmatpush3.bf16.msra.mxu1 %v6004_v14 }
 0x8b6   : > { %4893 = vmatprep.subr.bf16.mxu0 %v5984_v57  ;;  %4918 = vmatprep.subr.bf16.mxu1 %v5700_v0 }
 0x8b9   : > { %4895 = vmatpush1.bf16.msra.mxu0 %v5989_v63  ;;  %4920 = vmatpush3.bf16.msra.mxu1 %v6012_v20 }
 0x8ba   : > { %4897 = vmatprep.subr.bf16.mxu0 %v5996_v7  ;;  %4921 = vmatprep.subr.bf16.mxu1 %v5700_v0 }
 0x8bd   : > { %4899 = vmatpush1.bf16.msra.mxu0 %v6001_v13  ;;  %4923 = vmatpush3.bf16.msra.mxu1 %v6020_v26 }
 0x8be   : > { %4925 = vmatprep.subr.bf16.mxu0 %v5925_v6  ;;  %4956 = vmatprep.subr.bf16.mxu1 %v5700_v0 }
 0x973   : > { %v1869_v45 = vpop.f32.mrb[16].mxu0  ;;  %v1940_v50 = vpop.f32.mrb[16].mxu1 }
 0x974   : > { %v1944_v2 = vadd.f32 %v3470_v49, %v1869_v45  ;;  %v1871_v54 = vpop.f32.mrb[17].mxu0  ;;  %v4118_v56 = vpop.f32.mrb[17].mxu1  ;;  %v1958_v5 = vadd.f32 %v6414_v25, %v1940_v50 }
 0x975   : > { %v1951_v51 = vadd.f32 %v3471_v52, %v1871_v54 }
 0x976   : > { %v3473_v58 = vmul.f32 -1.442695, %v1944_v2 }
 0x977   : > { %v3474_v59 = vmul.f32 -1.442695, %v1951_v51 }
 0x978   : > { %5433 = vpow2.f32 %v3473_v58  ;;  %v3479_v58 = vld [vmem:[%s5909_s9 + $0xe8] sm:$0xff] }
 0x979   : > { %5435 = vpow2.f32 %v3474_v59 }
 0x982   : > { %v5434_v60 = vpop.eup %5433 }
 0x983   : > { %v1948_v61 = vadd.f32 1.0, %v5434_v60  ;;  %v5436_v62 = vpop.eup %5435 }
 0x984   : > { %v1955_v3 = vadd.f32 1.0, %v5436_v62 }
 0x985   : > { %5437 = vrcp.f32 %v1948_v61 }
 0x986   : > { %5439 = vrcp.f32 %v1955_v3 }
 0x98f   : > { %v5438_v8 = vpop.eup %5437 }
 0x990   : > { %v1959_v12 = vmul.f32 %v5438_v8, %v1958_v5  ;;  %v5440_v18 = vpop.eup %5439  ;;  %v2151_v8 = vpop.permute.xlu1 %2150 }
 0x991   : > { %v1962_v19 = vsub.f32 1.0, %v5440_v18  ;;  %v1964_v27 = vmul.f32 %v5440_v18, %v6420_v47  ;;  %vm2152_vm11 = vcmp.eq.s32.totalorder %v2151_v8, 1  ;;  %v3484_v18 = vld [vmem:[%s5909_s9 + $0xf0] sm:$0xff] }
 0x992   : > { %v1960_v15 = vadd.f32 %v3472_v9, %v1959_v12 }
 0x994   : > { %5441 = vtanh.f32 %v1960_v15 }
 0x99e   : > { %v5442_v21 = vpop.eup %5441 }
 0x99f   : > { %v1963_v23 = vmul.f32 %v5442_v21, %v1962_v19 }
 0x9a1   : > { %v1965_v29 = vadd.f32 %v1964_v27, %v1963_v23  ;;  %v3485_v27 = vld [vmem:[%s5909_s9 + $0xf8] sm:$0xff] }
 0x9a3   : > { %v6466_v31 = vsel %vm1973_vm10, %v1965_v29, %v6420_v47  ;;  %v1975_v32 = vsel %vm1973_vm10, %v1965_v29, 0.0 }
 0x9a4   : > { %3476 = vst [vmem:[%s6078_s26 + $0x40] sm:$0xff] %v1975_v32  ;;  %2047 = vmatmul.mubr.f32.vlgmr.msra.gmra.mrb[18].mxu0 %v6466_v31  ;;  %4152 = vmatmul.mubr.f32.vlgmr.msra.gmra.mrb[18].mxu1 %v6466_v31 }
 0x9a5   : > { %4927 = vmatpush1.bf16.msra.mxu0 %v5927_v10  ;;  %4958 = vmatpush3.bf16.msra.mxu1 %v5946_v30 }
 0x9a6   : > { %4929 = vmatprep.subr.bf16.mxu0 %v5929_v11  ;;  %4959 = vmatprep.subr.bf16.mxu1 %v5700_v0 }
 0x9a7   : > { %2225 = vmatprep.mubr.f32.mxu0 %v5701_v1  ;;  %4186 = vmatprep.mubr.msk.f32.mxu1 %vm5702_vm0, %v5701_v1 }
 0x9a9   : > { %4931 = vmatpush1.bf16.msra.mxu0 %v5934_v16  ;;  %4961 = vmatpush3.bf16.msra.mxu1 %v5952_v35 }
 0x9aa   : > { %4933 = vmatprep.subr.bf16.mxu0 %v5937_v17  ;;  %4962 = vmatprep.subr.bf16.mxu1 %v5700_v0 }
 0x9ad   : > { %4935 = vmatpush1.bf16.msra.mxu0 %v5941_v22  ;;  %4964 = vmatpush3.bf16.msra.mxu1 %v5965_v44 }
 0x9ae   : > { %4937 = vmatprep.subr.bf16.mxu0 %v5944_v24  ;;  %4965 = vmatprep.subr.bf16.mxu1 %v5700_v0 }
 0x9b1   : > { %4939 = vmatpush1.bf16.msra.mxu0 %v5949_v33  ;;  %4967 = vmatpush3.bf16.msra.mxu1 %v5980_v55 }
 0x9b2   : > { %4941 = vmatprep.subr.bf16.mxu0 %v5955_v36  ;;  %4968 = vmatprep.subr.bf16.mxu1 %v5700_v0 }
 0x9b5   : > { %4943 = vmatpush1.bf16.msra.mxu0 %v5962_v42  ;;  %4970 = vmatpush3.bf16.msra.mxu1 %v5992_v4 }
 0x9b6   : > { %4945 = vmatprep.subr.bf16.mxu0 %v5970_v46  ;;  %4971 = vmatprep.subr.bf16.mxu1 %v5700_v0 }
 0x9b9   : > { %4947 = vmatpush1.bf16.msra.mxu0 %v5977_v53  ;;  %4973 = vmatpush3.bf16.msra.mxu1 %v6004_v14 }
 0x9ba   : > { %4949 = vmatprep.subr.bf16.mxu0 %v5984_v57  ;;  %4974 = vmatprep.subr.bf16.mxu1 %v5700_v0 }
 0x9bd   : > { %4951 = vmatpush1.bf16.msra.mxu0 %v5989_v63  ;;  %4976 = vmatpush3.bf16.msra.mxu1 %v6012_v20 }
 0x9be   : > { %4953 = vmatprep.subr.bf16.mxu0 %v5996_v7  ;;  %4977 = vmatprep.subr.bf16.mxu1 %v5700_v0 }
 0x9c1   : > { %4955 = vmatpush1.bf16.msra.mxu0 %v6001_v13  ;;  %4979 = vmatpush3.bf16.msra.mxu1 %v6020_v26 }
 0x9c2   : > { %4981 = vmatprep.subr.bf16.mxu0 %v5925_v6  ;;  %5012 = vmatprep.subr.bf16.mxu1 %v5700_v0 }
 0xa77   : > { %v2048_v37 = vpop.f32.mrb[18].mxu0  ;;  %v2119_v38 = vpop.f32.mrb[18].mxu1 }
 0xa78   : > { %v2123_v39 = vadd.f32 %v3477_v34, %v2048_v37  ;;  %v2050_v41 = vpop.f32.mrb[19].mxu0  ;;  %v4153_v43 = vpop.f32.mrb[19].mxu1  ;;  %v2137_v54 = vadd.f32 %v6414_v25, %v2119_v38 }
 0xa79   : > { %v2130_v48 = vadd.f32 %v3478_v40, %v2050_v41 }
 0xa7a   : > { %v3480_v47 = vmul.f32 -1.442695, %v2123_v39 }
 0xa7b   : > { %v3481_v49 = vmul.f32 -1.442695, %v2130_v48 }
 0xa7c   : > { %5443 = vpow2.f32 %v3480_v47  ;;  %v3486_v47 = vld [vmem:[%s5909_s9 + $0x100] sm:$0xff] }
 0xa7d   : > { %5445 = vpow2.f32 %v3481_v49 }
 0xa86   : > { %v5444_v45 = vpop.eup %5443 }
 0xa87   : > { %v2127_v50 = vadd.f32 1.0, %v5444_v45  ;;  %v5446_v2 = vpop.eup %5445 }
 0xa88   : > { %v2134_v52 = vadd.f32 1.0, %v5446_v2 }
 0xa89   : > { %5447 = vrcp.f32 %v2127_v50 }
 0xa8a   : > { %5449 = vrcp.f32 %v2134_v52 }
 0xa93   : > { %v5448_v56 = vpop.eup %5447 }
 0xa94   : > { %v2138_v51 = vmul.f32 %v5448_v56, %v2137_v54  ;;  %v5450_v60 = vpop.eup %5449  ;;  %v2330_v56 = vpop.permute.xlu0 %2329 }
 0xa95   : > { %v2141_v61 = vsub.f32 1.0, %v5450_v60  ;;  %v2143_v5 = vmul.f32 %v5450_v60, %v6466_v31  ;;  %vm2331_vm12 = vcmp.eq.s32.totalorder %v2330_v56, 1  ;;  %v3491_v60 = vld [vmem:[%s5909_s9 + $0x108] sm:$0xff] }
 0xa96   : > { %v2139_v59 = vadd.f32 %v3479_v58, %v2138_v51 }
 0xa98   : > { %5451 = vtanh.f32 %v2139_v59 }
 0xaa2   : > { %v5452_v62 = vpop.eup %5451 }
 0xaa3   : > { %v2142_v3 = vmul.f32 %v5452_v62, %v2141_v61 }
 0xaa5   : > { %v2144_v9 = vadd.f32 %v2143_v5, %v2142_v3  ;;  %v3492_v5 = vld [vmem:[%s5909_s9 + $0x110] sm:$0xff] }
 0xaa7   : > { %v6512_v12 = vsel %vm2152_vm11, %v2144_v9, %v6466_v31  ;;  %v2154_v15 = vsel %vm2152_vm11, %v2144_v9, 0.0 }
 0xaa8   : > { %3483 = vst [vmem:[%s6078_s26 + $0x48] sm:$0xff] %v2154_v15  ;;  %2226 = vmatmul.mubr.f32.vlgmr.msra.gmra.mrb[20].mxu0 %v6512_v12  ;;  %4187 = vmatmul.mubr.f32.vlgmr.msra.gmra.mrb[20].mxu1 %v6512_v12 }
 0xaa9   : > { %4983 = vmatpush1.bf16.msra.mxu0 %v5927_v10  ;;  %5014 = vmatpush3.bf16.msra.mxu1 %v5946_v30 }
 0xaaa   : > { %4985 = vmatprep.subr.bf16.mxu0 %v5929_v11  ;;  %5015 = vmatprep.subr.bf16.mxu1 %v5700_v0 }
 0xaab   : > { %2404 = vmatprep.mubr.f32.mxu0 %v5701_v1  ;;  %4221 = vmatprep.mubr.msk.f32.mxu1 %vm5702_vm0, %v5701_v1 }
 0xaad   : > { %4987 = vmatpush1.bf16.msra.mxu0 %v5934_v16  ;;  %5017 = vmatpush3.bf16.msra.mxu1 %v5952_v35 }
 0xaae   : > { %4989 = vmatprep.subr.bf16.mxu0 %v5937_v17  ;;  %5018 = vmatprep.subr.bf16.mxu1 %v5700_v0 }
 0xab1   : > { %4991 = vmatpush1.bf16.msra.mxu0 %v5941_v22  ;;  %5020 = vmatpush3.bf16.msra.mxu1 %v5965_v44 }
 0xab2   : > { %4993 = vmatprep.subr.bf16.mxu0 %v5944_v24  ;;  %5021 = vmatprep.subr.bf16.mxu1 %v5700_v0 }
 0xab5   : > { %4995 = vmatpush1.bf16.msra.mxu0 %v5949_v33  ;;  %5023 = vmatpush3.bf16.msra.mxu1 %v5980_v55 }
 0xab6   : > { %4997 = vmatprep.subr.bf16.mxu0 %v5955_v36  ;;  %5024 = vmatprep.subr.bf16.mxu1 %v5700_v0 }
 0xab9   : > { %4999 = vmatpush1.bf16.msra.mxu0 %v5962_v42  ;;  %5026 = vmatpush3.bf16.msra.mxu1 %v5992_v4 }
 0xaba   : > { %5001 = vmatprep.subr.bf16.mxu0 %v5970_v46  ;;  %5027 = vmatprep.subr.bf16.mxu1 %v5700_v0 }
 0xabd   : > { %5003 = vmatpush1.bf16.msra.mxu0 %v5977_v53  ;;  %5029 = vmatpush3.bf16.msra.mxu1 %v6004_v14 }
 0xabe   : > { %5005 = vmatprep.subr.bf16.mxu0 %v5984_v57  ;;  %5030 = vmatprep.subr.bf16.mxu1 %v5700_v0 }
 0xac1   : > { %5007 = vmatpush1.bf16.msra.mxu0 %v5989_v63  ;;  %5032 = vmatpush3.bf16.msra.mxu1 %v6012_v20 }
 0xac2   : > { %5009 = vmatprep.subr.bf16.mxu0 %v5996_v7  ;;  %5033 = vmatprep.subr.bf16.mxu1 %v5700_v0 }
 0xac5   : > { %5011 = vmatpush1.bf16.msra.mxu0 %v6001_v13  ;;  %5035 = vmatpush3.bf16.msra.mxu1 %v6020_v26 }
 0xac6   : > { %5037 = vmatprep.subr.bf16.mxu0 %v5925_v6  ;;  %5068 = vmatprep.subr.bf16.mxu1 %v5700_v0 }
 0xb7b   : > { %v2227_v19 = vpop.f32.mrb[20].mxu0  ;;  %v2298_v21 = vpop.f32.mrb[20].mxu1 }
 0xb7c   : > { %v2302_v23 = vadd.f32 %v3484_v18, %v2227_v19  ;;  %v2229_v28 = vpop.f32.mrb[21].mxu0  ;;  %v4188_v29 = vpop.f32.mrb[21].mxu1  ;;  %v2316_v41 = vadd.f32 %v6414_v25, %v2298_v21 }
 0xb7d   : > { %v2309_v32 = vadd.f32 %v3485_v27, %v2229_v28 }
 0xb7e   : > { %v3487_v31 = vmul.f32 -1.442695, %v2302_v23 }
 0xb7f   : > { %v3488_v34 = vmul.f32 -1.442695, %v2309_v32 }
 0xb80   : > { %5453 = vpow2.f32 %v3487_v31  ;;  %v3493_v31 = vld [vmem:[%s5909_s9 + $0x118] sm:$0xff] }
 0xb81   : > { %5455 = vpow2.f32 %v3488_v34 }
 0xb8a   : > { %v5454_v37 = vpop.eup %5453 }
 0xb8b   : > { %v2306_v38 = vadd.f32 1.0, %v5454_v37  ;;  %v5456_v39 = vpop.eup %5455 }
 0xb8c   : > { %v2313_v40 = vadd.f32 1.0, %v5456_v39 }
 0xb8d   : > { %5457 = vrcp.f32 %v2306_v38 }
 0xb8e   : > { %5459 = vrcp.f32 %v2313_v40 }
 0xb97   : > { %v5458_v43 = vpop.eup %5457 }
 0xb98   : > { %v2317_v48 = vmul.f32 %v5458_v43, %v2316_v41  ;;  %v5460_v45 = vpop.eup %5459  ;;  %v2509_v43 = vpop.permute.xlu1 %2508 }
 0xb99   : > { %v2320_v50 = vsub.f32 1.0, %v5460_v45  ;;  %v2322_v54 = vmul.f32 %v5460_v45, %v6512_v12  ;;  %vm2510_vm13 = vcmp.eq.s32.totalorder %v2509_v43, 1  ;;  %v3498_v45 = vld [vmem:[%s5909_s9 + $0x120] sm:$0xff] }
 0xb9a   : > { %v2318_v49 = vadd.f32 %v3486_v47, %v2317_v48 }
 0xb9c   : > { %5461 = vtanh.f32 %v2318_v49 }
 0xba6   : > { %v5462_v2 = vpop.eup %5461 }
 0xba7   : > { %v2321_v52 = vmul.f32 %v5462_v2, %v2320_v50 }
 0xba9   : > { %v2323_v58 = vadd.f32 %v2322_v54, %v2321_v52  ;;  %v3499_v54 = vld [vmem:[%s5909_s9 + $0x128] sm:$0xff] }
 0xbab   : > { %v6558_v51 = vsel %vm2331_vm12, %v2323_v58, %v6512_v12  ;;  %v2333_v59 = vsel %vm2331_vm12, %v2323_v58, 0.0 }
 0xbac   : > { %3490 = vst [vmem:[%s6078_s26 + $0x50] sm:$0xff] %v2333_v59  ;;  %2405 = vmatmul.mubr.f32.vlgmr.msra.gmra.mrb[22].mxu0 %v6558_v51  ;;  %4222 = vmatmul.mubr.f32.vlgmr.msra.gmra.mrb[22].mxu1 %v6558_v51 }
 0xbad   : > { %5039 = vmatpush1.bf16.msra.mxu0 %v5927_v10  ;;  %5070 = vmatpush3.bf16.msra.mxu1 %v5946_v30 }
 0xbae   : > { %5041 = vmatprep.subr.bf16.mxu0 %v5929_v11  ;;  %5071 = vmatprep.subr.bf16.mxu1 %v5700_v0 }
 0xbaf   : > { %2583 = vmatprep.mubr.f32.mxu0 %v5701_v1  ;;  %4256 = vmatprep.mubr.msk.f32.mxu1 %vm5702_vm0, %v5701_v1 }
 0xbb1   : > { %5043 = vmatpush1.bf16.msra.mxu0 %v5934_v16  ;;  %5073 = vmatpush3.bf16.msra.mxu1 %v5952_v35 }
 0xbb2   : > { %5045 = vmatprep.subr.bf16.mxu0 %v5937_v17  ;;  %5074 = vmatprep.subr.bf16.mxu1 %v5700_v0 }
 0xbb5   : > { %5047 = vmatpush1.bf16.msra.mxu0 %v5941_v22  ;;  %5076 = vmatpush3.bf16.msra.mxu1 %v5965_v44 }
 0xbb6   : > { %5049 = vmatprep.subr.bf16.mxu0 %v5944_v24  ;;  %5077 = vmatprep.subr.bf16.mxu1 %v5700_v0 }
 0xbb9   : > { %5051 = vmatpush1.bf16.msra.mxu0 %v5949_v33  ;;  %5079 = vmatpush3.bf16.msra.mxu1 %v5980_v55 }
 0xbba   : > { %5053 = vmatprep.subr.bf16.mxu0 %v5955_v36  ;;  %5080 = vmatprep.subr.bf16.mxu1 %v5700_v0 }
 0xbbd   : > { %5055 = vmatpush1.bf16.msra.mxu0 %v5962_v42  ;;  %5082 = vmatpush3.bf16.msra.mxu1 %v5992_v4 }
 0xbbe   : > { %5057 = vmatprep.subr.bf16.mxu0 %v5970_v46  ;;  %5083 = vmatprep.subr.bf16.mxu1 %v5700_v0 }
 0xbc1   : > { %5059 = vmatpush1.bf16.msra.mxu0 %v5977_v53  ;;  %5085 = vmatpush3.bf16.msra.mxu1 %v6004_v14 }
 0xbc2   : > { %5061 = vmatprep.subr.bf16.mxu0 %v5984_v57  ;;  %5086 = vmatprep.subr.bf16.mxu1 %v5700_v0 }
 0xbc5   : > { %5063 = vmatpush1.bf16.msra.mxu0 %v5989_v63  ;;  %5088 = vmatpush3.bf16.msra.mxu1 %v6012_v20 }
 0xbc6   : > { %5065 = vmatprep.subr.bf16.mxu0 %v5996_v7  ;;  %5089 = vmatprep.subr.bf16.mxu1 %v5700_v0 }
 0xbc9   : > { %5067 = vmatpush1.bf16.msra.mxu0 %v6001_v13  ;;  %5091 = vmatpush3.bf16.msra.mxu1 %v6020_v26 }
 0xbca   : > { %5093 = vmatprep.subr.bf16.mxu0 %v5925_v6  ;;  %5124 = vmatprep.subr.bf16.mxu1 %v5700_v0 }
 0xc7f   : > { %v2406_v61 = vpop.f32.mrb[22].mxu0  ;;  %v2477_v62 = vpop.f32.mrb[22].mxu1 }
 0xc80   : > { %v2481_v3 = vadd.f32 %v3491_v60, %v2406_v61  ;;  %v2408_v8 = vpop.f32.mrb[23].mxu0  ;;  %v4223_v9 = vpop.f32.mrb[23].mxu1  ;;  %v2495_v28 = vadd.f32 %v6414_v25, %v2477_v62 }
 0xc81   : > { %v2488_v15 = vadd.f32 %v3492_v5, %v2408_v8 }
 0xc82   : > { %v3494_v12 = vmul.f32 -1.442695, %v2481_v3 }
 0xc83   : > { %v3495_v18 = vmul.f32 -1.442695, %v2488_v15 }
 0xc84   : > { %5463 = vpow2.f32 %v3494_v12  ;;  %v3500_v12 = vld [vmem:[%s5909_s9 + $0x130] sm:$0xff] }
 0xc85   : > { %5465 = vpow2.f32 %v3495_v18 }
 0xc8e   : > { %v5464_v19 = vpop.eup %5463 }
 0xc8f   : > { %v2485_v21 = vadd.f32 1.0, %v5464_v19  ;;  %v5466_v23 = vpop.eup %5465 }
 0xc90   : > { %v2492_v27 = vadd.f32 1.0, %v5466_v23 }
 0xc91   : > { %5467 = vrcp.f32 %v2485_v21 }
 0xc92   : > { %5469 = vrcp.f32 %v2492_v27 }
 0xc9b   : > { %v5468_v29 = vpop.eup %5467 }
 0xc9c   : > { %v2496_v32 = vmul.f32 %v5468_v29, %v2495_v28  ;;  %v5470_v37 = vpop.eup %5469  ;;  %v2688_v29 = vpop.permute.xlu0 %2687 }
 0xc9d   : > { %v2499_v38 = vsub.f32 1.0, %v5470_v37  ;;  %v2501_v41 = vmul.f32 %v5470_v37, %v6558_v51  ;;  %vm2689_vm14 = vcmp.eq.s32.totalorder %v2688_v29, 1  ;;  %v3505_v37 = vld [vmem:[%s5909_s9 + $0x138] sm:$0xff]  ;;  %v3520_v29 = vld [vmem:[%s5909_s9 + $0x170] sm:$0xff] }
 0xc9e   : > { %v2497_v34 = vadd.f32 %v3493_v31, %v2496_v32 }
 0xca0   : > { %5471 = vtanh.f32 %v2497_v34 }
 0xcaa   : > { %v5472_v39 = vpop.eup %5471 }
 0xcab   : > { %v2500_v40 = vmul.f32 %v5472_v39, %v2499_v38 }
 0xcad   : > { %v2502_v47 = vadd.f32 %v2501_v41, %v2500_v40  ;;  %v3506_v41 = vld [vmem:[%s5909_s9 + $0x140] sm:$0xff] }
 0xcaf   : > { %v6604_v48 = vsel %vm2510_vm13, %v2502_v47, %v6558_v51  ;;  %v2512_v49 = vsel %vm2510_vm13, %v2502_v47, 0.0 }
 0xcb0   : > { %3497 = vst [vmem:[%s6078_s26 + $0x58] sm:$0xff] %v2512_v49  ;;  %2584 = vmatmul.mubr.f32.vlgmr.msra.gmra.mrb[24].mxu0 %v6604_v48  ;;  %4257 = vmatmul.mubr.f32.vlgmr.msra.gmra.mrb[24].mxu1 %v6604_v48 }
 0xcb1   : > { %5095 = vmatpush1.bf16.msra.mxu0 %v5927_v10  ;;  %5126 = vmatpush3.bf16.msra.mxu1 %v5946_v30 }
 0xcb2   : > { %5097 = vmatprep.subr.bf16.mxu0 %v5929_v11  ;;  %5127 = vmatprep.subr.bf16.mxu1 %v5700_v0 }
 0xcb3   : > { %2762 = vmatprep.mubr.f32.mxu0 %v5701_v1  ;;  %4291 = vmatprep.mubr.msk.f32.mxu1 %vm5702_vm0, %v5701_v1 }
 0xcb5   : > { %5099 = vmatpush1.bf16.msra.mxu0 %v5934_v16  ;;  %5129 = vmatpush3.bf16.msra.mxu1 %v5952_v35 }
 0xcb6   : > { %5101 = vmatprep.subr.bf16.mxu0 %v5937_v17  ;;  %5130 = vmatprep.subr.bf16.mxu1 %v5700_v0 }
 0xcb9   : > { %5103 = vmatpush1.bf16.msra.mxu0 %v5941_v22  ;;  %5132 = vmatpush3.bf16.msra.mxu1 %v5965_v44 }
 0xcba   : > { %5105 = vmatprep.subr.bf16.mxu0 %v5944_v24  ;;  %5133 = vmatprep.subr.bf16.mxu1 %v5700_v0 }
 0xcbd   : > { %5107 = vmatpush1.bf16.msra.mxu0 %v5949_v33  ;;  %5135 = vmatpush3.bf16.msra.mxu1 %v5980_v55 }
 0xcbe   : > { %5109 = vmatprep.subr.bf16.mxu0 %v5955_v36  ;;  %5136 = vmatprep.subr.bf16.mxu1 %v5700_v0 }
 0xcc1   : > { %5111 = vmatpush1.bf16.msra.mxu0 %v5962_v42  ;;  %5138 = vmatpush3.bf16.msra.mxu1 %v5992_v4 }
 0xcc2   : > { %5113 = vmatprep.subr.bf16.mxu0 %v5970_v46  ;;  %5139 = vmatprep.subr.bf16.mxu1 %v5700_v0 }
 0xcc5   : > { %5115 = vmatpush1.bf16.msra.mxu0 %v5977_v53  ;;  %5141 = vmatpush3.bf16.msra.mxu1 %v6004_v14 }
 0xcc6   : > { %5117 = vmatprep.subr.bf16.mxu0 %v5984_v57  ;;  %5142 = vmatprep.subr.bf16.mxu1 %v5700_v0 }
 0xcc9   : > { %5119 = vmatpush1.bf16.msra.mxu0 %v5989_v63  ;;  %5144 = vmatpush3.bf16.msra.mxu1 %v6012_v20 }
 0xcca   : > { %5121 = vmatprep.subr.bf16.mxu0 %v5996_v7  ;;  %5145 = vmatprep.subr.bf16.mxu1 %v5700_v0 }
 0xccd   : > { %5123 = vmatpush1.bf16.msra.mxu0 %v6001_v13  ;;  %5147 = vmatpush3.bf16.msra.mxu1 %v6020_v26 }
 0xcce   : > { %5149 = vmatprep.subr.bf16.mxu0 %v5925_v6  ;;  %5180 = vmatprep.subr.bf16.mxu1 %v5700_v0 }
 0xd83   : > { %v2585_v50 = vpop.f32.mrb[24].mxu0  ;;  %v2656_v2 = vpop.f32.mrb[24].mxu1 }
 0xd84   : > { %v2660_v52 = vadd.f32 %v3498_v45, %v2585_v50  ;;  %v2587_v56 = vpop.f32.mrb[25].mxu0  ;;  %v4258_v58 = vpop.f32.mrb[25].mxu1  ;;  %v2674_v8 = vadd.f32 %v6414_v25, %v2656_v2 }
 0xd85   : > { %v2667_v59 = vadd.f32 %v3499_v54, %v2587_v56  ;;  %v3507_v58 = vld [vmem:[%s5909_s9 + $0x148] sm:$0xff] }
 0xd86   : > { %v3501_v51 = vmul.f32 -1.442695, %v2660_v52 }
 0xd87   : > { %v3502_v60 = vmul.f32 -1.442695, %v2667_v59 }
 0xd88   : > { %5473 = vpow2.f32 %v3501_v51 }
 0xd89   : > { %5475 = vpow2.f32 %v3502_v60 }
 0xd92   : > { %v5474_v61 = vpop.eup %5473 }
 0xd93   : > { %v2664_v62 = vadd.f32 1.0, %v5474_v61  ;;  %v5476_v3 = vpop.eup %5475 }
 0xd94   : > { %v2671_v5 = vadd.f32 1.0, %v5476_v3 }
 0xd95   : > { %5477 = vrcp.f32 %v2664_v62 }
 0xd96   : > { %5479 = vrcp.f32 %v2671_v5 }
 0xd9f   : > { %v5478_v9 = vpop.eup %5477 }
 0xda0   : > { %v2675_v15 = vmul.f32 %v5478_v9, %v2674_v8  ;;  %v5480_v19 = vpop.eup %5479  ;;  %v2867_v8 = vpop.permute.xlu1 %2866 }
 0xda1   : > { %v2678_v21 = vsub.f32 1.0, %v5480_v19  ;;  %v2680_v28 = vmul.f32 %v5480_v19, %v6604_v48  ;;  %vm2868_vm15 = vcmp.eq.s32.totalorder %v2867_v8, 1 }
 0xda2   : > { %v2676_v18 = vadd.f32 %v3500_v12, %v2675_v15 }
 0xda4   : > { %5481 = vtanh.f32 %v2676_v18 }
 0xdae   : > { %v5482_v23 = vpop.eup %5481 }
 0xdaf   : > { %v2679_v27 = vmul.f32 %v5482_v23, %v2678_v21  ;;  %v3519_v21 = vld [vmem:[%s5909_s9 + $0x168] sm:$0xff] }
 0xdb1   : > { %v2681_v31 = vadd.f32 %v2680_v28, %v2679_v27 }
 0xdb3   : > { %v6650_v32 = vsel %vm2689_vm14, %v2681_v31, %v6604_v48  ;;  %v2691_v34 = vsel %vm2689_vm14, %v2681_v31, 0.0 }
 0xdb4   : > { %3504 = vst [vmem:[%s6078_s26 + $0x60] sm:$0xff] %v2691_v34  ;;  %2763 = vmatmul.mubr.f32.vlgmr.msra.gmra.mrb[26].mxu0 %v6650_v32  ;;  %4292 = vmatmul.mubr.f32.vlgmr.msra.gmra.mrb[26].mxu1 %v6650_v32 }
 0xdb5   : > { %5151 = vmatpush1.bf16.msra.mxu0 %v5927_v10  ;;  %5182 = vmatpush3.bf16.msra.mxu1 %v5946_v30 }
 0xdb6   : > { %5153 = vmatprep.subr.bf16.mxu0 %v5929_v11  ;;  %5183 = vmatprep.subr.bf16.mxu1 %v5700_v0 }
 0xdb7   : > { %2941 = vmatprep.mubr.f32.mxu0 %v5701_v1  ;;  %4326 = vmatprep.mubr.msk.f32.mxu1 %vm5702_vm0, %v5701_v1 }
 0xdb9   : > { %5155 = vmatpush1.bf16.msra.mxu0 %v5934_v16  ;;  %5185 = vmatpush3.bf16.msra.mxu1 %v5952_v35 }
 0xdba   : > { %5157 = vmatprep.subr.bf16.mxu0 %v5937_v17  ;;  %5186 = vmatprep.subr.bf16.mxu1 %v5700_v0 }
 0xdbd   : > { %5159 = vmatpush1.bf16.msra.mxu0 %v5941_v22  ;;  %5188 = vmatpush3.bf16.msra.mxu1 %v5965_v44 }
 0xdbe   : > { %5161 = vmatprep.subr.bf16.mxu0 %v5944_v24  ;;  %5189 = vmatprep.subr.bf16.mxu1 %v5700_v0 }
 0xdc1   : > { %5163 = vmatpush1.bf16.msra.mxu0 %v5949_v33  ;;  %5191 = vmatpush3.bf16.msra.mxu1 %v5980_v55 }
 0xdc2   : > { %5165 = vmatprep.subr.bf16.mxu0 %v5955_v36  ;;  %5192 = vmatprep.subr.bf16.mxu1 %v5700_v0 }
 0xdc5   : > { %5167 = vmatpush1.bf16.msra.mxu0 %v5962_v42  ;;  %5194 = vmatpush3.bf16.msra.mxu1 %v5992_v4 }
 0xdc6   : > { %5169 = vmatprep.subr.bf16.mxu0 %v5970_v46  ;;  %5195 = vmatprep.subr.bf16.mxu1 %v5700_v0 }
 0xdc9   : > { %5171 = vmatpush1.bf16.msra.mxu0 %v5977_v53  ;;  %5197 = vmatpush3.bf16.msra.mxu1 %v6004_v14 }
 0xdca   : > { %5173 = vmatprep.subr.bf16.mxu0 %v5984_v57  ;;  %5198 = vmatprep.subr.bf16.mxu1 %v5700_v0 }
 0xdcd   : > { %5175 = vmatpush1.bf16.msra.mxu0 %v5989_v63  ;;  %5200 = vmatpush3.bf16.msra.mxu1 %v6012_v20 }
 0xdce   : > { %5177 = vmatprep.subr.bf16.mxu0 %v5996_v7  ;;  %5201 = vmatprep.subr.bf16.mxu1 %v5700_v0 }
 0xdd1   : > { %5179 = vmatpush1.bf16.msra.mxu0 %v6001_v13  ;;  %5203 = vmatpush3.bf16.msra.mxu1 %v6020_v26 }
 0xdd2   : > { %5205 = vmatprep.subr.bf16.mxu0 %v5925_v6  ;;  %5236 = vmatprep.subr.bf16.mxu1 %v5700_v0 }
 0xe87   : > { %v2764_v38 = vpop.f32.mrb[26].mxu0  ;;  %v2835_v39 = vpop.f32.mrb[26].mxu1 }
 0xe88   : > { %v2839_v40 = vadd.f32 %v3505_v37, %v2764_v38  ;;  %v2766_v43 = vpop.f32.mrb[27].mxu0  ;;  %v4293_v47 = vpop.f32.mrb[27].mxu1  ;;  %v2853_v54 = vadd.f32 %v6414_v25, %v2835_v39 }
 0xe89   : > { %v2846_v49 = vadd.f32 %v3506_v41, %v2766_v43  ;;  %v5514_v47 = vld [vmem:[%s6837_s3] ss:$0 sm:$0xff] }
 0xe8a   : > { %v3508_v48 = vmul.f32 -1.442695, %v2839_v40 }
 0xe8b   : > { %v3509_v45 = vmul.f32 -1.442695, %v2846_v49 }
 0xe8c   : > { %5483 = vpow2.f32 %v3508_v48 }
 0xe8d   : > { %5485 = vpow2.f32 %v3509_v45  ;;  %v3521_v45 = vld [vmem:[%s5909_s9 + $0x178] sm:$0xff] }
 0xe96   : > { %v5484_v50 = vpop.eup %5483 }
 0xe97   : > { %v2843_v2 = vadd.f32 1.0, %v5484_v50  ;;  %v5486_v52 = vpop.eup %5485 }
 0xe98   : > { %v2850_v6 = vadd.f32 1.0, %v5486_v52 }
 0xe99   : > { %5487 = vrcp.f32 %v2843_v2 }
 0xe9a   : > { %5489 = vrcp.f32 %v2850_v6 }
 0xea3   : > { %v5488_v56 = vpop.eup %5487 }
 0xea4   : > { %v2854_v51 = vmul.f32 %v5488_v56, %v2853_v54  ;;  %v5490_v60 = vpop.eup %5489  ;;  %v3225_v56 = vpop.permute.xlu1 %3224 }
 0xea5   : > { %v2857_v61 = vsub.f32 1.0, %v5490_v60  ;;  %v2859_v5 = vmul.f32 %v5490_v60, %v6650_v32  ;;  %vm3226_vm1 = vcmp.eq.s32.totalorder %v3225_v56, 1 }
 0xea6   : > { %v2855_v59 = vadd.f32 %v3507_v58, %v2854_v51 }
 0xea8   : > { %5491 = vtanh.f32 %v2855_v59 }
 0xeb2   : > { %v5492_v62 = vpop.eup %5491 }
 0xeb3   : > { %v2858_v3 = vmul.f32 %v5492_v62, %v2857_v61 }
 0xeb5   : > { %v2860_v9 = vadd.f32 %v2859_v5, %v2858_v3 }
 0xeb7   : > { %v6696_v12 = vsel %vm2868_vm15, %v2860_v9, %v6650_v32  ;;  %v2870_v15 = vsel %vm2868_vm15, %v2860_v9, 0.0 }
 0xeb8   : > { %3511 = vst [vmem:[%s6078_s26 + $0x68] sm:$0xff] %v2870_v15  ;;  %2942 = vmatmul.mubr.f32.vlgmr.msra.gmra.mrb[28].mxu0 %v6696_v12  ;;  %4327 = vmatmul.mubr.f32.vlgmr.msra.gmra.mrb[28].mxu1 %v6696_v12 }
 0xeb9   : > { %5207 = vmatpush1.bf16.msra.mxu0 %v5927_v10  ;;  %5238 = vmatpush3.bf16.msra.mxu1 %v5946_v30 }
 0xeba   : > { %5209 = vmatprep.subr.bf16.mxu0 %v5929_v11  ;;  %5239 = vmatprep.subr.bf16.mxu1 %v5700_v0 }
 0xebb   : > { %3120 = vmatprep.mubr.f32.mxu0 %v5701_v1  ;;  %4361 = vmatprep.mubr.msk.f32.mxu1 %vm5702_vm0, %v5701_v1  ;;  %v3512_v1 = vld [vmem:[%s5909_s9 + $0x150] sm:$0xff] }
 0xebd   : > { %5211 = vmatpush1.bf16.msra.mxu0 %v5934_v16  ;;  %5241 = vmatpush3.bf16.msra.mxu1 %v5952_v35 }
 0xebe   : > { %5213 = vmatprep.subr.bf16.mxu0 %v5937_v17  ;;  %5242 = vmatprep.subr.bf16.mxu1 %v5700_v0  ;;  %v3513_v17 = vld [vmem:[%s5909_s9 + $0x158] sm:$0xff] }
 0xec1   : > { %5215 = vmatpush1.bf16.msra.mxu0 %v5941_v22  ;;  %5244 = vmatpush3.bf16.msra.mxu1 %v5965_v44 }
 0xec2   : > { %5217 = vmatprep.subr.bf16.mxu0 %v5944_v24  ;;  %5245 = vmatprep.subr.bf16.mxu1 %v5700_v0 }
 0xec5   : > { %5219 = vmatpush1.bf16.msra.mxu0 %v5949_v33  ;;  %5247 = vmatpush3.bf16.msra.mxu1 %v5980_v55  ;;  %v3514_v55 = vld [vmem:[%s5909_s9 + $0x160] sm:$0xff]  ;;  %s6753_s9 = scalar_lea.hbm %s6838_s4, %s3528_s23 }
 0xec6   : > { %5221 = vmatprep.subr.bf16.mxu0 %v5955_v36  ;;  %5248 = vmatprep.subr.bf16.mxu1 %v5700_v0 }
 0xec9   : > { %5223 = vmatpush1.bf16.msra.mxu0 %v5962_v42  ;;  %5250 = vmatpush3.bf16.msra.mxu1 %v5992_v4 }
 0xeca   : > { %5225 = vmatprep.subr.bf16.mxu0 %v5970_v46  ;;  %5251 = vmatprep.subr.bf16.mxu1 %v5700_v0 }
 0xecd   : > { %5227 = vmatpush1.bf16.msra.mxu0 %v5977_v53  ;;  %5253 = vmatpush3.bf16.msra.mxu1 %v6004_v14  ;;  %v3046_v14 = vpop.permute.xlu0 %3045 }
 0xece   : > { %5229 = vmatprep.subr.bf16.mxu0 %v5984_v57  ;;  %5254 = vmatprep.subr.bf16.mxu1 %v5700_v0  ;;  %vm3047_vm0 = vcmp.eq.s32.totalorder %v3046_v14, 1 }
 0xed1   : > { %5231 = vmatpush1.bf16.msra.mxu0 %v5989_v63  ;;  %5256 = vmatpush3.bf16.msra.mxu1 %v6012_v20 }
 0xed2   : > { %5233 = vmatprep.subr.bf16.mxu0 %v5996_v7  ;;  %5257 = vmatprep.subr.bf16.mxu1 %v5700_v0 }
 0xed5   : > { %5235 = vmatpush1.bf16.msra.mxu0 %v6001_v13  ;;  %5259 = vmatpush3.bf16.msra.mxu1 %v6020_v26 }
 0xf8b   : > { %v2943_v10 = vpop.f32.mrb[28].mxu0  ;;  %v3014_v11 = vpop.f32.mrb[28].mxu1 }
 0xf8c   : > { %v3018_v16 = vadd.f32 %v3512_v1, %v2943_v10  ;;  %v2945_v22 = vpop.f32.mrb[29].mxu0  ;;  %v4328_v24 = vpop.f32.mrb[29].mxu1  ;;  %v3032_v46 = vadd.f32 %v6414_v25, %v3014_v11 }
 0xf8d   : > { %v3025_v33 = vadd.f32 %v3513_v17, %v2945_v22 }
 0xf8e   : > { %v3515_v30 = vmul.f32 -1.442695, %v3018_v16 }
 0xf8f   : > { %v3516_v35 = vmul.f32 -1.442695, %v3025_v33 }
 0xf90   : > { %5493 = vpow2.f32 %v3515_v30 }
 0xf91   : > { %5495 = vpow2.f32 %v3516_v35 }
 0xf9a   : > { %v5494_v36 = vpop.eup %5493 }
 0xf9b   : > { %v3022_v42 = vadd.f32 1.0, %v5494_v36  ;;  %v5496_v0 = vpop.eup %5495 }
 0xf9c   : > { %v3029_v44 = vadd.f32 1.0, %v5496_v0 }
 0xf9d   : > { %5497 = vrcp.f32 %v3022_v42 }
 0xf9e   : > { %5499 = vrcp.f32 %v3029_v44 }
 0xfa7   : > { %v5498_v53 = vpop.eup %5497 }
 0xfa8   : > { %v3033_v57 = vmul.f32 %v5498_v53, %v3032_v46  ;;  %v5500_v4 = vpop.eup %5499 }
 0xfa9   : > { %v3036_v7 = vsub.f32 1.0, %v5500_v4  ;;  %v3038_v26 = vmul.f32 %v5500_v4, %v6696_v12 }
 0xfaa   : > { %v3034_v63 = vadd.f32 %v3514_v55, %v3033_v57 }
 0xfac   : > { %5501 = vtanh.f32 %v3034_v63 }
 0xfb6   : > { %v5502_v13 = vpop.eup %5501 }
 0xfb7   : > { %v3037_v20 = vmul.f32 %v5502_v13, %v3036_v7 }
 0xfb9   : > { %v3039_v18 = vadd.f32 %v3038_v26, %v3037_v20 }
 0xfbb   : > { %v3048_v25 = vsel %vm3047_vm0, %v3039_v18, %v6696_v12  ;;  %v3049_v19 = vsel %vm3047_vm0, %v3039_v18, 0.0 }
 0xfbc   : > { %3518 = vst [vmem:[%s6078_s26 + $0x70] sm:$0xff] %v3049_v19  ;;  %3121 = vmatmul.mubr.f32.vlgmr.msra.gmra.mrb[30].mxu0 %v3048_v25  ;;  %4362 = vmatmul.mubr.f32.vlgmr.msra.gmra.mrb[30].mxu1 %v3048_v25 }
0x108f   : > { %v3122_v23 = vpop.f32.mrb[30].mxu0  ;;  %v3193_v27 = vpop.f32.mrb[30].mxu1 }
0x1090   : > { %v3197_v28 = vadd.f32 %v3519_v21, %v3122_v23  ;;  %v3124_v31 = vpop.f32.mrb[31].mxu0  ;;  %v4363_v32 = vpop.f32.mrb[31].mxu1  ;;  %v3211_v48 = vadd.f32 %v5514_v47, %v3193_v27 }
0x1091   : > { %v3204_v37 = vadd.f32 %v3520_v29, %v3124_v31 }
0x1092   : > { %v3522_v34 = vmul.f32 -1.442695, %v3197_v28 }
0x1093   : > { %v3523_v38 = vmul.f32 -1.442695, %v3204_v37 }
0x1094   : > { %5503 = vpow2.f32 %v3522_v34 }
0x1095   : > { %5505 = vpow2.f32 %v3523_v38 }
0x109e   : > { %v5504_v39 = vpop.eup %5503 }
0x109f   : > { %v3201_v40 = vadd.f32 1.0, %v5504_v39  ;;  %v5506_v41 = vpop.eup %5505 }
0x10a0   : > { %v3208_v43 = vadd.f32 1.0, %v5506_v41 }
0x10a1   : > { %5507 = vrcp.f32 %v3201_v40 }
0x10a2   : > { %5509 = vrcp.f32 %v3208_v43 }
0x10ab   : > { %v5508_v49 = vpop.eup %5507 }
0x10ac   : > { %v3212_v50 = vmul.f32 %v5508_v49, %v3211_v48  ;;  %v5510_v52 = vpop.eup %5509 }
0x10ad   : > { %v3215_v6 = vsub.f32 1.0, %v5510_v52  ;;  %v3217_v51 = vmul.f32 %v5510_v52, %v3048_v25 }
0x10ae   : > { %v3213_v2 = vadd.f32 %v3521_v45, %v3212_v50 }
0x10b0   : > { %5511 = vtanh.f32 %v3213_v2 }
0x10ba   : > { %v5512_v54 = vpop.eup %5511 }
0x10bb   : > { %v3216_v58 = vmul.f32 %v5512_v54, %v3215_v6 }
0x10bd   : > { %v3218_v59 = vadd.f32 %v3217_v51, %v3216_v58 }
0x10bf   : > { %v3228_v60 = vsel %vm3226_vm1, %v3218_v59, 0.0  ;;  %v3227_v61 = vsel %vm3226_vm1, %v3218_v59, %v3048_v25 }
0x10c0   : > { %3525 = vst [vmem:[%s6078_s26 + $0x78] sm:$0xff] %v3228_v60  ;;  %3231 = vst [vmem:[%s300_s11] sm:$0xff] %v3227_v61 }
0x10c1   : > { %5588 = shalt.err (!%p5585_p0)
}
0x10c2   : > { %s5589_s26 = scalar_lea.hbm %s6753_s9, 2048  ;;  %s5593_s7 = scalar_lea.hbm %s6838_s4, 4096 }
0x10c3   : > { %p5590_p4 = scmp.ne.s32.totalorder %s6753_s9, %s5589_s26  ;;  %p5594_p2 = scmp.lt.u32.totalorder %s6753_s9, %s6838_s4 }
0x10c4   : > { %p5595_p9 = scmp.lt.u32.totalorder %s5593_s7, %s5589_s26  ;;  %p5597_p11 = scmp.lt.u32.totalorder %s5589_s26, %s6753_s9 }
0x10c5   : > { %p5591_p6 = pnand %p5590_p4, %p6868_p13 }
0x10c6   : > { %p5596_p10 = por %p5595_p9, %p5594_p2 }
0x10c7   : > { %p5592_p12 = pneg %p5591_p6 }
0x10c8   : > { %p5598_p5 = por %p5597_p11, %p5596_p10 }
0x10ca   : > { %p5599_p1 = pnand %p5598_p5, %p5592_p12 }
0x10cc   : > { %5602 = shalt.err (!%p5599_p1)
}
0x10cd   : > { %s5705_s16 = smov 128   ;;  %s5706_s28 = smov 256  }
0x10ce   : > { %s5707_s25 = smov 8   ;;  %s3238_s10 = scalar_lea.sflag [#allocation9], %s5905_s8 }
0x10cf   : > { %5269 = dma.vmem_to_hbm [thread:$0]  (%p6868_p13), %s6755_s27, 2048, %s6753_s9, %s3233_s15, %s5705_s16, %s5706_s28, %s5707_s25  }
0x10d0   : > { %s5603_s24 = scalar_lea.vmem %s6762_s21, 128  ;;  %s5708_s26 = smov [#allocation8]  }
0x10d1   : > { %p5604_p3 = scmp.ne.s32.totalorder %s6762_s21, %s5603_s24  ;;  %s5607_s23 = sshll.u32 %s5708_s26, 4  ;;  %s5608_s23 = int_to_ptr.vmem [resolvable:$false] %s5607_s23 }
0x10d2   : > { %s5609_s29 = scalar_lea.vmem %s5608_s23, 256  ;;  %p5610_p0 = scmp.lt.s32.totalorder %s6762_s21, %s5608_s23 }
0x10d3   : > { %p5605_p7 = pnand %p5604_p3, %p6868_p13  ;;  %p5611_p4 = scmp.lt.s32.totalorder %s5609_s29, %s5603_s24 }
0x10d5   : > { %p5606_p8 = pneg %p5605_p7  ;;  %p5612_p6 = por %p5611_p4, %p5610_p0 }
0x10d7   : > { %p5613_p12 = pnand %p5612_p6, %p5606_p8 }
0x10d9   : > { %5616 = shalt.err (!%p5613_p12)
}
0x10da   : > { %s5617_s8 = scalar_lea.hbm %s6760_s17, 128  ;;  %s5621_s15 = scalar_lea.hbm %s6839_s5, 256 }
0x10db   : > { %p5618_p2 = scmp.ne.s32.totalorder %s6760_s17, %s5617_s8  ;;  %p5622_p11 = scmp.lt.u32.totalorder %s6760_s17, %s6839_s5 }
0x10dc   : > { %p5623_p5 = scmp.lt.u32.totalorder %s5621_s15, %s5617_s8  ;;  %p5625_p3 = scmp.lt.u32.totalorder %s5617_s8, %s6760_s17 }
0x10dd   : > { %p5619_p9 = pnand %p5618_p2, %p6868_p13 }
0x10de   : > { %p5624_p1 = por %p5623_p5, %p5622_p11 }
0x10df   : > { %p5620_p10 = pneg %p5619_p9 }
0x10e0   : > { %p5626_p7 = por %p5625_p3, %p5624_p1 }
0x10e2   : > { %p5627_p8 = pnand %p5626_p7, %p5620_p10 }
0x10e4   : > { %5630 = shalt.err (!%p5627_p8)
}
0x10e5   : > { %5270 = dma.vmem_to_hbm [thread:$0]  (%p6868_p13), %s6762_s21, 128, %s6760_s17, %s3238_s10  }
0x10e6 PF: > { %s6869_s14 = sld [smem:[#allocation14_spill]]  ;;  %s3281_s16 = sand.u32 1, %s5673_s18  }
0x10e7   : > { %p6870_p0 = scmp.ne.s32.totalorder %s6855_s6, 0  ;;  %s3282_s28 = scalar_lea.sflag [#allocation4], %s3281_s16 }
0x10ec   : > { %p6871_p4 = scmp.ge.s32.totalorder %s6869_s14, 2 }
0x10ee   : > { %p5282_p6 = pnand %p6871_p4, %p6870_p0 }
0x10f0   : > { %5664 = dma.done.wait (!%p5282_p6), %s3282_s28, 2048  }
0x10f1   : > { %5666 = vsyncadd (!%p5282_p6), %s3282_s28, 4294965248  ;;  %s3291_s25 = scalar_lea.sflag [#allocation9], %s3281_s16 }
0x10f2   : > { %5668 = dma.done.wait (!%p5282_p6), %s3291_s25, 128  }
0x10f3   : > { %5670 = vsyncadd (!%p5282_p6), %s3291_s25, 4294967168  ;;  %s26_s23 = sadd.s32 1, %s6869_s14   ;;  %s6872_s18 = smov %s5677_s19 }
0x10f4   : > { %p23_p12 = scmp.ge.s32.totalorder %s26_s23, 4   ;;  %s6873_s19 = smov %s5681_s20 }
0x10f5   : > { %s6874_s20 = smov %s5868_s13  ;;  %s6875_s21 = smov %s5689_s22 }
0x10f6   : > { %s6876_s22 = smov %s6878_s12  ;;  %25 = sbr.rel (!%p23_p12) target bundleno = 9 (0x9), region = 139 }
0x10fd   :  { %3296 = vsyncpa [#allocation3], 1 }
0x10fe   :  { %3298 = vsyncpa [#allocation3 + $0x1], 1 }
0x10ff   :  { %3299 = vsyncpa [#allocation6], 1 }
0x1100   :  { %3300 = vsyncpa [#allocation4], 1 }
0x1101   :  { %3302 = vsyncpa [#allocation4 + $0x1], 1 }
0x1102   :  { %3303 = vsyncpa [#allocation9], 1 }
0x1103   :  { %3305 = vsyncpa [#allocation9 + $0x1], 1 }

</bundles_post_ra>
